<compile_context>
chip_gen: v7x
topology: tpu7x:2x2x1
jax: 0.10.0
libtpu: 0.0.40
codegen_flags: <defaults>
</compile_context>

<pallas_src>
import functools

import jax
import jax.numpy as jnp
from jax.experimental import pallas as pl
from jax.experimental.pallas import tpu as pltpu


# ----------------------------- Pallas kernel -------------------------------


def fused_lstm_fc_kernel(num_layers, *refs):
    """Fused multi-layer LSTM + final Linear on the last hidden state.

    Ref layout (in order):
      x_ref:                       (T, B, D)        time-major input sequence
      per layer l in [0, L):       wih_t (D_l, 4H), whh_t (H, 4H), bias (1, 4H)
      fc_wt_ref:                   (H, O)
      fc_b_ref:                    (1, O)
      out_ref:                     (B, O)           output
      gx_scr:                      (T, B, 4H)       hoisted input projection
      seq_scr:                     (T, B, H)        layer-to-layer hidden seq
      h_scr, c_scr:                (B, H)           recurrent state
    """
    x_ref = refs[0]
    layer_refs = refs[1:1 + 3 * num_layers]
    (fc_wt_ref, fc_b_ref, out_ref,
     gx_scr, seq_scr, h_scr, c_scr) = refs[1 + 3 * num_layers:]

    T = x_ref.shape[0]
    H = h_scr.shape[-1]

    for layer in range(num_layers):
        wih_t = layer_refs[3 * layer][...]       # (D_l, 4H)
        whh_t = layer_refs[3 * layer + 1][...]   # (H, 4H)
        bias = layer_refs[3 * layer + 2][...]    # (1, 4H)  (b_ih + b_hh)
        in_ref = x_ref if layer == 0 else seq_scr
        is_last = (layer == num_layers - 1)

        # -- Hoisted input projection: no serial dependence, off the critical
        #    path, bias folded in once per timestep. Unrolled so the T small
        #    matmuls can be pipelined back-to-back through the MXU.
        def proj_step(t, carry):
            gx_scr[t] = (jnp.dot(in_ref[t], wih_t,
                                 preferred_element_type=jnp.float32) + bias)
            return carry

        jax.lax.fori_loop(0, T, proj_step, 0, unroll=True)

        # -- Serial recurrence: per step only the (B,H)@(H,4H) matmul + gates.
        h_scr[...] = jnp.zeros_like(h_scr)
        c_scr[...] = jnp.zeros_like(c_scr)

        def rec_step(t, carry):
            h = h_scr[...]
            c = c_scr[...]
            gates = gx_scr[t] + jnp.dot(h, whh_t,
                                        preferred_element_type=jnp.float32)
            # Gate order [i, f, g, o] (PyTorch convention).
            i_g = jax.nn.sigmoid(gates[:, 0 * H:1 * H])
            f_g = jax.nn.sigmoid(gates[:, 1 * H:2 * H])
            g_g = jnp.tanh(gates[:, 2 * H:3 * H])
            o_g = jax.nn.sigmoid(gates[:, 3 * H:4 * H])
            c_new = f_g * c + i_g * g_g
            h_new = o_g * jnp.tanh(c_new)
            h_scr[...] = h_new
            c_scr[...] = c_new
            if not is_last:
                # Only intermediate layers need the full hidden sequence
                # (kept in VMEM; never written to HBM).
                seq_scr[t] = h_new
            return carry

        jax.lax.fori_loop(0, T, rec_step, 0, unroll=True)

    # Final FC on the last hidden state of the last layer
    # (h_scr == lstm_out[:, -1, :]).
    out_ref[...] = (jnp.dot(h_scr[...], fc_wt_ref[...],
                            preferred_element_type=jnp.float32)
                    + fc_b_ref[...])


# ------------------------------ JAX wrapper ---------------------------------


_VMEM = pl.BlockSpec(memory_space=pltpu.MemorySpace.VMEM)


@jax.jit
def lstm_model_forward(x, params):
    """x: (B, T, input_size) batch_first, like the PyTorch module."""
    B, T, _ = x.shape
    num_layers = len(params["lstm"])
    H = params["lstm"][0][1].shape[1]
    O = params["fc_w"].shape[0]

    x_tbd = jnp.transpose(x, (1, 0, 2))            # time-major (T, B, D)

    inputs = [x_tbd]
    for (w_ih, w_hh, b_ih, b_hh) in params["lstm"]:
        inputs.append(jnp.transpose(w_ih))                 # (D_l, 4H)
        inputs.append(jnp.transpose(w_hh))                 # (H, 4H)
        inputs.append((b_ih + b_hh).reshape(1, 4 * H))     # (1, 4H)
    inputs.append(jnp.transpose(params["fc_w"]))           # (H, O)
    inputs.append(params["fc_b"].reshape(1, O))            # (1, O)

    kernel = functools.partial(fused_lstm_fc_kernel, num_layers)
    return pl.pallas_call(
        kernel,
        out_shape=jax.ShapeDtypeStruct((B, O), jnp.float32),
        in_specs=[_VMEM] * len(inputs),
        out_specs=_VMEM,
        scratch_shapes=[
            pltpu.VMEM((T, B, 4 * H), jnp.float32),   # gx_scr
            pltpu.VMEM((T, B, H), jnp.float32),       # seq_scr
            pltpu.VMEM((B, H), jnp.float32),          # h_scr
            pltpu.VMEM((B, H), jnp.float32),          # c_scr
        ],
    )(*inputs)


# ------------------------- parameter initialization -------------------------


def init_params(key, input_size, hidden_size, num_layers, output_size):
    """Deterministic init mimicking PyTorch's uniform(-1/sqrt(H), 1/sqrt(H))."""
    params = {"lstm": []}
    k_lstm = 1.0 / jnp.sqrt(hidden_size)
    for layer in range(num_layers):
        d_in = input_size if layer == 0 else hidden_size
        key, k1, k2, k3, k4 = jax.random.split(key, 5)
        w_ih = jax.random.uniform(k1, (4 * hidden_size, d_in),
                                  minval=-k_lstm, maxval=k_lstm, dtype=jnp.float32)
        w_hh = jax.random.uniform(k2, (4 * hidden_size, hidden_size),
                                  minval=-k_lstm, maxval=k_lstm, dtype=jnp.float32)
        b_ih = jax.random.uniform(k3, (4 * hidden_size,),
                                  minval=-k_lstm, maxval=k_lstm, dtype=jnp.float32)
        b_hh = jax.random.uniform(k4, (4 * hidden_size,),
                                  minval=-k_lstm, maxval=k_lstm, dtype=jnp.float32)
        params["lstm"].append((w_ih, w_hh, b_ih, b_hh))
    k_fc = 1.0 / jnp.sqrt(hidden_size)
    key, k1, k2 = jax.random.split(key, 3)
    params["fc_w"] = jax.random.uniform(k1, (output_size, hidden_size),
                                        minval=-k_fc, maxval=k_fc, dtype=jnp.float32)
    params["fc_b"] = jax.random.uniform(k2, (output_size,),
                                        minval=-k_fc, maxval=k_fc, dtype=jnp.float32)
    return params


# ----------------------------- pure-JAX reference ----------------------------


def reference_forward(x, params):
    def cell(carry, x_t, w_ih, w_hh, b_ih, b_hh, H):
        h, c = carry
        gates = x_t @ w_ih.T + h @ w_hh.T + b_ih + b_hh
        i_g = jax.nn.sigmoid(gates[:, 0 * H:1 * H])
        f_g = jax.nn.sigmoid(gates[:, 1 * H:2 * H])
        g_g = jnp.tanh(gates[:, 2 * H:3 * H])
        o_g = jax.nn.sigmoid(gates[:, 3 * H:4 * H])
        c_new = f_g * c + i_g * g_g
        h_new = o_g * jnp.tanh(c_new)
        return (h_new, c_new), h_new

    B = x.shape[0]
    seq = jnp.transpose(x, (1, 0, 2))
    for (w_ih, w_hh, b_ih, b_hh) in params["lstm"]:
        H = w_hh.shape[1]
        init = (jnp.zeros((B, H), jnp.float32), jnp.zeros((B, H), jnp.float32))
        _, seq = jax.lax.scan(
            lambda carry, x_t: cell(carry, x_t, w_ih, w_hh, b_ih, b_hh, H),
            init, seq)
    last_hidden = seq[-1]
    return last_hidden @ params["fc_w"].T + params["fc_b"]


# ----------------------------------- main ------------------------------------


if __name__ == "__main__":
    batch, seq_len = 2, 8
    input_size, hidden_size, num_layers, output_size = 16, 32, 2, 4

    key = jax.random.PRNGKey(0)
    key, kx, kp = jax.random.split(key, 3)
    x = jax.random.normal(kx, (batch, seq_len, input_size), dtype=jnp.float32)
    params = init_params(kp, input_size, hidden_size, num_layers, output_size)

    out = lstm_model_forward(x, params)
    out = jax.block_until_ready(out)
    assert out.shape == (batch, output_size), out.shape

    ref = jax.block_until_ready(reference_forward(x, params))
    assert jnp.max(jnp.abs(out - ref)) < 1e-4, "mismatch vs pure-JAX reference"

    print("KERNEL_OK")
</pallas_src>

<mosaic_0001>
module attributes {stable_mosaic.version = 11 : i64} {
  func.func @fused_lstm_fc_kernel(%arg0: memref<8x2x16xf32, #tpu.memory_space<vmem>>, %arg1: memref<16x128xf32, #tpu.memory_space<vmem>>, %arg2: memref<32x128xf32, #tpu.memory_space<vmem>>, %arg3: memref<1x128xf32, #tpu.memory_space<vmem>>, %arg4: memref<32x128xf32, #tpu.memory_space<vmem>>, %arg5: memref<32x128xf32, #tpu.memory_space<vmem>>, %arg6: memref<1x128xf32, #tpu.memory_space<vmem>>, %arg7: memref<32x4xf32, #tpu.memory_space<vmem>>, %arg8: memref<1x4xf32, #tpu.memory_space<vmem>>, %arg9: memref<2x4xf32, #tpu.memory_space<vmem>>, %arg10: memref<8x2x128xf32, #tpu.memory_space<vmem>>, %arg11: memref<8x2x32xf32, #tpu.memory_space<vmem>>, %arg12: memref<2x32xf32, #tpu.memory_space<vmem>>, %arg13: memref<2x32xf32, #tpu.memory_space<vmem>>) attributes {dimension_semantics = [], scalar_prefetch = 0 : i64, scratch_operands = 4 : i64, tpu.core_type = #tpu.core_type<tc>} {
    %c0 = arith.constant 0 : index
    %c0_0 = arith.constant 0 : index
    %0 = vector.load %arg1[%c0, %c0_0] : memref<16x128xf32, #tpu.memory_space<vmem>>, vector<16x128xf32>
    %c0_1 = arith.constant 0 : index
    %c0_2 = arith.constant 0 : index
    %1 = vector.load %arg2[%c0_1, %c0_2] : memref<32x128xf32, #tpu.memory_space<vmem>>, vector<32x128xf32>
    %c0_3 = arith.constant 0 : index
    %c0_4 = arith.constant 0 : index
    %2 = vector.load %arg3[%c0_3, %c0_4] : memref<1x128xf32, #tpu.memory_space<vmem>>, vector<1x128xf32>
    %c0_i32 = arith.constant 0 : i32
    %3 = arith.index_cast %c0_i32 : i32 to index
    %c0_5 = arith.constant 0 : index
    %c0_6 = arith.constant 0 : index
    %4 = vector.load %arg0[%3, %c0_5, %c0_6] : memref<8x2x16xf32, #tpu.memory_space<vmem>>, vector<1x2x16xf32>
    %5 = vector.shape_cast %4 : vector<1x2x16xf32> to vector<2x16xf32>
    %cst = arith.constant dense<0.000000e+00> : vector<2x128xf32>
    %6 = tpu.matmul %5, %0, %cst {dimension_numbers = #tpu.dot_dimension_numbers<[1], [0], [0], [1], [0, 0, 1, 1], [], []>} : vector<2x16xf32>, vector<16x128xf32>, vector<2x128xf32> -> vector<2x128xf32>
    %7 = vector.broadcast %2 : vector<1x128xf32> to vector<2x128xf32>
    %8 = arith.addf %6, %7 : vector<2x128xf32>
    %9 = arith.index_cast %c0_i32 : i32 to index
    %c0_7 = arith.constant 0 : index
    %c0_8 = arith.constant 0 : index
    %10 = vector.load %arg10[%9, %c0_7, %c0_8] : memref<8x2x128xf32, #tpu.memory_space<vmem>>, vector<1x2x128xf32>
    %11 = vector.shape_cast %10 : vector<1x2x128xf32> to vector<2x128xf32>
    %12 = vector.shape_cast %8 : vector<2x128xf32> to vector<1x2x128xf32>
    tpu.vector_store %arg10[%9, %c0_7, %c0_8], %12 {strides = array<i32>} : memref<8x2x128xf32, #tpu.memory_space<vmem>>, vector<1x2x128xf32>,
    %c1_i32 = arith.constant 1 : i32
    %13 = arith.index_cast %c1_i32 : i32 to index
    %c0_9 = arith.constant 0 : index
    %c0_10 = arith.constant 0 : index
    %14 = vector.load %arg0[%13, %c0_9, %c0_10] : memref<8x2x16xf32, #tpu.memory_space<vmem>>, vector<1x2x16xf32>
    %15 = vector.shape_cast %14 : vector<1x2x16xf32> to vector<2x16xf32>
    %cst_11 = arith.constant dense<0.000000e+00> : vector<2x128xf32>
    %16 = tpu.matmul %15, %0, %cst_11 {dimension_numbers = #tpu.dot_dimension_numbers<[1], [0], [0], [1], [0, 0, 1, 1], [], []>} : vector<2x16xf32>, vector<16x128xf32>, vector<2x128xf32> -> vector<2x128xf32>
    %17 = vector.broadcast %2 : vector<1x128xf32> to vector<2x128xf32>
    %18 = arith.addf %16, %17 : vector<2x128xf32>
    %19 = arith.index_cast %c1_i32 : i32 to index
    %c0_12 = arith.constant 0 : index
    %c0_13 = arith.constant 0 : index
    %20 = vector.load %arg10[%19, %c0_12, %c0_13] : memref<8x2x128xf32, #tpu.memory_space<vmem>>, vector<1x2x128xf32>
    %21 = vector.shape_cast %20 : vector<1x2x128xf32> to vector<2x128xf32>
    %22 = vector.shape_cast %18 : vector<2x128xf32> to vector<1x2x128xf32>
    tpu.vector_store %arg10[%19, %c0_12, %c0_13], %22 {strides = array<i32>} : memref<8x2x128xf32, #tpu.memory_space<vmem>>, vector<1x2x128xf32>,
    %c2_i32 = arith.constant 2 : i32
    %23 = arith.index_cast %c2_i32 : i32 to index
    %c0_14 = arith.constant 0 : index
    %c0_15 = arith.constant 0 : index
    %24 = vector.load %arg0[%23, %c0_14, %c0_15] : memref<8x2x16xf32, #tpu.memory_space<vmem>>, vector<1x2x16xf32>
    %25 = vector.shape_cast %24 : vector<1x2x16xf32> to vector<2x16xf32>
    %cst_16 = arith.constant dense<0.000000e+00> : vector<2x128xf32>
    %26 = tpu.matmul %25, %0, %cst_16 {dimension_numbers = #tpu.dot_dimension_numbers<[1], [0], [0], [1], [0, 0, 1, 1], [], []>} : vector<2x16xf32>, vector<16x128xf32>, vector<2x128xf32> -> vector<2x128xf32>
    %27 = vector.broadcast %2 : vector<1x128xf32> to vector<2x128xf32>
    %28 = arith.addf %26, %27 : vector<2x128xf32>
    %29 = arith.index_cast %c2_i32 : i32 to index
    %c0_17 = arith.constant 0 : index
    %c0_18 = arith.constant 0 : index
    %30 = vector.load %arg10[%29, %c0_17, %c0_18] : memref<8x2x128xf32, #tpu.memory_space<vmem>>, vector<1x2x128xf32>
    %31 = vector.shape_cast %30 : vector<1x2x128xf32> to vector<2x128xf32>
    %32 = vector.shape_cast %28 : vector<2x128xf32> to vector<1x2x128xf32>
    tpu.vector_store %arg10[%29, %c0_17, %c0_18], %32 {strides = array<i32>} : memref<8x2x128xf32, #tpu.memory_space<vmem>>, vector<1x2x128xf32>,
    %c3_i32 = arith.constant 3 : i32
    %33 = arith.index_cast %c3_i32 : i32 to index
    %c0_19 = arith.constant 0 : index
    %c0_20 = arith.constant 0 : index
    %34 = vector.load %arg0[%33, %c0_19, %c0_20] : memref<8x2x16xf32, #tpu.memory_space<vmem>>, vector<1x2x16xf32>
    %35 = vector.shape_cast %34 : vector<1x2x16xf32> to vector<2x16xf32>
    %cst_21 = arith.constant dense<0.000000e+00> : vector<2x128xf32>
    %36 = tpu.matmul %35, %0, %cst_21 {dimension_numbers = #tpu.dot_dimension_numbers<[1], [0], [0], [1], [0, 0, 1, 1], [], []>} : vector<2x16xf32>, vector<16x128xf32>, vector<2x128xf32> -> vector<2x128xf32>
    %37 = vector.broadcast %2 : vector<1x128xf32> to vector<2x128xf32>
    %38 = arith.addf %36, %37 : vector<2x128xf32>
    %39 = arith.index_cast %c3_i32 : i32 to index
    %c0_22 = arith.constant 0 : index
    %c0_23 = arith.constant 0 : index
    %40 = vector.load %arg10[%39, %c0_22, %c0_23] : memref<8x2x128xf32, #tpu.memory_space<vmem>>, vector<1x2x128xf32>
    %41 = vector.shape_cast %40 : vector<1x2x128xf32> to vector<2x128xf32>
    %42 = vector.shape_cast %38 : vector<2x128xf32> to vector<1x2x128xf32>
    tpu.vector_store %arg10[%39, %c0_22, %c0_23], %42 {strides = array<i32>} : memref<8x2x128xf32, #tpu.memory_space<vmem>>, vector<1x2x128xf32>,
    %c4_i32 = arith.constant 4 : i32
    %43 = arith.index_cast %c4_i32 : i32 to index
    %c0_24 = arith.constant 0 : index
    %c0_25 = arith.constant 0 : index
    %44 = vector.load %arg0[%43, %c0_24, %c0_25] : memref<8x2x16xf32, #tpu.memory_space<vmem>>, vector<1x2x16xf32>
    %45 = vector.shape_cast %44 : vector<1x2x16xf32> to vector<2x16xf32>
    %cst_26 = arith.constant dense<0.000000e+00> : vector<2x128xf32>
    %46 = tpu.matmul %45, %0, %cst_26 {dimension_numbers = #tpu.dot_dimension_numbers<[1], [0], [0], [1], [0, 0, 1, 1], [], []>} : vector<2x16xf32>, vector<16x128xf32>, vector<2x128xf32> -> vector<2x128xf32>
    %47 = vector.broadcast %2 : vector<1x128xf32> to vector<2x128xf32>
    %48 = arith.addf %46, %47 : vector<2x128xf32>
    %49 = arith.index_cast %c4_i32 : i32 to index
    %c0_27 = arith.constant 0 : index
    %c0_28 = arith.constant 0 : index
    %50 = vector.load %arg10[%49, %c0_27, %c0_28] : memref<8x2x128xf32, #tpu.memory_space<vmem>>, vector<1x2x128xf32>
    %51 = vector.shape_cast %50 : vector<1x2x128xf32> to vector<2x128xf32>
    %52 = vector.shape_cast %48 : vector<2x128xf32> to vector<1x2x128xf32>
    tpu.vector_store %arg10[%49, %c0_27, %c0_28], %52 {strides = array<i32>} : memref<8x2x128xf32, #tpu.memory_space<vmem>>, vector<1x2x128xf32>,
    %c5_i32 = arith.constant 5 : i32
    %53 = arith.index_cast %c5_i32 : i32 to index
    %c0_29 = arith.constant 0 : index
    %c0_30 = arith.constant 0 : index
    %54 = vector.load %arg0[%53, %c0_29, %c0_30] : memref<8x2x16xf32, #tpu.memory_space<vmem>>, vector<1x2x16xf32>
    %55 = vector.shape_cast %54 : vector<1x2x16xf32> to vector<2x16xf32>
    %cst_31 = arith.constant dense<0.000000e+00> : vector<2x128xf32>
    %56 = tpu.matmul %55, %0, %cst_31 {dimension_numbers = #tpu.dot_dimension_numbers<[1], [0], [0], [1], [0, 0, 1, 1], [], []>} : vector<2x16xf32>, vector<16x128xf32>, vector<2x128xf32> -> vector<2x128xf32>
    %57 = vector.broadcast %2 : vector<1x128xf32> to vector<2x128xf32>
    %58 = arith.addf %56, %57 : vector<2x128xf32>
    %59 = arith.index_cast %c5_i32 : i32 to index
    %c0_32 = arith.constant 0 : index
    %c0_33 = arith.constant 0 : index
    %60 = vector.load %arg10[%59, %c0_32, %c0_33] : memref<8x2x128xf32, #tpu.memory_space<vmem>>, vector<1x2x128xf32>
    %61 = vector.shape_cast %60 : vector<1x2x128xf32> to vector<2x128xf32>
    %62 = vector.shape_cast %58 : vector<2x128xf32> to vector<1x2x128xf32>
    tpu.vector_store %arg10[%59, %c0_32, %c0_33], %62 {strides = array<i32>} : memref<8x2x128xf32, #tpu.memory_space<vmem>>, vector<1x2x128xf32>,
    %c6_i32 = arith.constant 6 : i32
    %63 = arith.index_cast %c6_i32 : i32 to index
    %c0_34 = arith.constant 0 : index
    %c0_35 = arith.constant 0 : index
    %64 = vector.load %arg0[%63, %c0_34, %c0_35] : memref<8x2x16xf32, #tpu.memory_space<vmem>>, vector<1x2x16xf32>
    %65 = vector.shape_cast %64 : vector<1x2x16xf32> to vector<2x16xf32>
    %cst_36 = arith.constant dense<0.000000e+00> : vector<2x128xf32>
    %66 = tpu.matmul %65, %0, %cst_36 {dimension_numbers = #tpu.dot_dimension_numbers<[1], [0], [0], [1], [0, 0, 1, 1], [], []>} : vector<2x16xf32>, vector<16x128xf32>, vector<2x128xf32> -> vector<2x128xf32>
    %67 = vector.broadcast %2 : vector<1x128xf32> to vector<2x128xf32>
    %68 = arith.addf %66, %67 : vector<2x128xf32>
    %69 = arith.index_cast %c6_i32 : i32 to index
    %c0_37 = arith.constant 0 : index
    %c0_38 = arith.constant 0 : index
    %70 = vector.load %arg10[%69, %c0_37, %c0_38] : memref<8x2x128xf32, #tpu.memory_space<vmem>>, vector<1x2x128xf32>
    %71 = vector.shape_cast %70 : vector<1x2x128xf32> to vector<2x128xf32>
    %72 = vector.shape_cast %68 : vector<2x128xf32> to vector<1x2x128xf32>
    tpu.vector_store %arg10[%69, %c0_37, %c0_38], %72 {strides = array<i32>} : memref<8x2x128xf32, #tpu.memory_space<vmem>>, vector<1x2x128xf32>,
    %c7_i32 = arith.constant 7 : i32
    %73 = arith.index_cast %c7_i32 : i32 to index
    %c0_39 = arith.constant 0 : index
    %c0_40 = arith.constant 0 : index
    %74 = vector.load %arg0[%73, %c0_39, %c0_40] : memref<8x2x16xf32, #tpu.memory_space<vmem>>, vector<1x2x16xf32>
    %75 = vector.shape_cast %74 : vector<1x2x16xf32> to vector<2x16xf32>
    %cst_41 = arith.constant dense<0.000000e+00> : vector<2x128xf32>
    %76 = tpu.matmul %75, %0, %cst_41 {dimension_numbers = #tpu.dot_dimension_numbers<[1], [0], [0], [1], [0, 0, 1, 1], [], []>} : vector<2x16xf32>, vector<16x128xf32>, vector<2x128xf32> -> vector<2x128xf32>
    %77 = vector.broadcast %2 : vector<1x128xf32> to vector<2x128xf32>
    %78 = arith.addf %76, %77 : vector<2x128xf32>
    %79 = arith.index_cast %c7_i32 : i32 to index
    %c0_42 = arith.constant 0 : index
    %c0_43 = arith.constant 0 : index
    %80 = vector.load %arg10[%79, %c0_42, %c0_43] : memref<8x2x128xf32, #tpu.memory_space<vmem>>, vector<1x2x128xf32>
    %81 = vector.shape_cast %80 : vector<1x2x128xf32> to vector<2x128xf32>
    %82 = vector.shape_cast %78 : vector<2x128xf32> to vector<1x2x128xf32>
    tpu.vector_store %arg10[%79, %c0_42, %c0_43], %82 {strides = array<i32>} : memref<8x2x128xf32, #tpu.memory_space<vmem>>, vector<1x2x128xf32>,
    %c8_i32 = arith.constant 8 : i32
    %cst_44 = arith.constant 0.000000e+00 : f32
    %83 = vector.broadcast %cst_44 : f32 to vector<2x32xf32>
    %c0_45 = arith.constant 0 : index
    %c0_46 = arith.constant 0 : index
    %84 = vector.load %arg12[%c0_45, %c0_46] : memref<2x32xf32, #tpu.memory_space<vmem>>, vector<2x32xf32>
    tpu.vector_store %arg12[%c0_45, %c0_46], %83 {strides = array<i32>} : memref<2x32xf32, #tpu.memory_space<vmem>>, vector<2x32xf32>,
    %cst_47 = arith.constant 0.000000e+00 : f32
    %85 = vector.broadcast %cst_47 : f32 to vector<2x32xf32>
    %c0_48 = arith.constant 0 : index
    %c0_49 = arith.constant 0 : index
    %86 = vector.load %arg13[%c0_48, %c0_49] : memref<2x32xf32, #tpu.memory_space<vmem>>, vector<2x32xf32>
    tpu.vector_store %arg13[%c0_48, %c0_49], %85 {strides = array<i32>} : memref<2x32xf32, #tpu.memory_space<vmem>>, vector<2x32xf32>,
    %c0_i32_50 = arith.constant 0 : i32
    %c0_51 = arith.constant 0 : index
    %c0_52 = arith.constant 0 : index
    %87 = vector.load %arg12[%c0_51, %c0_52] : memref<2x32xf32, #tpu.memory_space<vmem>>, vector<2x32xf32>
    %c0_53 = arith.constant 0 : index
    %c0_54 = arith.constant 0 : index
    %88 = vector.load %arg13[%c0_53, %c0_54] : memref<2x32xf32, #tpu.memory_space<vmem>>, vector<2x32xf32>
    %89 = arith.index_cast %c0_i32_50 : i32 to index
    %c0_55 = arith.constant 0 : index
    %c0_56 = arith.constant 0 : index
    %90 = vector.load %arg10[%89, %c0_55, %c0_56] : memref<8x2x128xf32, #tpu.memory_space<vmem>>, vector<1x2x128xf32>
    %91 = vector.shape_cast %90 : vector<1x2x128xf32> to vector<2x128xf32>
    %cst_57 = arith.constant dense<0.000000e+00> : vector<2x128xf32>
    %92 = tpu.matmul %87, %1, %cst_57 {dimension_numbers = #tpu.dot_dimension_numbers<[1], [0], [0], [1], [0, 0, 1, 1], [], []>} : vector<2x32xf32>, vector<32x128xf32>, vector<2x128xf32> -> vector<2x128xf32>
    %93 = arith.addf %91, %92 : vector<2x128xf32>
    %94 = vector.extract_strided_slice %93 {offsets = [0, 0], sizes = [2, 32], strides = [1, 1]} : vector<2x128xf32> to vector<2x32xf32>
    %95 = arith.negf %94 : vector<2x32xf32>
    %96 = math.exp %95 : vector<2x32xf32>
    %cst_58 = arith.constant 1.000000e+00 : f32
    %97 = vector.broadcast %cst_58 : f32 to vector<2x32xf32>
    %98 = arith.addf %97, %96 : vector<2x32xf32>
    %99 = arith.divf %97, %98 : vector<2x32xf32>
    %100 = vector.extract_strided_slice %93 {offsets = [0, 32], sizes = [2, 32], strides = [1, 1]} : vector<2x128xf32> to vector<2x32xf32>
    %101 = arith.negf %100 : vector<2x32xf32>
    %102 = math.exp %101 : vector<2x32xf32>
    %cst_59 = arith.constant 1.000000e+00 : f32
    %103 = vector.broadcast %cst_59 : f32 to vector<2x32xf32>
    %104 = arith.addf %103, %102 : vector<2x32xf32>
    %105 = arith.divf %103, %104 : vector<2x32xf32>
    %106 = vector.extract_strided_slice %93 {offsets = [0, 64], sizes = [2, 32], strides = [1, 1]} : vector<2x128xf32> to vector<2x32xf32>
    %107 = math.tanh %106 : vector<2x32xf32>
    %108 = vector.extract_strided_slice %93 {offsets = [0, 96], sizes = [2, 32], strides = [1, 1]} : vector<2x128xf32> to vector<2x32xf32>
    %109 = arith.negf %108 : vector<2x32xf32>
    %110 = math.exp %109 : vector<2x32xf32>
    %cst_60 = arith.constant 1.000000e+00 : f32
    %111 = vector.broadcast %cst_60 : f32 to vector<2x32xf32>
    %112 = arith.addf %111, %110 : vector<2x32xf32>
    %113 = arith.divf %111, %112 : vector<2x32xf32>
    %114 = arith.mulf %105, %88 : vector<2x32xf32>
    %115 = arith.mulf %99, %107 : vector<2x32xf32>
    %116 = arith.addf %114, %115 : vector<2x32xf32>
    %117 = math.tanh %116 : vector<2x32xf32>
    %118 = arith.mulf %113, %117 : vector<2x32xf32>
    %c0_61 = arith.constant 0 : index
    %c0_62 = arith.constant 0 : index
    %119 = vector.load %arg12[%c0_61, %c0_62] : memref<2x32xf32, #tpu.memory_space<vmem>>, vector<2x32xf32>
    tpu.vector_store %arg12[%c0_61, %c0_62], %118 {strides = array<i32>} : memref<2x32xf32, #tpu.memory_space<vmem>>, vector<2x32xf32>,
    %c0_63 = arith.constant 0 : index
    %c0_64 = arith.constant 0 : index
    %120 = vector.load %arg13[%c0_63, %c0_64] : memref<2x32xf32, #tpu.memory_space<vmem>>, vector<2x32xf32>
    tpu.vector_store %arg13[%c0_63, %c0_64], %116 {strides = array<i32>} : memref<2x32xf32, #tpu.memory_space<vmem>>, vector<2x32xf32>,
    %121 = arith.index_cast %c0_i32_50 : i32 to index
    %c0_65 = arith.constant 0 : index
    %c0_66 = arith.constant 0 : index
    %122 = vector.load %arg11[%121, %c0_65, %c0_66] : memref<8x2x32xf32, #tpu.memory_space<vmem>>, vector<1x2x32xf32>
    %123 = vector.shape_cast %122 : vector<1x2x32xf32> to vector<2x32xf32>
    %124 = vector.shape_cast %118 : vector<2x32xf32> to vector<1x2x32xf32>
    tpu.vector_store %arg11[%121, %c0_65, %c0_66], %124 {strides = array<i32>} : memref<8x2x32xf32, #tpu.memory_space<vmem>>, vector<1x2x32xf32>,
    %c1_i32_67 = arith.constant 1 : i32
    %c0_68 = arith.constant 0 : index
    %c0_69 = arith.constant 0 : index
    %125 = vector.load %arg12[%c0_68, %c0_69] : memref<2x32xf32, #tpu.memory_space<vmem>>, vector<2x32xf32>
    %c0_70 = arith.constant 0 : index
    %c0_71 = arith.constant 0 : index
    %126 = vector.load %arg13[%c0_70, %c0_71] : memref<2x32xf32, #tpu.memory_space<vmem>>, vector<2x32xf32>
    %127 = arith.index_cast %c1_i32_67 : i32 to index
    %c0_72 = arith.constant 0 : index
    %c0_73 = arith.constant 0 : index
    %128 = vector.load %arg10[%127, %c0_72, %c0_73] : memref<8x2x128xf32, #tpu.memory_space<vmem>>, vector<1x2x128xf32>
    %129 = vector.shape_cast %128 : vector<1x2x128xf32> to vector<2x128xf32>
    %cst_74 = arith.constant dense<0.000000e+00> : vector<2x128xf32>
    %130 = tpu.matmul %125, %1, %cst_74 {dimension_numbers = #tpu.dot_dimension_numbers<[1], [0], [0], [1], [0, 0, 1, 1], [], []>} : vector<2x32xf32>, vector<32x128xf32>, vector<2x128xf32> -> vector<2x128xf32>
    %131 = arith.addf %129, %130 : vector<2x128xf32>
    %132 = vector.extract_strided_slice %131 {offsets = [0, 0], sizes = [2, 32], strides = [1, 1]} : vector<2x128xf32> to vector<2x32xf32>
    %133 = arith.negf %132 : vector<2x32xf32>
    %134 = math.exp %133 : vector<2x32xf32>
    %cst_75 = arith.constant 1.000000e+00 : f32
    %135 = vector.broadcast %cst_75 : f32 to vector<2x32xf32>
    %136 = arith.addf %135, %134 : vector<2x32xf32>
    %137 = arith.divf %135, %136 : vector<2x32xf32>
    %138 = vector.extract_strided_slice %131 {offsets = [0, 32], sizes = [2, 32], strides = [1, 1]} : vector<2x128xf32> to vector<2x32xf32>
    %139 = arith.negf %138 : vector<2x32xf32>
    %140 = math.exp %139 : vector<2x32xf32>
    %cst_76 = arith.constant 1.000000e+00 : f32
    %141 = vector.broadcast %cst_76 : f32 to vector<2x32xf32>
    %142 = arith.addf %141, %140 : vector<2x32xf32>
    %143 = arith.divf %141, %142 : vector<2x32xf32>
    %144 = vector.extract_strided_slice %131 {offsets = [0, 64], sizes = [2, 32], strides = [1, 1]} : vector<2x128xf32> to vector<2x32xf32>
    %145 = math.tanh %144 : vector<2x32xf32>
    %146 = vector.extract_strided_slice %131 {offsets = [0, 96], sizes = [2, 32], strides = [1, 1]} : vector<2x128xf32> to vector<2x32xf32>
    %147 = arith.negf %146 : vector<2x32xf32>
    %148 = math.exp %147 : vector<2x32xf32>
    %cst_77 = arith.constant 1.000000e+00 : f32
    %149 = vector.broadcast %cst_77 : f32 to vector<2x32xf32>
    %150 = arith.addf %149, %148 : vector<2x32xf32>
    %151 = arith.divf %149, %150 : vector<2x32xf32>
    %152 = arith.mulf %143, %126 : vector<2x32xf32>
    %153 = arith.mulf %137, %145 : vector<2x32xf32>
    %154 = arith.addf %152, %153 : vector<2x32xf32>
    %155 = math.tanh %154 : vector<2x32xf32>
    %156 = arith.mulf %151, %155 : vector<2x32xf32>
    %c0_78 = arith.constant 0 : index
    %c0_79 = arith.constant 0 : index
    %157 = vector.load %arg12[%c0_78, %c0_79] : memref<2x32xf32, #tpu.memory_space<vmem>>, vector<2x32xf32>
    tpu.vector_store %arg12[%c0_78, %c0_79], %156 {strides = array<i32>} : memref<2x32xf32, #tpu.memory_space<vmem>>, vector<2x32xf32>,
    %c0_80 = arith.constant 0 : index
    %c0_81 = arith.constant 0 : index
    %158 = vector.load %arg13[%c0_80, %c0_81] : memref<2x32xf32, #tpu.memory_space<vmem>>, vector<2x32xf32>
    tpu.vector_store %arg13[%c0_80, %c0_81], %154 {strides = array<i32>} : memref<2x32xf32, #tpu.memory_space<vmem>>, vector<2x32xf32>,
    %159 = arith.index_cast %c1_i32_67 : i32 to index
    %c0_82 = arith.constant 0 : index
    %c0_83 = arith.constant 0 : index
    %160 = vector.load %arg11[%159, %c0_82, %c0_83] : memref<8x2x32xf32, #tpu.memory_space<vmem>>, vector<1x2x32xf32>
    %161 = vector.shape_cast %160 : vector<1x2x32xf32> to vector<2x32xf32>
    %162 = vector.shape_cast %156 : vector<2x32xf32> to vector<1x2x32xf32>
    tpu.vector_store %arg11[%159, %c0_82, %c0_83], %162 {strides = array<i32>} : memref<8x2x32xf32, #tpu.memory_space<vmem>>, vector<1x2x32xf32>,
    %c2_i32_84 = arith.constant 2 : i32
    %c0_85 = arith.constant 0 : index
    %c0_86 = arith.constant 0 : index
    %163 = vector.load %arg12[%c0_85, %c0_86] : memref<2x32xf32, #tpu.memory_space<vmem>>, vector<2x32xf32>
    %c0_87 = arith.constant 0 : index
    %c0_88 = arith.constant 0 : index
    %164 = vector.load %arg13[%c0_87, %c0_88] : memref<2x32xf32, #tpu.memory_space<vmem>>, vector<2x32xf32>
    %165 = arith.index_cast %c2_i32_84 : i32 to index
    %c0_89 = arith.constant 0 : index
    %c0_90 = arith.constant 0 : index
    %166 = vector.load %arg10[%165, %c0_89, %c0_90] : memref<8x2x128xf32, #tpu.memory_space<vmem>>, vector<1x2x128xf32>
    %167 = vector.shape_cast %166 : vector<1x2x128xf32> to vector<2x128xf32>
    %cst_91 = arith.constant dense<0.000000e+00> : vector<2x128xf32>
    %168 = tpu.matmul %163, %1, %cst_91 {dimension_numbers = #tpu.dot_dimension_numbers<[1], [0], [0], [1], [0, 0, 1, 1], [], []>} : vector<2x32xf32>, vector<32x128xf32>, vector<2x128xf32> -> vector<2x128xf32>
    %169 = arith.addf %167, %168 : vector<2x128xf32>
    %170 = vector.extract_strided_slice %169 {offsets = [0, 0], sizes = [2, 32], strides = [1, 1]} : vector<2x128xf32> to vector<2x32xf32>
    %171 = arith.negf %170 : vector<2x32xf32>
    %172 = math.exp %171 : vector<2x32xf32>
    %cst_92 = arith.constant 1.000000e+00 : f32
    %173 = vector.broadcast %cst_92 : f32 to vector<2x32xf32>
    %174 = arith.addf %173, %172 : vector<2x32xf32>
    %175 = arith.divf %173, %174 : vector<2x32xf32>
    %176 = vector.extract_strided_slice %169 {offsets = [0, 32], sizes = [2, 32], strides = [1, 1]} : vector<2x128xf32> to vector<2x32xf32>
    %177 = arith.negf %176 : vector<2x32xf32>
    %178 = math.exp %177 : vector<2x32xf32>
    %cst_93 = arith.constant 1.000000e+00 : f32
    %179 = vector.broadcast %cst_93 : f32 to vector<2x32xf32>
    %180 = arith.addf %179, %178 : vector<2x32xf32>
    %181 = arith.divf %179, %180 : vector<2x32xf32>
    %182 = vector.extract_strided_slice %169 {offsets = [0, 64], sizes = [2, 32], strides = [1, 1]} : vector<2x128xf32> to vector<2x32xf32>
    %183 = math.tanh %182 : vector<2x32xf32>
    %184 = vector.extract_strided_slice %169 {offsets = [0, 96], sizes = [2, 32], strides = [1, 1]} : vector<2x128xf32> to vector<2x32xf32>
    %185 = arith.negf %184 : vector<2x32xf32>
    %186 = math.exp %185 : vector<2x32xf32>
    %cst_94 = arith.constant 1.000000e+00 : f32
    %187 = vector.broadcast %cst_94 : f32 to vector<2x32xf32>
    %188 = arith.addf %187, %186 : vector<2x32xf32>
    %189 = arith.divf %187, %188 : vector<2x32xf32>
    %190 = arith.mulf %181, %164 : vector<2x32xf32>
    %191 = arith.mulf %175, %183 : vector<2x32xf32>
    %192 = arith.addf %190, %191 : vector<2x32xf32>
    %193 = math.tanh %192 : vector<2x32xf32>
    %194 = arith.mulf %189, %193 : vector<2x32xf32>
    %c0_95 = arith.constant 0 : index
    %c0_96 = arith.constant 0 : index
    %195 = vector.load %arg12[%c0_95, %c0_96] : memref<2x32xf32, #tpu.memory_space<vmem>>, vector<2x32xf32>
    tpu.vector_store %arg12[%c0_95, %c0_96], %194 {strides = array<i32>} : memref<2x32xf32, #tpu.memory_space<vmem>>, vector<2x32xf32>,
    %c0_97 = arith.constant 0 : index
    %c0_98 = arith.constant 0 : index
    %196 = vector.load %arg13[%c0_97, %c0_98] : memref<2x32xf32, #tpu.memory_space<vmem>>, vector<2x32xf32>
    tpu.vector_store %arg13[%c0_97, %c0_98], %192 {strides = array<i32>} : memref<2x32xf32, #tpu.memory_space<vmem>>, vector<2x32xf32>,
    %197 = arith.index_cast %c2_i32_84 : i32 to index
    %c0_99 = arith.constant 0 : index
    %c0_100 = arith.constant 0 : index
    %198 = vector.load %arg11[%197, %c0_99, %c0_100] : memref<8x2x32xf32, #tpu.memory_space<vmem>>, vector<1x2x32xf32>
    %199 = vector.shape_cast %198 : vector<1x2x32xf32> to vector<2x32xf32>
    %200 = vector.shape_cast %194 : vector<2x32xf32> to vector<1x2x32xf32>
    tpu.vector_store %arg11[%197, %c0_99, %c0_100], %200 {strides = array<i32>} : memref<8x2x32xf32, #tpu.memory_space<vmem>>, vector<1x2x32xf32>,
    %c3_i32_101 = arith.constant 3 : i32
    %c0_102 = arith.constant 0 : index
    %c0_103 = arith.constant 0 : index
    %201 = vector.load %arg12[%c0_102, %c0_103] : memref<2x32xf32, #tpu.memory_space<vmem>>, vector<2x32xf32>
    %c0_104 = arith.constant 0 : index
    %c0_105 = arith.constant 0 : index
    %202 = vector.load %arg13[%c0_104, %c0_105] : memref<2x32xf32, #tpu.memory_space<vmem>>, vector<2x32xf32>
    %203 = arith.index_cast %c3_i32_101 : i32 to index
    %c0_106 = arith.constant 0 : index
    %c0_107 = arith.constant 0 : index
    %204 = vector.load %arg10[%203, %c0_106, %c0_107] : memref<8x2x128xf32, #tpu.memory_space<vmem>>, vector<1x2x128xf32>
    %205 = vector.shape_cast %204 : vector<1x2x128xf32> to vector<2x128xf32>
    %cst_108 = arith.constant dense<0.000000e+00> : vector<2x128xf32>
    %206 = tpu.matmul %201, %1, %cst_108 {dimension_numbers = #tpu.dot_dimension_numbers<[1], [0], [0], [1], [0, 0, 1, 1], [], []>} : vector<2x32xf32>, vector<32x128xf32>, vector<2x128xf32> -> vector<2x128xf32>
    %207 = arith.addf %205, %206 : vector<2x128xf32>
    %208 = vector.extract_strided_slice %207 {offsets = [0, 0], sizes = [2, 32], strides = [1, 1]} : vector<2x128xf32> to vector<2x32xf32>
    %209 = arith.negf %208 : vector<2x32xf32>
    %210 = math.exp %209 : vector<2x32xf32>
    %cst_109 = arith.constant 1.000000e+00 : f32
    %211 = vector.broadcast %cst_109 : f32 to vector<2x32xf32>
    %212 = arith.addf %211, %210 : vector<2x32xf32>
    %213 = arith.divf %211, %212 : vector<2x32xf32>
    %214 = vector.extract_strided_slice %207 {offsets = [0, 32], sizes = [2, 32], strides = [1, 1]} : vector<2x128xf32> to vector<2x32xf32>
    %215 = arith.negf %214 : vector<2x32xf32>
    %216 = math.exp %215 : vector<2x32xf32>
    %cst_110 = arith.constant 1.000000e+00 : f32
    %217 = vector.broadcast %cst_110 : f32 to vector<2x32xf32>
    %218 = arith.addf %217, %216 : vector<2x32xf32>
    %219 = arith.divf %217, %218 : vector<2x32xf32>
    %220 = vector.extract_strided_slice %207 {offsets = [0, 64], sizes = [2, 32], strides = [1, 1]} : vector<2x128xf32> to vector<2x32xf32>
    %221 = math.tanh %220 : vector<2x32xf32>
    %222 = vector.extract_strided_slice %207 {offsets = [0, 96], sizes = [2, 32], strides = [1, 1]} : vector<2x128xf32> to vector<2x32xf32>
    %223 = arith.negf %222 : vector<2x32xf32>
    %224 = math.exp %223 : vector<2x32xf32>
    %cst_111 = arith.constant 1.000000e+00 : f32
    %225 = vector.broadcast %cst_111 : f32 to vector<2x32xf32>
    %226 = arith.addf %225, %224 : vector<2x32xf32>
    %227 = arith.divf %225, %226 : vector<2x32xf32>
    %228 = arith.mulf %219, %202 : vector<2x32xf32>
    %229 = arith.mulf %213, %221 : vector<2x32xf32>
    %230 = arith.addf %228, %229 : vector<2x32xf32>
    %231 = math.tanh %230 : vector<2x32xf32>
    %232 = arith.mulf %227, %231 : vector<2x32xf32>
    %c0_112 = arith.constant 0 : index
    %c0_113 = arith.constant 0 : index
    %233 = vector.load %arg12[%c0_112, %c0_113] : memref<2x32xf32, #tpu.memory_space<vmem>>, vector<2x32xf32>
    tpu.vector_store %arg12[%c0_112, %c0_113], %232 {strides = array<i32>} : memref<2x32xf32, #tpu.memory_space<vmem>>, vector<2x32xf32>,
    %c0_114 = arith.constant 0 : index
    %c0_115 = arith.constant 0 : index
    %234 = vector.load %arg13[%c0_114, %c0_115] : memref<2x32xf32, #tpu.memory_space<vmem>>, vector<2x32xf32>
    tpu.vector_store %arg13[%c0_114, %c0_115], %230 {strides = array<i32>} : memref<2x32xf32, #tpu.memory_space<vmem>>, vector<2x32xf32>,
    %235 = arith.index_cast %c3_i32_101 : i32 to index
    %c0_116 = arith.constant 0 : index
    %c0_117 = arith.constant 0 : index
    %236 = vector.load %arg11[%235, %c0_116, %c0_117] : memref<8x2x32xf32, #tpu.memory_space<vmem>>, vector<1x2x32xf32>
    %237 = vector.shape_cast %236 : vector<1x2x32xf32> to vector<2x32xf32>
    %238 = vector.shape_cast %232 : vector<2x32xf32> to vector<1x2x32xf32>
    tpu.vector_store %arg11[%235, %c0_116, %c0_117], %238 {strides = array<i32>} : memref<8x2x32xf32, #tpu.memory_space<vmem>>, vector<1x2x32xf32>,
    %c4_i32_118 = arith.constant 4 : i32
    %c0_119 = arith.constant 0 : index
    %c0_120 = arith.constant 0 : index
    %239 = vector.load %arg12[%c0_119, %c0_120] : memref<2x32xf32, #tpu.memory_space<vmem>>, vector<2x32xf32>
    %c0_121 = arith.constant 0 : index
    %c0_122 = arith.constant 0 : index
    %240 = vector.load %arg13[%c0_121, %c0_122] : memref<2x32xf32, #tpu.memory_space<vmem>>, vector<2x32xf32>
    %241 = arith.index_cast %c4_i32_118 : i32 to index
    %c0_123 = arith.constant 0 : index
    %c0_124 = arith.constant 0 : index
    %242 = vector.load %arg10[%241, %c0_123, %c0_124] : memref<8x2x128xf32, #tpu.memory_space<vmem>>, vector<1x2x128xf32>
    %243 = vector.shape_cast %242 : vector<1x2x128xf32> to vector<2x128xf32>
    %cst_125 = arith.constant dense<0.000000e+00> : vector<2x128xf32>
    %244 = tpu.matmul %239, %1, %cst_125 {dimension_numbers = #tpu.dot_dimension_numbers<[1], [0], [0], [1], [0, 0, 1, 1], [], []>} : vector<2x32xf32>, vector<32x128xf32>, vector<2x128xf32> -> vector<2x128xf32>
    %245 = arith.addf %243, %244 : vector<2x128xf32>
    %246 = vector.extract_strided_slice %245 {offsets = [0, 0], sizes = [2, 32], strides = [1, 1]} : vector<2x128xf32> to vector<2x32xf32>
    %247 = arith.negf %246 : vector<2x32xf32>
    %248 = math.exp %247 : vector<2x32xf32>
    %cst_126 = arith.constant 1.000000e+00 : f32
    %249 = vector.broadcast %cst_126 : f32 to vector<2x32xf32>
    %250 = arith.addf %249, %248 : vector<2x32xf32>
    %251 = arith.divf %249, %250 : vector<2x32xf32>
    %252 = vector.extract_strided_slice %245 {offsets = [0, 32], sizes = [2, 32], strides = [1, 1]} : vector<2x128xf32> to vector<2x32xf32>
    %253 = arith.negf %252 : vector<2x32xf32>
    %254 = math.exp %253 : vector<2x32xf32>
    %cst_127 = arith.constant 1.000000e+00 : f32
    %255 = vector.broadcast %cst_127 : f32 to vector<2x32xf32>
    %256 = arith.addf %255, %254 : vector<2x32xf32>
    %257 = arith.divf %255, %256 : vector<2x32xf32>
    %258 = vector.extract_strided_slice %245 {offsets = [0, 64], sizes = [2, 32], strides = [1, 1]} : vector<2x128xf32> to vector<2x32xf32>
    %259 = math.tanh %258 : vector<2x32xf32>
    %260 = vector.extract_strided_slice %245 {offsets = [0, 96], sizes = [2, 32], strides = [1, 1]} : vector<2x128xf32> to vector<2x32xf32>
    %261 = arith.negf %260 : vector<2x32xf32>
    %262 = math.exp %261 : vector<2x32xf32>
    %cst_128 = arith.constant 1.000000e+00 : f32
    %263 = vector.broadcast %cst_128 : f32 to vector<2x32xf32>
    %264 = arith.addf %263, %262 : vector<2x32xf32>
    %265 = arith.divf %263, %264 : vector<2x32xf32>
    %266 = arith.mulf %257, %240 : vector<2x32xf32>
    %267 = arith.mulf %251, %259 : vector<2x32xf32>
    %268 = arith.addf %266, %267 : vector<2x32xf32>
    %269 = math.tanh %268 : vector<2x32xf32>
    %270 = arith.mulf %265, %269 : vector<2x32xf32>
    %c0_129 = arith.constant 0 : index
    %c0_130 = arith.constant 0 : index
    %271 = vector.load %arg12[%c0_129, %c0_130] : memref<2x32xf32, #tpu.memory_space<vmem>>, vector<2x32xf32>
    tpu.vector_store %arg12[%c0_129, %c0_130], %270 {strides = array<i32>} : memref<2x32xf32, #tpu.memory_space<vmem>>, vector<2x32xf32>,
    %c0_131 = arith.constant 0 : index
    %c0_132 = arith.constant 0 : index
    %272 = vector.load %arg13[%c0_131, %c0_132] : memref<2x32xf32, #tpu.memory_space<vmem>>, vector<2x32xf32>
    tpu.vector_store %arg13[%c0_131, %c0_132], %268 {strides = array<i32>} : memref<2x32xf32, #tpu.memory_space<vmem>>, vector<2x32xf32>,
    %273 = arith.index_cast %c4_i32_118 : i32 to index
    %c0_133 = arith.constant 0 : index
    %c0_134 = arith.constant 0 : index
    %274 = vector.load %arg11[%273, %c0_133, %c0_134] : memref<8x2x32xf32, #tpu.memory_space<vmem>>, vector<1x2x32xf32>
    %275 = vector.shape_cast %274 : vector<1x2x32xf32> to vector<2x32xf32>
    %276 = vector.shape_cast %270 : vector<2x32xf32> to vector<1x2x32xf32>
    tpu.vector_store %arg11[%273, %c0_133, %c0_134], %276 {strides = array<i32>} : memref<8x2x32xf32, #tpu.memory_space<vmem>>, vector<1x2x32xf32>,
    %c5_i32_135 = arith.constant 5 : i32
    %c0_136 = arith.constant 0 : index
    %c0_137 = arith.constant 0 : index
    %277 = vector.load %arg12[%c0_136, %c0_137] : memref<2x32xf32, #tpu.memory_space<vmem>>, vector<2x32xf32>
    %c0_138 = arith.constant 0 : index
    %c0_139 = arith.constant 0 : index
    %278 = vector.load %arg13[%c0_138, %c0_139] : memref<2x32xf32, #tpu.memory_space<vmem>>, vector<2x32xf32>
    %279 = arith.index_cast %c5_i32_135 : i32 to index
    %c0_140 = arith.constant 0 : index
    %c0_141 = arith.constant 0 : index
    %280 = vector.load %arg10[%279, %c0_140, %c0_141] : memref<8x2x128xf32, #tpu.memory_space<vmem>>, vector<1x2x128xf32>
    %281 = vector.shape_cast %280 : vector<1x2x128xf32> to vector<2x128xf32>
    %cst_142 = arith.constant dense<0.000000e+00> : vector<2x128xf32>
    %282 = tpu.matmul %277, %1, %cst_142 {dimension_numbers = #tpu.dot_dimension_numbers<[1], [0], [0], [1], [0, 0, 1, 1], [], []>} : vector<2x32xf32>, vector<32x128xf32>, vector<2x128xf32> -> vector<2x128xf32>
    %283 = arith.addf %281, %282 : vector<2x128xf32>
    %284 = vector.extract_strided_slice %283 {offsets = [0, 0], sizes = [2, 32], strides = [1, 1]} : vector<2x128xf32> to vector<2x32xf32>
    %285 = arith.negf %284 : vector<2x32xf32>
    %286 = math.exp %285 : vector<2x32xf32>
    %cst_143 = arith.constant 1.000000e+00 : f32
    %287 = vector.broadcast %cst_143 : f32 to vector<2x32xf32>
    %288 = arith.addf %287, %286 : vector<2x32xf32>
    %289 = arith.divf %287, %288 : vector<2x32xf32>
    %290 = vector.extract_strided_slice %283 {offsets = [0, 32], sizes = [2, 32], strides = [1, 1]} : vector<2x128xf32> to vector<2x32xf32>
    %291 = arith.negf %290 : vector<2x32xf32>
    %292 = math.exp %291 : vector<2x32xf32>
    %cst_144 = arith.constant 1.000000e+00 : f32
    %293 = vector.broadcast %cst_144 : f32 to vector<2x32xf32>
    %294 = arith.addf %293, %292 : vector<2x32xf32>
    %295 = arith.divf %293, %294 : vector<2x32xf32>
    %296 = vector.extract_strided_slice %283 {offsets = [0, 64], sizes = [2, 32], strides = [1, 1]} : vector<2x128xf32> to vector<2x32xf32>
    %297 = math.tanh %296 : vector<2x32xf32>
    %298 = vector.extract_strided_slice %283 {offsets = [0, 96], sizes = [2, 32], strides = [1, 1]} : vector<2x128xf32> to vector<2x32xf32>
    %299 = arith.negf %298 : vector<2x32xf32>
    %300 = math.exp %299 : vector<2x32xf32>
    %cst_145 = arith.constant 1.000000e+00 : f32
    %301 = vector.broadcast %cst_145 : f32 to vector<2x32xf32>
    %302 = arith.addf %301, %300 : vector<2x32xf32>
    %303 = arith.divf %301, %302 : vector<2x32xf32>
    %304 = arith.mulf %295, %278 : vector<2x32xf32>
    %305 = arith.mulf %289, %297 : vector<2x32xf32>
    %306 = arith.addf %304, %305 : vector<2x32xf32>
    %307 = math.tanh %306 : vector<2x32xf32>
    %308 = arith.mulf %303, %307 : vector<2x32xf32>
    %c0_146 = arith.constant 0 : index
    %c0_147 = arith.constant 0 : index
    %309 = vector.load %arg12[%c0_146, %c0_147] : memref<2x32xf32, #tpu.memory_space<vmem>>, vector<2x32xf32>
    tpu.vector_store %arg12[%c0_146, %c0_147], %308 {strides = array<i32>} : memref<2x32xf32, #tpu.memory_space<vmem>>, vector<2x32xf32>,
    %c0_148 = arith.constant 0 : index
    %c0_149 = arith.constant 0 : index
    %310 = vector.load %arg13[%c0_148, %c0_149] : memref<2x32xf32, #tpu.memory_space<vmem>>, vector<2x32xf32>
    tpu.vector_store %arg13[%c0_148, %c0_149], %306 {strides = array<i32>} : memref<2x32xf32, #tpu.memory_space<vmem>>, vector<2x32xf32>,
    %311 = arith.index_cast %c5_i32_135 : i32 to index
    %c0_150 = arith.constant 0 : index
    %c0_151 = arith.constant 0 : index
    %312 = vector.load %arg11[%311, %c0_150, %c0_151] : memref<8x2x32xf32, #tpu.memory_space<vmem>>, vector<1x2x32xf32>
    %313 = vector.shape_cast %312 : vector<1x2x32xf32> to vector<2x32xf32>
    %314 = vector.shape_cast %308 : vector<2x32xf32> to vector<1x2x32xf32>
    tpu.vector_store %arg11[%311, %c0_150, %c0_151], %314 {strides = array<i32>} : memref<8x2x32xf32, #tpu.memory_space<vmem>>, vector<1x2x32xf32>,
    %c6_i32_152 = arith.constant 6 : i32
    %c0_153 = arith.constant 0 : index
    %c0_154 = arith.constant 0 : index
    %315 = vector.load %arg12[%c0_153, %c0_154] : memref<2x32xf32, #tpu.memory_space<vmem>>, vector<2x32xf32>
    %c0_155 = arith.constant 0 : index
    %c0_156 = arith.constant 0 : index
    %316 = vector.load %arg13[%c0_155, %c0_156] : memref<2x32xf32, #tpu.memory_space<vmem>>, vector<2x32xf32>
    %317 = arith.index_cast %c6_i32_152 : i32 to index
    %c0_157 = arith.constant 0 : index
    %c0_158 = arith.constant 0 : index
    %318 = vector.load %arg10[%317, %c0_157, %c0_158] : memref<8x2x128xf32, #tpu.memory_space<vmem>>, vector<1x2x128xf32>
    %319 = vector.shape_cast %318 : vector<1x2x128xf32> to vector<2x128xf32>
    %cst_159 = arith.constant dense<0.000000e+00> : vector<2x128xf32>
    %320 = tpu.matmul %315, %1, %cst_159 {dimension_numbers = #tpu.dot_dimension_numbers<[1], [0], [0], [1], [0, 0, 1, 1], [], []>} : vector<2x32xf32>, vector<32x128xf32>, vector<2x128xf32> -> vector<2x128xf32>
    %321 = arith.addf %319, %320 : vector<2x128xf32>
    %322 = vector.extract_strided_slice %321 {offsets = [0, 0], sizes = [2, 32], strides = [1, 1]} : vector<2x128xf32> to vector<2x32xf32>
    %323 = arith.negf %322 : vector<2x32xf32>
    %324 = math.exp %323 : vector<2x32xf32>
    %cst_160 = arith.constant 1.000000e+00 : f32
    %325 = vector.broadcast %cst_160 : f32 to vector<2x32xf32>
    %326 = arith.addf %325, %324 : vector<2x32xf32>
    %327 = arith.divf %325, %326 : vector<2x32xf32>
    %328 = vector.extract_strided_slice %321 {offsets = [0, 32], sizes = [2, 32], strides = [1, 1]} : vector<2x128xf32> to vector<2x32xf32>
    %329 = arith.negf %328 : vector<2x32xf32>
    %330 = math.exp %329 : vector<2x32xf32>
    %cst_161 = arith.constant 1.000000e+00 : f32
    %331 = vector.broadcast %cst_161 : f32 to vector<2x32xf32>
    %332 = arith.addf %331, %330 : vector<2x32xf32>
    %333 = arith.divf %331, %332 : vector<2x32xf32>
    %334 = vector.extract_strided_slice %321 {offsets = [0, 64], sizes = [2, 32], strides = [1, 1]} : vector<2x128xf32> to vector<2x32xf32>
    %335 = math.tanh %334 : vector<2x32xf32>
    %336 = vector.extract_strided_slice %321 {offsets = [0, 96], sizes = [2, 32], strides = [1, 1]} : vector<2x128xf32> to vector<2x32xf32>
    %337 = arith.negf %336 : vector<2x32xf32>
    %338 = math.exp %337 : vector<2x32xf32>
    %cst_162 = arith.constant 1.000000e+00 : f32
    %339 = vector.broadcast %cst_162 : f32 to vector<2x32xf32>
    %340 = arith.addf %339, %338 : vector<2x32xf32>
    %341 = arith.divf %339, %340 : vector<2x32xf32>
    %342 = arith.mulf %333, %316 : vector<2x32xf32>
    %343 = arith.mulf %327, %335 : vector<2x32xf32>
    %344 = arith.addf %342, %343 : vector<2x32xf32>
    %345 = math.tanh %344 : vector<2x32xf32>
    %346 = arith.mulf %341, %345 : vector<2x32xf32>
    %c0_163 = arith.constant 0 : index
    %c0_164 = arith.constant 0 : index
    %347 = vector.load %arg12[%c0_163, %c0_164] : memref<2x32xf32, #tpu.memory_space<vmem>>, vector<2x32xf32>
    tpu.vector_store %arg12[%c0_163, %c0_164], %346 {strides = array<i32>} : memref<2x32xf32, #tpu.memory_space<vmem>>, vector<2x32xf32>,
    %c0_165 = arith.constant 0 : index
    %c0_166 = arith.constant 0 : index
    %348 = vector.load %arg13[%c0_165, %c0_166] : memref<2x32xf32, #tpu.memory_space<vmem>>, vector<2x32xf32>
    tpu.vector_store %arg13[%c0_165, %c0_166], %344 {strides = array<i32>} : memref<2x32xf32, #tpu.memory_space<vmem>>, vector<2x32xf32>,
    %349 = arith.index_cast %c6_i32_152 : i32 to index
    %c0_167 = arith.constant 0 : index
    %c0_168 = arith.constant 0 : index
    %350 = vector.load %arg11[%349, %c0_167, %c0_168] : memref<8x2x32xf32, #tpu.memory_space<vmem>>, vector<1x2x32xf32>
    %351 = vector.shape_cast %350 : vector<1x2x32xf32> to vector<2x32xf32>
    %352 = vector.shape_cast %346 : vector<2x32xf32> to vector<1x2x32xf32>
    tpu.vector_store %arg11[%349, %c0_167, %c0_168], %352 {strides = array<i32>} : memref<8x2x32xf32, #tpu.memory_space<vmem>>, vector<1x2x32xf32>,
    %c7_i32_169 = arith.constant 7 : i32
    %c0_170 = arith.constant 0 : index
    %c0_171 = arith.constant 0 : index
    %353 = vector.load %arg12[%c0_170, %c0_171] : memref<2x32xf32, #tpu.memory_space<vmem>>, vector<2x32xf32>
    %c0_172 = arith.constant 0 : index
    %c0_173 = arith.constant 0 : index
    %354 = vector.load %arg13[%c0_172, %c0_173] : memref<2x32xf32, #tpu.memory_space<vmem>>, vector<2x32xf32>
    %355 = arith.index_cast %c7_i32_169 : i32 to index
    %c0_174 = arith.constant 0 : index
    %c0_175 = arith.constant 0 : index
    %356 = vector.load %arg10[%355, %c0_174, %c0_175] : memref<8x2x128xf32, #tpu.memory_space<vmem>>, vector<1x2x128xf32>
    %357 = vector.shape_cast %356 : vector<1x2x128xf32> to vector<2x128xf32>
    %cst_176 = arith.constant dense<0.000000e+00> : vector<2x128xf32>
    %358 = tpu.matmul %353, %1, %cst_176 {dimension_numbers = #tpu.dot_dimension_numbers<[1], [0], [0], [1], [0, 0, 1, 1], [], []>} : vector<2x32xf32>, vector<32x128xf32>, vector<2x128xf32> -> vector<2x128xf32>
    %359 = arith.addf %357, %358 : vector<2x128xf32>
    %360 = vector.extract_strided_slice %359 {offsets = [0, 0], sizes = [2, 32], strides = [1, 1]} : vector<2x128xf32> to vector<2x32xf32>
    %361 = arith.negf %360 : vector<2x32xf32>
    %362 = math.exp %361 : vector<2x32xf32>
    %cst_177 = arith.constant 1.000000e+00 : f32
    %363 = vector.broadcast %cst_177 : f32 to vector<2x32xf32>
    %364 = arith.addf %363, %362 : vector<2x32xf32>
    %365 = arith.divf %363, %364 : vector<2x32xf32>
    %366 = vector.extract_strided_slice %359 {offsets = [0, 32], sizes = [2, 32], strides = [1, 1]} : vector<2x128xf32> to vector<2x32xf32>
    %367 = arith.negf %366 : vector<2x32xf32>
    %368 = math.exp %367 : vector<2x32xf32>
    %cst_178 = arith.constant 1.000000e+00 : f32
    %369 = vector.broadcast %cst_178 : f32 to vector<2x32xf32>
    %370 = arith.addf %369, %368 : vector<2x32xf32>
    %371 = arith.divf %369, %370 : vector<2x32xf32>
    %372 = vector.extract_strided_slice %359 {offsets = [0, 64], sizes = [2, 32], strides = [1, 1]} : vector<2x128xf32> to vector<2x32xf32>
    %373 = math.tanh %372 : vector<2x32xf32>
    %374 = vector.extract_strided_slice %359 {offsets = [0, 96], sizes = [2, 32], strides = [1, 1]} : vector<2x128xf32> to vector<2x32xf32>
    %375 = arith.negf %374 : vector<2x32xf32>
    %376 = math.exp %375 : vector<2x32xf32>
    %cst_179 = arith.constant 1.000000e+00 : f32
    %377 = vector.broadcast %cst_179 : f32 to vector<2x32xf32>
    %378 = arith.addf %377, %376 : vector<2x32xf32>
    %379 = arith.divf %377, %378 : vector<2x32xf32>
    %380 = arith.mulf %371, %354 : vector<2x32xf32>
    %381 = arith.mulf %365, %373 : vector<2x32xf32>
    %382 = arith.addf %380, %381 : vector<2x32xf32>
    %383 = math.tanh %382 : vector<2x32xf32>
    %384 = arith.mulf %379, %383 : vector<2x32xf32>
    %c0_180 = arith.constant 0 : index
    %c0_181 = arith.constant 0 : index
    %385 = vector.load %arg12[%c0_180, %c0_181] : memref<2x32xf32, #tpu.memory_space<vmem>>, vector<2x32xf32>
    tpu.vector_store %arg12[%c0_180, %c0_181], %384 {strides = array<i32>} : memref<2x32xf32, #tpu.memory_space<vmem>>, vector<2x32xf32>,
    %c0_182 = arith.constant 0 : index
    %c0_183 = arith.constant 0 : index
    %386 = vector.load %arg13[%c0_182, %c0_183] : memref<2x32xf32, #tpu.memory_space<vmem>>, vector<2x32xf32>
    tpu.vector_store %arg13[%c0_182, %c0_183], %382 {strides = array<i32>} : memref<2x32xf32, #tpu.memory_space<vmem>>, vector<2x32xf32>,
    %387 = arith.index_cast %c7_i32_169 : i32 to index
    %c0_184 = arith.constant 0 : index
    %c0_185 = arith.constant 0 : index
    %388 = vector.load %arg11[%387, %c0_184, %c0_185] : memref<8x2x32xf32, #tpu.memory_space<vmem>>, vector<1x2x32xf32>
    %389 = vector.shape_cast %388 : vector<1x2x32xf32> to vector<2x32xf32>
    %390 = vector.shape_cast %384 : vector<2x32xf32> to vector<1x2x32xf32>
    tpu.vector_store %arg11[%387, %c0_184, %c0_185], %390 {strides = array<i32>} : memref<8x2x32xf32, #tpu.memory_space<vmem>>, vector<1x2x32xf32>,
    %c8_i32_186 = arith.constant 8 : i32
    %c0_187 = arith.constant 0 : index
    %c0_188 = arith.constant 0 : index
    %391 = vector.load %arg4[%c0_187, %c0_188] : memref<32x128xf32, #tpu.memory_space<vmem>>, vector<32x128xf32>
    %c0_189 = arith.constant 0 : index
    %c0_190 = arith.constant 0 : index
    %392 = vector.load %arg5[%c0_189, %c0_190] : memref<32x128xf32, #tpu.memory_space<vmem>>, vector<32x128xf32>
    %c0_191 = arith.constant 0 : index
    %c0_192 = arith.constant 0 : index
    %393 = vector.load %arg6[%c0_191, %c0_192] : memref<1x128xf32, #tpu.memory_space<vmem>>, vector<1x128xf32>
    %c0_i32_193 = arith.constant 0 : i32
    %394 = arith.index_cast %c0_i32_193 : i32 to index
    %c0_194 = arith.constant 0 : index
    %c0_195 = arith.constant 0 : index
    %395 = vector.load %arg11[%394, %c0_194, %c0_195] : memref<8x2x32xf32, #tpu.memory_space<vmem>>, vector<1x2x32xf32>
    %396 = vector.shape_cast %395 : vector<1x2x32xf32> to vector<2x32xf32>
    %cst_196 = arith.constant dense<0.000000e+00> : vector<2x128xf32>
    %397 = tpu.matmul %396, %391, %cst_196 {dimension_numbers = #tpu.dot_dimension_numbers<[1], [0], [0], [1], [0, 0, 1, 1], [], []>} : vector<2x32xf32>, vector<32x128xf32>, vector<2x128xf32> -> vector<2x128xf32>
    %398 = vector.broadcast %393 : vector<1x128xf32> to vector<2x128xf32>
    %399 = arith.addf %397, %398 : vector<2x128xf32>
    %400 = arith.index_cast %c0_i32_193 : i32 to index
    %c0_197 = arith.constant 0 : index
    %c0_198 = arith.constant 0 : index
    %401 = vector.load %arg10[%400, %c0_197, %c0_198] : memref<8x2x128xf32, #tpu.memory_space<vmem>>, vector<1x2x128xf32>
    %402 = vector.shape_cast %401 : vector<1x2x128xf32> to vector<2x128xf32>
    %403 = vector.shape_cast %399 : vector<2x128xf32> to vector<1x2x128xf32>
    tpu.vector_store %arg10[%400, %c0_197, %c0_198], %403 {strides = array<i32>} : memref<8x2x128xf32, #tpu.memory_space<vmem>>, vector<1x2x128xf32>,
    %c1_i32_199 = arith.constant 1 : i32
    %404 = arith.index_cast %c1_i32_199 : i32 to index
    %c0_200 = arith.constant 0 : index
    %c0_201 = arith.constant 0 : index
    %405 = vector.load %arg11[%404, %c0_200, %c0_201] : memref<8x2x32xf32, #tpu.memory_space<vmem>>, vector<1x2x32xf32>
    %406 = vector.shape_cast %405 : vector<1x2x32xf32> to vector<2x32xf32>
    %cst_202 = arith.constant dense<0.000000e+00> : vector<2x128xf32>
    %407 = tpu.matmul %406, %391, %cst_202 {dimension_numbers = #tpu.dot_dimension_numbers<[1], [0], [0], [1], [0, 0, 1, 1], [], []>} : vector<2x32xf32>, vector<32x128xf32>, vector<2x128xf32> -> vector<2x128xf32>
    %408 = vector.broadcast %393 : vector<1x128xf32> to vector<2x128xf32>
    %409 = arith.addf %407, %408 : vector<2x128xf32>
    %410 = arith.index_cast %c1_i32_199 : i32 to index
    %c0_203 = arith.constant 0 : index
    %c0_204 = arith.constant 0 : index
    %411 = vector.load %arg10[%410, %c0_203, %c0_204] : memref<8x2x128xf32, #tpu.memory_space<vmem>>, vector<1x2x128xf32>
    %412 = vector.shape_cast %411 : vector<1x2x128xf32> to vector<2x128xf32>
    %413 = vector.shape_cast %409 : vector<2x128xf32> to vector<1x2x128xf32>
    tpu.vector_store %arg10[%410, %c0_203, %c0_204], %413 {strides = array<i32>} : memref<8x2x128xf32, #tpu.memory_space<vmem>>, vector<1x2x128xf32>,
    %c2_i32_205 = arith.constant 2 : i32
    %414 = arith.index_cast %c2_i32_205 : i32 to index
    %c0_206 = arith.constant 0 : index
    %c0_207 = arith.constant 0 : index
    %415 = vector.load %arg11[%414, %c0_206, %c0_207] : memref<8x2x32xf32, #tpu.memory_space<vmem>>, vector<1x2x32xf32>
    %416 = vector.shape_cast %415 : vector<1x2x32xf32> to vector<2x32xf32>
    %cst_208 = arith.constant dense<0.000000e+00> : vector<2x128xf32>
    %417 = tpu.matmul %416, %391, %cst_208 {dimension_numbers = #tpu.dot_dimension_numbers<[1], [0], [0], [1], [0, 0, 1, 1], [], []>} : vector<2x32xf32>, vector<32x128xf32>, vector<2x128xf32> -> vector<2x128xf32>
    %418 = vector.broadcast %393 : vector<1x128xf32> to vector<2x128xf32>
    %419 = arith.addf %417, %418 : vector<2x128xf32>
    %420 = arith.index_cast %c2_i32_205 : i32 to index
    %c0_209 = arith.constant 0 : index
    %c0_210 = arith.constant 0 : index
    %421 = vector.load %arg10[%420, %c0_209, %c0_210] : memref<8x2x128xf32, #tpu.memory_space<vmem>>, vector<1x2x128xf32>
    %422 = vector.shape_cast %421 : vector<1x2x128xf32> to vector<2x128xf32>
    %423 = vector.shape_cast %419 : vector<2x128xf32> to vector<1x2x128xf32>
    tpu.vector_store %arg10[%420, %c0_209, %c0_210], %423 {strides = array<i32>} : memref<8x2x128xf32, #tpu.memory_space<vmem>>, vector<1x2x128xf32>,
    %c3_i32_211 = arith.constant 3 : i32
    %424 = arith.index_cast %c3_i32_211 : i32 to index
    %c0_212 = arith.constant 0 : index
    %c0_213 = arith.constant 0 : index
    %425 = vector.load %arg11[%424, %c0_212, %c0_213] : memref<8x2x32xf32, #tpu.memory_space<vmem>>, vector<1x2x32xf32>
    %426 = vector.shape_cast %425 : vector<1x2x32xf32> to vector<2x32xf32>
    %cst_214 = arith.constant dense<0.000000e+00> : vector<2x128xf32>
    %427 = tpu.matmul %426, %391, %cst_214 {dimension_numbers = #tpu.dot_dimension_numbers<[1], [0], [0], [1], [0, 0, 1, 1], [], []>} : vector<2x32xf32>, vector<32x128xf32>, vector<2x128xf32> -> vector<2x128xf32>
    %428 = vector.broadcast %393 : vector<1x128xf32> to vector<2x128xf32>
    %429 = arith.addf %427, %428 : vector<2x128xf32>
    %430 = arith.index_cast %c3_i32_211 : i32 to index
    %c0_215 = arith.constant 0 : index
    %c0_216 = arith.constant 0 : index
    %431 = vector.load %arg10[%430, %c0_215, %c0_216] : memref<8x2x128xf32, #tpu.memory_space<vmem>>, vector<1x2x128xf32>
    %432 = vector.shape_cast %431 : vector<1x2x128xf32> to vector<2x128xf32>
    %433 = vector.shape_cast %429 : vector<2x128xf32> to vector<1x2x128xf32>
    tpu.vector_store %arg10[%430, %c0_215, %c0_216], %433 {strides = array<i32>} : memref<8x2x128xf32, #tpu.memory_space<vmem>>, vector<1x2x128xf32>,
    %c4_i32_217 = arith.constant 4 : i32
    %434 = arith.index_cast %c4_i32_217 : i32 to index
    %c0_218 = arith.constant 0 : index
    %c0_219 = arith.constant 0 : index
    %435 = vector.load %arg11[%434, %c0_218, %c0_219] : memref<8x2x32xf32, #tpu.memory_space<vmem>>, vector<1x2x32xf32>
    %436 = vector.shape_cast %435 : vector<1x2x32xf32> to vector<2x32xf32>
    %cst_220 = arith.constant dense<0.000000e+00> : vector<2x128xf32>
    %437 = tpu.matmul %436, %391, %cst_220 {dimension_numbers = #tpu.dot_dimension_numbers<[1], [0], [0], [1], [0, 0, 1, 1], [], []>} : vector<2x32xf32>, vector<32x128xf32>, vector<2x128xf32> -> vector<2x128xf32>
    %438 = vector.broadcast %393 : vector<1x128xf32> to vector<2x128xf32>
    %439 = arith.addf %437, %438 : vector<2x128xf32>
    %440 = arith.index_cast %c4_i32_217 : i32 to index
    %c0_221 = arith.constant 0 : index
    %c0_222 = arith.constant 0 : index
    %441 = vector.load %arg10[%440, %c0_221, %c0_222] : memref<8x2x128xf32, #tpu.memory_space<vmem>>, vector<1x2x128xf32>
    %442 = vector.shape_cast %441 : vector<1x2x128xf32> to vector<2x128xf32>
    %443 = vector.shape_cast %439 : vector<2x128xf32> to vector<1x2x128xf32>
    tpu.vector_store %arg10[%440, %c0_221, %c0_222], %443 {strides = array<i32>} : memref<8x2x128xf32, #tpu.memory_space<vmem>>, vector<1x2x128xf32>,
    %c5_i32_223 = arith.constant 5 : i32
    %444 = arith.index_cast %c5_i32_223 : i32 to index
    %c0_224 = arith.constant 0 : index
    %c0_225 = arith.constant 0 : index
    %445 = vector.load %arg11[%444, %c0_224, %c0_225] : memref<8x2x32xf32, #tpu.memory_space<vmem>>, vector<1x2x32xf32>
    %446 = vector.shape_cast %445 : vector<1x2x32xf32> to vector<2x32xf32>
    %cst_226 = arith.constant dense<0.000000e+00> : vector<2x128xf32>
    %447 = tpu.matmul %446, %391, %cst_226 {dimension_numbers = #tpu.dot_dimension_numbers<[1], [0], [0], [1], [0, 0, 1, 1], [], []>} : vector<2x32xf32>, vector<32x128xf32>, vector<2x128xf32> -> vector<2x128xf32>
    %448 = vector.broadcast %393 : vector<1x128xf32> to vector<2x128xf32>
    %449 = arith.addf %447, %448 : vector<2x128xf32>
    %450 = arith.index_cast %c5_i32_223 : i32 to index
    %c0_227 = arith.constant 0 : index
    %c0_228 = arith.constant 0 : index
    %451 = vector.load %arg10[%450, %c0_227, %c0_228] : memref<8x2x128xf32, #tpu.memory_space<vmem>>, vector<1x2x128xf32>
    %452 = vector.shape_cast %451 : vector<1x2x128xf32> to vector<2x128xf32>
    %453 = vector.shape_cast %449 : vector<2x128xf32> to vector<1x2x128xf32>
    tpu.vector_store %arg10[%450, %c0_227, %c0_228], %453 {strides = array<i32>} : memref<8x2x128xf32, #tpu.memory_space<vmem>>, vector<1x2x128xf32>,
    %c6_i32_229 = arith.constant 6 : i32
    %454 = arith.index_cast %c6_i32_229 : i32 to index
    %c0_230 = arith.constant 0 : index
    %c0_231 = arith.constant 0 : index
    %455 = vector.load %arg11[%454, %c0_230, %c0_231] : memref<8x2x32xf32, #tpu.memory_space<vmem>>, vector<1x2x32xf32>
    %456 = vector.shape_cast %455 : vector<1x2x32xf32> to vector<2x32xf32>
    %cst_232 = arith.constant dense<0.000000e+00> : vector<2x128xf32>
    %457 = tpu.matmul %456, %391, %cst_232 {dimension_numbers = #tpu.dot_dimension_numbers<[1], [0], [0], [1], [0, 0, 1, 1], [], []>} : vector<2x32xf32>, vector<32x128xf32>, vector<2x128xf32> -> vector<2x128xf32>
    %458 = vector.broadcast %393 : vector<1x128xf32> to vector<2x128xf32>
    %459 = arith.addf %457, %458 : vector<2x128xf32>
    %460 = arith.index_cast %c6_i32_229 : i32 to index
    %c0_233 = arith.constant 0 : index
    %c0_234 = arith.constant 0 : index
    %461 = vector.load %arg10[%460, %c0_233, %c0_234] : memref<8x2x128xf32, #tpu.memory_space<vmem>>, vector<1x2x128xf32>
    %462 = vector.shape_cast %461 : vector<1x2x128xf32> to vector<2x128xf32>
    %463 = vector.shape_cast %459 : vector<2x128xf32> to vector<1x2x128xf32>
    tpu.vector_store %arg10[%460, %c0_233, %c0_234], %463 {strides = array<i32>} : memref<8x2x128xf32, #tpu.memory_space<vmem>>, vector<1x2x128xf32>,
    %c7_i32_235 = arith.constant 7 : i32
    %464 = arith.index_cast %c7_i32_235 : i32 to index
    %c0_236 = arith.constant 0 : index
    %c0_237 = arith.constant 0 : index
    %465 = vector.load %arg11[%464, %c0_236, %c0_237] : memref<8x2x32xf32, #tpu.memory_space<vmem>>, vector<1x2x32xf32>
    %466 = vector.shape_cast %465 : vector<1x2x32xf32> to vector<2x32xf32>
    %cst_238 = arith.constant dense<0.000000e+00> : vector<2x128xf32>
    %467 = tpu.matmul %466, %391, %cst_238 {dimension_numbers = #tpu.dot_dimension_numbers<[1], [0], [0], [1], [0, 0, 1, 1], [], []>} : vector<2x32xf32>, vector<32x128xf32>, vector<2x128xf32> -> vector<2x128xf32>
    %468 = vector.broadcast %393 : vector<1x128xf32> to vector<2x128xf32>
    %469 = arith.addf %467, %468 : vector<2x128xf32>
    %470 = arith.index_cast %c7_i32_235 : i32 to index
    %c0_239 = arith.constant 0 : index
    %c0_240 = arith.constant 0 : index
    %471 = vector.load %arg10[%470, %c0_239, %c0_240] : memref<8x2x128xf32, #tpu.memory_space<vmem>>, vector<1x2x128xf32>
    %472 = vector.shape_cast %471 : vector<1x2x128xf32> to vector<2x128xf32>
    %473 = vector.shape_cast %469 : vector<2x128xf32> to vector<1x2x128xf32>
    tpu.vector_store %arg10[%470, %c0_239, %c0_240], %473 {strides = array<i32>} : memref<8x2x128xf32, #tpu.memory_space<vmem>>, vector<1x2x128xf32>,
    %c8_i32_241 = arith.constant 8 : i32
    %cst_242 = arith.constant 0.000000e+00 : f32
    %474 = vector.broadcast %cst_242 : f32 to vector<2x32xf32>
    %c0_243 = arith.constant 0 : index
    %c0_244 = arith.constant 0 : index
    %475 = vector.load %arg12[%c0_243, %c0_244] : memref<2x32xf32, #tpu.memory_space<vmem>>, vector<2x32xf32>
    tpu.vector_store %arg12[%c0_243, %c0_244], %474 {strides = array<i32>} : memref<2x32xf32, #tpu.memory_space<vmem>>, vector<2x32xf32>,
    %cst_245 = arith.constant 0.000000e+00 : f32
    %476 = vector.broadcast %cst_245 : f32 to vector<2x32xf32>
    %c0_246 = arith.constant 0 : index
    %c0_247 = arith.constant 0 : index
    %477 = vector.load %arg13[%c0_246, %c0_247] : memref<2x32xf32, #tpu.memory_space<vmem>>, vector<2x32xf32>
    tpu.vector_store %arg13[%c0_246, %c0_247], %476 {strides = array<i32>} : memref<2x32xf32, #tpu.memory_space<vmem>>, vector<2x32xf32>,
    %c0_i32_248 = arith.constant 0 : i32
    %c0_249 = arith.constant 0 : index
    %c0_250 = arith.constant 0 : index
    %478 = vector.load %arg12[%c0_249, %c0_250] : memref<2x32xf32, #tpu.memory_space<vmem>>, vector<2x32xf32>
    %c0_251 = arith.constant 0 : index
    %c0_252 = arith.constant 0 : index
    %479 = vector.load %arg13[%c0_251, %c0_252] : memref<2x32xf32, #tpu.memory_space<vmem>>, vector<2x32xf32>
    %480 = arith.index_cast %c0_i32_248 : i32 to index
    %c0_253 = arith.constant 0 : index
    %c0_254 = arith.constant 0 : index
    %481 = vector.load %arg10[%480, %c0_253, %c0_254] : memref<8x2x128xf32, #tpu.memory_space<vmem>>, vector<1x2x128xf32>
    %482 = vector.shape_cast %481 : vector<1x2x128xf32> to vector<2x128xf32>
    %cst_255 = arith.constant dense<0.000000e+00> : vector<2x128xf32>
    %483 = tpu.matmul %478, %392, %cst_255 {dimension_numbers = #tpu.dot_dimension_numbers<[1], [0], [0], [1], [0, 0, 1, 1], [], []>} : vector<2x32xf32>, vector<32x128xf32>, vector<2x128xf32> -> vector<2x128xf32>
    %484 = arith.addf %482, %483 : vector<2x128xf32>
    %485 = vector.extract_strided_slice %484 {offsets = [0, 0], sizes = [2, 32], strides = [1, 1]} : vector<2x128xf32> to vector<2x32xf32>
    %486 = arith.negf %485 : vector<2x32xf32>
    %487 = math.exp %486 : vector<2x32xf32>
    %cst_256 = arith.constant 1.000000e+00 : f32
    %488 = vector.broadcast %cst_256 : f32 to vector<2x32xf32>
    %489 = arith.addf %488, %487 : vector<2x32xf32>
    %490 = arith.divf %488, %489 : vector<2x32xf32>
    %491 = vector.extract_strided_slice %484 {offsets = [0, 32], sizes = [2, 32], strides = [1, 1]} : vector<2x128xf32> to vector<2x32xf32>
    %492 = arith.negf %491 : vector<2x32xf32>
    %493 = math.exp %492 : vector<2x32xf32>
    %cst_257 = arith.constant 1.000000e+00 : f32
    %494 = vector.broadcast %cst_257 : f32 to vector<2x32xf32>
    %495 = arith.addf %494, %493 : vector<2x32xf32>
    %496 = arith.divf %494, %495 : vector<2x32xf32>
    %497 = vector.extract_strided_slice %484 {offsets = [0, 64], sizes = [2, 32], strides = [1, 1]} : vector<2x128xf32> to vector<2x32xf32>
    %498 = math.tanh %497 : vector<2x32xf32>
    %499 = vector.extract_strided_slice %484 {offsets = [0, 96], sizes = [2, 32], strides = [1, 1]} : vector<2x128xf32> to vector<2x32xf32>
    %500 = arith.negf %499 : vector<2x32xf32>
    %501 = math.exp %500 : vector<2x32xf32>
    %cst_258 = arith.constant 1.000000e+00 : f32
    %502 = vector.broadcast %cst_258 : f32 to vector<2x32xf32>
    %503 = arith.addf %502, %501 : vector<2x32xf32>
    %504 = arith.divf %502, %503 : vector<2x32xf32>
    %505 = arith.mulf %496, %479 : vector<2x32xf32>
    %506 = arith.mulf %490, %498 : vector<2x32xf32>
    %507 = arith.addf %505, %506 : vector<2x32xf32>
    %508 = math.tanh %507 : vector<2x32xf32>
    %509 = arith.mulf %504, %508 : vector<2x32xf32>
    %c0_259 = arith.constant 0 : index
    %c0_260 = arith.constant 0 : index
    %510 = vector.load %arg12[%c0_259, %c0_260] : memref<2x32xf32, #tpu.memory_space<vmem>>, vector<2x32xf32>
    tpu.vector_store %arg12[%c0_259, %c0_260], %509 {strides = array<i32>} : memref<2x32xf32, #tpu.memory_space<vmem>>, vector<2x32xf32>,
    %c0_261 = arith.constant 0 : index
    %c0_262 = arith.constant 0 : index
    %511 = vector.load %arg13[%c0_261, %c0_262] : memref<2x32xf32, #tpu.memory_space<vmem>>, vector<2x32xf32>
    tpu.vector_store %arg13[%c0_261, %c0_262], %507 {strides = array<i32>} : memref<2x32xf32, #tpu.memory_space<vmem>>, vector<2x32xf32>,
    %c1_i32_263 = arith.constant 1 : i32
    %c0_264 = arith.constant 0 : index
    %c0_265 = arith.constant 0 : index
    %512 = vector.load %arg12[%c0_264, %c0_265] : memref<2x32xf32, #tpu.memory_space<vmem>>, vector<2x32xf32>
    %c0_266 = arith.constant 0 : index
    %c0_267 = arith.constant 0 : index
    %513 = vector.load %arg13[%c0_266, %c0_267] : memref<2x32xf32, #tpu.memory_space<vmem>>, vector<2x32xf32>
    %514 = arith.index_cast %c1_i32_263 : i32 to index
    %c0_268 = arith.constant 0 : index
    %c0_269 = arith.constant 0 : index
    %515 = vector.load %arg10[%514, %c0_268, %c0_269] : memref<8x2x128xf32, #tpu.memory_space<vmem>>, vector<1x2x128xf32>
    %516 = vector.shape_cast %515 : vector<1x2x128xf32> to vector<2x128xf32>
    %cst_270 = arith.constant dense<0.000000e+00> : vector<2x128xf32>
    %517 = tpu.matmul %512, %392, %cst_270 {dimension_numbers = #tpu.dot_dimension_numbers<[1], [0], [0], [1], [0, 0, 1, 1], [], []>} : vector<2x32xf32>, vector<32x128xf32>, vector<2x128xf32> -> vector<2x128xf32>
    %518 = arith.addf %516, %517 : vector<2x128xf32>
    %519 = vector.extract_strided_slice %518 {offsets = [0, 0], sizes = [2, 32], strides = [1, 1]} : vector<2x128xf32> to vector<2x32xf32>
    %520 = arith.negf %519 : vector<2x32xf32>
    %521 = math.exp %520 : vector<2x32xf32>
    %cst_271 = arith.constant 1.000000e+00 : f32
    %522 = vector.broadcast %cst_271 : f32 to vector<2x32xf32>
    %523 = arith.addf %522, %521 : vector<2x32xf32>
    %524 = arith.divf %522, %523 : vector<2x32xf32>
    %525 = vector.extract_strided_slice %518 {offsets = [0, 32], sizes = [2, 32], strides = [1, 1]} : vector<2x128xf32> to vector<2x32xf32>
    %526 = arith.negf %525 : vector<2x32xf32>
    %527 = math.exp %526 : vector<2x32xf32>
    %cst_272 = arith.constant 1.000000e+00 : f32
    %528 = vector.broadcast %cst_272 : f32 to vector<2x32xf32>
    %529 = arith.addf %528, %527 : vector<2x32xf32>
    %530 = arith.divf %528, %529 : vector<2x32xf32>
    %531 = vector.extract_strided_slice %518 {offsets = [0, 64], sizes = [2, 32], strides = [1, 1]} : vector<2x128xf32> to vector<2x32xf32>
    %532 = math.tanh %531 : vector<2x32xf32>
    %533 = vector.extract_strided_slice %518 {offsets = [0, 96], sizes = [2, 32], strides = [1, 1]} : vector<2x128xf32> to vector<2x32xf32>
    %534 = arith.negf %533 : vector<2x32xf32>
    %535 = math.exp %534 : vector<2x32xf32>
    %cst_273 = arith.constant 1.000000e+00 : f32
    %536 = vector.broadcast %cst_273 : f32 to vector<2x32xf32>
    %537 = arith.addf %536, %535 : vector<2x32xf32>
    %538 = arith.divf %536, %537 : vector<2x32xf32>
    %539 = arith.mulf %530, %513 : vector<2x32xf32>
    %540 = arith.mulf %524, %532 : vector<2x32xf32>
    %541 = arith.addf %539, %540 : vector<2x32xf32>
    %542 = math.tanh %541 : vector<2x32xf32>
    %543 = arith.mulf %538, %542 : vector<2x32xf32>
    %c0_274 = arith.constant 0 : index
    %c0_275 = arith.constant 0 : index
    %544 = vector.load %arg12[%c0_274, %c0_275] : memref<2x32xf32, #tpu.memory_space<vmem>>, vector<2x32xf32>
    tpu.vector_store %arg12[%c0_274, %c0_275], %543 {strides = array<i32>} : memref<2x32xf32, #tpu.memory_space<vmem>>, vector<2x32xf32>,
    %c0_276 = arith.constant 0 : index
    %c0_277 = arith.constant 0 : index
    %545 = vector.load %arg13[%c0_276, %c0_277] : memref<2x32xf32, #tpu.memory_space<vmem>>, vector<2x32xf32>
    tpu.vector_store %arg13[%c0_276, %c0_277], %541 {strides = array<i32>} : memref<2x32xf32, #tpu.memory_space<vmem>>, vector<2x32xf32>,
    %c2_i32_278 = arith.constant 2 : i32
    %c0_279 = arith.constant 0 : index
    %c0_280 = arith.constant 0 : index
    %546 = vector.load %arg12[%c0_279, %c0_280] : memref<2x32xf32, #tpu.memory_space<vmem>>, vector<2x32xf32>
    %c0_281 = arith.constant 0 : index
    %c0_282 = arith.constant 0 : index
    %547 = vector.load %arg13[%c0_281, %c0_282] : memref<2x32xf32, #tpu.memory_space<vmem>>, vector<2x32xf32>
    %548 = arith.index_cast %c2_i32_278 : i32 to index
    %c0_283 = arith.constant 0 : index
    %c0_284 = arith.constant 0 : index
    %549 = vector.load %arg10[%548, %c0_283, %c0_284] : memref<8x2x128xf32, #tpu.memory_space<vmem>>, vector<1x2x128xf32>
    %550 = vector.shape_cast %549 : vector<1x2x128xf32> to vector<2x128xf32>
    %cst_285 = arith.constant dense<0.000000e+00> : vector<2x128xf32>
    %551 = tpu.matmul %546, %392, %cst_285 {dimension_numbers = #tpu.dot_dimension_numbers<[1], [0], [0], [1], [0, 0, 1, 1], [], []>} : vector<2x32xf32>, vector<32x128xf32>, vector<2x128xf32> -> vector<2x128xf32>
    %552 = arith.addf %550, %551 : vector<2x128xf32>
    %553 = vector.extract_strided_slice %552 {offsets = [0, 0], sizes = [2, 32], strides = [1, 1]} : vector<2x128xf32> to vector<2x32xf32>
    %554 = arith.negf %553 : vector<2x32xf32>
    %555 = math.exp %554 : vector<2x32xf32>
    %cst_286 = arith.constant 1.000000e+00 : f32
    %556 = vector.broadcast %cst_286 : f32 to vector<2x32xf32>
    %557 = arith.addf %556, %555 : vector<2x32xf32>
    %558 = arith.divf %556, %557 : vector<2x32xf32>
    %559 = vector.extract_strided_slice %552 {offsets = [0, 32], sizes = [2, 32], strides = [1, 1]} : vector<2x128xf32> to vector<2x32xf32>
    %560 = arith.negf %559 : vector<2x32xf32>
    %561 = math.exp %560 : vector<2x32xf32>
    %cst_287 = arith.constant 1.000000e+00 : f32
    %562 = vector.broadcast %cst_287 : f32 to vector<2x32xf32>
    %563 = arith.addf %562, %561 : vector<2x32xf32>
    %564 = arith.divf %562, %563 : vector<2x32xf32>
    %565 = vector.extract_strided_slice %552 {offsets = [0, 64], sizes = [2, 32], strides = [1, 1]} : vector<2x128xf32> to vector<2x32xf32>
    %566 = math.tanh %565 : vector<2x32xf32>
    %567 = vector.extract_strided_slice %552 {offsets = [0, 96], sizes = [2, 32], strides = [1, 1]} : vector<2x128xf32> to vector<2x32xf32>
    %568 = arith.negf %567 : vector<2x32xf32>
    %569 = math.exp %568 : vector<2x32xf32>
    %cst_288 = arith.constant 1.000000e+00 : f32
    %570 = vector.broadcast %cst_288 : f32 to vector<2x32xf32>
    %571 = arith.addf %570, %569 : vector<2x32xf32>
    %572 = arith.divf %570, %571 : vector<2x32xf32>
    %573 = arith.mulf %564, %547 : vector<2x32xf32>
    %574 = arith.mulf %558, %566 : vector<2x32xf32>
    %575 = arith.addf %573, %574 : vector<2x32xf32>
    %576 = math.tanh %575 : vector<2x32xf32>
    %577 = arith.mulf %572, %576 : vector<2x32xf32>
    %c0_289 = arith.constant 0 : index
    %c0_290 = arith.constant 0 : index
    %578 = vector.load %arg12[%c0_289, %c0_290] : memref<2x32xf32, #tpu.memory_space<vmem>>, vector<2x32xf32>
    tpu.vector_store %arg12[%c0_289, %c0_290], %577 {strides = array<i32>} : memref<2x32xf32, #tpu.memory_space<vmem>>, vector<2x32xf32>,
    %c0_291 = arith.constant 0 : index
    %c0_292 = arith.constant 0 : index
    %579 = vector.load %arg13[%c0_291, %c0_292] : memref<2x32xf32, #tpu.memory_space<vmem>>, vector<2x32xf32>
    tpu.vector_store %arg13[%c0_291, %c0_292], %575 {strides = array<i32>} : memref<2x32xf32, #tpu.memory_space<vmem>>, vector<2x32xf32>,
    %c3_i32_293 = arith.constant 3 : i32
    %c0_294 = arith.constant 0 : index
    %c0_295 = arith.constant 0 : index
    %580 = vector.load %arg12[%c0_294, %c0_295] : memref<2x32xf32, #tpu.memory_space<vmem>>, vector<2x32xf32>
    %c0_296 = arith.constant 0 : index
    %c0_297 = arith.constant 0 : index
    %581 = vector.load %arg13[%c0_296, %c0_297] : memref<2x32xf32, #tpu.memory_space<vmem>>, vector<2x32xf32>
    %582 = arith.index_cast %c3_i32_293 : i32 to index
    %c0_298 = arith.constant 0 : index
    %c0_299 = arith.constant 0 : index
    %583 = vector.load %arg10[%582, %c0_298, %c0_299] : memref<8x2x128xf32, #tpu.memory_space<vmem>>, vector<1x2x128xf32>
    %584 = vector.shape_cast %583 : vector<1x2x128xf32> to vector<2x128xf32>
    %cst_300 = arith.constant dense<0.000000e+00> : vector<2x128xf32>
    %585 = tpu.matmul %580, %392, %cst_300 {dimension_numbers = #tpu.dot_dimension_numbers<[1], [0], [0], [1], [0, 0, 1, 1], [], []>} : vector<2x32xf32>, vector<32x128xf32>, vector<2x128xf32> -> vector<2x128xf32>
    %586 = arith.addf %584, %585 : vector<2x128xf32>
    %587 = vector.extract_strided_slice %586 {offsets = [0, 0], sizes = [2, 32], strides = [1, 1]} : vector<2x128xf32> to vector<2x32xf32>
    %588 = arith.negf %587 : vector<2x32xf32>
    %589 = math.exp %588 : vector<2x32xf32>
    %cst_301 = arith.constant 1.000000e+00 : f32
    %590 = vector.broadcast %cst_301 : f32 to vector<2x32xf32>
    %591 = arith.addf %590, %589 : vector<2x32xf32>
    %592 = arith.divf %590, %591 : vector<2x32xf32>
    %593 = vector.extract_strided_slice %586 {offsets = [0, 32], sizes = [2, 32], strides = [1, 1]} : vector<2x128xf32> to vector<2x32xf32>
    %594 = arith.negf %593 : vector<2x32xf32>
    %595 = math.exp %594 : vector<2x32xf32>
    %cst_302 = arith.constant 1.000000e+00 : f32
    %596 = vector.broadcast %cst_302 : f32 to vector<2x32xf32>
    %597 = arith.addf %596, %595 : vector<2x32xf32>
    %598 = arith.divf %596, %597 : vector<2x32xf32>
    %599 = vector.extract_strided_slice %586 {offsets = [0, 64], sizes = [2, 32], strides = [1, 1]} : vector<2x128xf32> to vector<2x32xf32>
    %600 = math.tanh %599 : vector<2x32xf32>
    %601 = vector.extract_strided_slice %586 {offsets = [0, 96], sizes = [2, 32], strides = [1, 1]} : vector<2x128xf32> to vector<2x32xf32>
    %602 = arith.negf %601 : vector<2x32xf32>
    %603 = math.exp %602 : vector<2x32xf32>
    %cst_303 = arith.constant 1.000000e+00 : f32
    %604 = vector.broadcast %cst_303 : f32 to vector<2x32xf32>
    %605 = arith.addf %604, %603 : vector<2x32xf32>
    %606 = arith.divf %604, %605 : vector<2x32xf32>
    %607 = arith.mulf %598, %581 : vector<2x32xf32>
    %608 = arith.mulf %592, %600 : vector<2x32xf32>
    %609 = arith.addf %607, %608 : vector<2x32xf32>
    %610 = math.tanh %609 : vector<2x32xf32>
    %611 = arith.mulf %606, %610 : vector<2x32xf32>
    %c0_304 = arith.constant 0 : index
    %c0_305 = arith.constant 0 : index
    %612 = vector.load %arg12[%c0_304, %c0_305] : memref<2x32xf32, #tpu.memory_space<vmem>>, vector<2x32xf32>
    tpu.vector_store %arg12[%c0_304, %c0_305], %611 {strides = array<i32>} : memref<2x32xf32, #tpu.memory_space<vmem>>, vector<2x32xf32>,
    %c0_306 = arith.constant 0 : index
    %c0_307 = arith.constant 0 : index
    %613 = vector.load %arg13[%c0_306, %c0_307] : memref<2x32xf32, #tpu.memory_space<vmem>>, vector<2x32xf32>
    tpu.vector_store %arg13[%c0_306, %c0_307], %609 {strides = array<i32>} : memref<2x32xf32, #tpu.memory_space<vmem>>, vector<2x32xf32>,
    %c4_i32_308 = arith.constant 4 : i32
    %c0_309 = arith.constant 0 : index
    %c0_310 = arith.constant 0 : index
    %614 = vector.load %arg12[%c0_309, %c0_310] : memref<2x32xf32, #tpu.memory_space<vmem>>, vector<2x32xf32>
    %c0_311 = arith.constant 0 : index
    %c0_312 = arith.constant 0 : index
    %615 = vector.load %arg13[%c0_311, %c0_312] : memref<2x32xf32, #tpu.memory_space<vmem>>, vector<2x32xf32>
    %616 = arith.index_cast %c4_i32_308 : i32 to index
    %c0_313 = arith.constant 0 : index
    %c0_314 = arith.constant 0 : index
    %617 = vector.load %arg10[%616, %c0_313, %c0_314] : memref<8x2x128xf32, #tpu.memory_space<vmem>>, vector<1x2x128xf32>
    %618 = vector.shape_cast %617 : vector<1x2x128xf32> to vector<2x128xf32>
    %cst_315 = arith.constant dense<0.000000e+00> : vector<2x128xf32>
    %619 = tpu.matmul %614, %392, %cst_315 {dimension_numbers = #tpu.dot_dimension_numbers<[1], [0], [0], [1], [0, 0, 1, 1], [], []>} : vector<2x32xf32>, vector<32x128xf32>, vector<2x128xf32> -> vector<2x128xf32>
    %620 = arith.addf %618, %619 : vector<2x128xf32>
    %621 = vector.extract_strided_slice %620 {offsets = [0, 0], sizes = [2, 32], strides = [1, 1]} : vector<2x128xf32> to vector<2x32xf32>
    %622 = arith.negf %621 : vector<2x32xf32>
    %623 = math.exp %622 : vector<2x32xf32>
    %cst_316 = arith.constant 1.000000e+00 : f32
    %624 = vector.broadcast %cst_316 : f32 to vector<2x32xf32>
    %625 = arith.addf %624, %623 : vector<2x32xf32>
    %626 = arith.divf %624, %625 : vector<2x32xf32>
    %627 = vector.extract_strided_slice %620 {offsets = [0, 32], sizes = [2, 32], strides = [1, 1]} : vector<2x128xf32> to vector<2x32xf32>
    %628 = arith.negf %627 : vector<2x32xf32>
    %629 = math.exp %628 : vector<2x32xf32>
    %cst_317 = arith.constant 1.000000e+00 : f32
    %630 = vector.broadcast %cst_317 : f32 to vector<2x32xf32>
    %631 = arith.addf %630, %629 : vector<2x32xf32>
    %632 = arith.divf %630, %631 : vector<2x32xf32>
    %633 = vector.extract_strided_slice %620 {offsets = [0, 64], sizes = [2, 32], strides = [1, 1]} : vector<2x128xf32> to vector<2x32xf32>
    %634 = math.tanh %633 : vector<2x32xf32>
    %635 = vector.extract_strided_slice %620 {offsets = [0, 96], sizes = [2, 32], strides = [1, 1]} : vector<2x128xf32> to vector<2x32xf32>
    %636 = arith.negf %635 : vector<2x32xf32>
    %637 = math.exp %636 : vector<2x32xf32>
    %cst_318 = arith.constant 1.000000e+00 : f32
    %638 = vector.broadcast %cst_318 : f32 to vector<2x32xf32>
    %639 = arith.addf %638, %637 : vector<2x32xf32>
    %640 = arith.divf %638, %639 : vector<2x32xf32>
    %641 = arith.mulf %632, %615 : vector<2x32xf32>
    %642 = arith.mulf %626, %634 : vector<2x32xf32>
    %643 = arith.addf %641, %642 : vector<2x32xf32>
    %644 = math.tanh %643 : vector<2x32xf32>
    %645 = arith.mulf %640, %644 : vector<2x32xf32>
    %c0_319 = arith.constant 0 : index
    %c0_320 = arith.constant 0 : index
    %646 = vector.load %arg12[%c0_319, %c0_320] : memref<2x32xf32, #tpu.memory_space<vmem>>, vector<2x32xf32>
    tpu.vector_store %arg12[%c0_319, %c0_320], %645 {strides = array<i32>} : memref<2x32xf32, #tpu.memory_space<vmem>>, vector<2x32xf32>,
    %c0_321 = arith.constant 0 : index
    %c0_322 = arith.constant 0 : index
    %647 = vector.load %arg13[%c0_321, %c0_322] : memref<2x32xf32, #tpu.memory_space<vmem>>, vector<2x32xf32>
    tpu.vector_store %arg13[%c0_321, %c0_322], %643 {strides = array<i32>} : memref<2x32xf32, #tpu.memory_space<vmem>>, vector<2x32xf32>,
    %c5_i32_323 = arith.constant 5 : i32
    %c0_324 = arith.constant 0 : index
    %c0_325 = arith.constant 0 : index
    %648 = vector.load %arg12[%c0_324, %c0_325] : memref<2x32xf32, #tpu.memory_space<vmem>>, vector<2x32xf32>
    %c0_326 = arith.constant 0 : index
    %c0_327 = arith.constant 0 : index
    %649 = vector.load %arg13[%c0_326, %c0_327] : memref<2x32xf32, #tpu.memory_space<vmem>>, vector<2x32xf32>
    %650 = arith.index_cast %c5_i32_323 : i32 to index
    %c0_328 = arith.constant 0 : index
    %c0_329 = arith.constant 0 : index
    %651 = vector.load %arg10[%650, %c0_328, %c0_329] : memref<8x2x128xf32, #tpu.memory_space<vmem>>, vector<1x2x128xf32>
    %652 = vector.shape_cast %651 : vector<1x2x128xf32> to vector<2x128xf32>
    %cst_330 = arith.constant dense<0.000000e+00> : vector<2x128xf32>
    %653 = tpu.matmul %648, %392, %cst_330 {dimension_numbers = #tpu.dot_dimension_numbers<[1], [0], [0], [1], [0, 0, 1, 1], [], []>} : vector<2x32xf32>, vector<32x128xf32>, vector<2x128xf32> -> vector<2x128xf32>
    %654 = arith.addf %652, %653 : vector<2x128xf32>
    %655 = vector.extract_strided_slice %654 {offsets = [0, 0], sizes = [2, 32], strides = [1, 1]} : vector<2x128xf32> to vector<2x32xf32>
    %656 = arith.negf %655 : vector<2x32xf32>
    %657 = math.exp %656 : vector<2x32xf32>
    %cst_331 = arith.constant 1.000000e+00 : f32
    %658 = vector.broadcast %cst_331 : f32 to vector<2x32xf32>
    %659 = arith.addf %658, %657 : vector<2x32xf32>
    %660 = arith.divf %658, %659 : vector<2x32xf32>
    %661 = vector.extract_strided_slice %654 {offsets = [0, 32], sizes = [2, 32], strides = [1, 1]} : vector<2x128xf32> to vector<2x32xf32>
    %662 = arith.negf %661 : vector<2x32xf32>
    %663 = math.exp %662 : vector<2x32xf32>
    %cst_332 = arith.constant 1.000000e+00 : f32
    %664 = vector.broadcast %cst_332 : f32 to vector<2x32xf32>
    %665 = arith.addf %664, %663 : vector<2x32xf32>
    %666 = arith.divf %664, %665 : vector<2x32xf32>
    %667 = vector.extract_strided_slice %654 {offsets = [0, 64], sizes = [2, 32], strides = [1, 1]} : vector<2x128xf32> to vector<2x32xf32>
    %668 = math.tanh %667 : vector<2x32xf32>
    %669 = vector.extract_strided_slice %654 {offsets = [0, 96], sizes = [2, 32], strides = [1, 1]} : vector<2x128xf32> to vector<2x32xf32>
    %670 = arith.negf %669 : vector<2x32xf32>
    %671 = math.exp %670 : vector<2x32xf32>
    %cst_333 = arith.constant 1.000000e+00 : f32
    %672 = vector.broadcast %cst_333 : f32 to vector<2x32xf32>
    %673 = arith.addf %672, %671 : vector<2x32xf32>
    %674 = arith.divf %672, %673 : vector<2x32xf32>
    %675 = arith.mulf %666, %649 : vector<2x32xf32>
    %676 = arith.mulf %660, %668 : vector<2x32xf32>
    %677 = arith.addf %675, %676 : vector<2x32xf32>
    %678 = math.tanh %677 : vector<2x32xf32>
    %679 = arith.mulf %674, %678 : vector<2x32xf32>
    %c0_334 = arith.constant 0 : index
    %c0_335 = arith.constant 0 : index
    %680 = vector.load %arg12[%c0_334, %c0_335] : memref<2x32xf32, #tpu.memory_space<vmem>>, vector<2x32xf32>
    tpu.vector_store %arg12[%c0_334, %c0_335], %679 {strides = array<i32>} : memref<2x32xf32, #tpu.memory_space<vmem>>, vector<2x32xf32>,
    %c0_336 = arith.constant 0 : index
    %c0_337 = arith.constant 0 : index
    %681 = vector.load %arg13[%c0_336, %c0_337] : memref<2x32xf32, #tpu.memory_space<vmem>>, vector<2x32xf32>
    tpu.vector_store %arg13[%c0_336, %c0_337], %677 {strides = array<i32>} : memref<2x32xf32, #tpu.memory_space<vmem>>, vector<2x32xf32>,
    %c6_i32_338 = arith.constant 6 : i32
    %c0_339 = arith.constant 0 : index
    %c0_340 = arith.constant 0 : index
    %682 = vector.load %arg12[%c0_339, %c0_340] : memref<2x32xf32, #tpu.memory_space<vmem>>, vector<2x32xf32>
    %c0_341 = arith.constant 0 : index
    %c0_342 = arith.constant 0 : index
    %683 = vector.load %arg13[%c0_341, %c0_342] : memref<2x32xf32, #tpu.memory_space<vmem>>, vector<2x32xf32>
    %684 = arith.index_cast %c6_i32_338 : i32 to index
    %c0_343 = arith.constant 0 : index
    %c0_344 = arith.constant 0 : index
    %685 = vector.load %arg10[%684, %c0_343, %c0_344] : memref<8x2x128xf32, #tpu.memory_space<vmem>>, vector<1x2x128xf32>
    %686 = vector.shape_cast %685 : vector<1x2x128xf32> to vector<2x128xf32>
    %cst_345 = arith.constant dense<0.000000e+00> : vector<2x128xf32>
    %687 = tpu.matmul %682, %392, %cst_345 {dimension_numbers = #tpu.dot_dimension_numbers<[1], [0], [0], [1], [0, 0, 1, 1], [], []>} : vector<2x32xf32>, vector<32x128xf32>, vector<2x128xf32> -> vector<2x128xf32>
    %688 = arith.addf %686, %687 : vector<2x128xf32>
    %689 = vector.extract_strided_slice %688 {offsets = [0, 0], sizes = [2, 32], strides = [1, 1]} : vector<2x128xf32> to vector<2x32xf32>
    %690 = arith.negf %689 : vector<2x32xf32>
    %691 = math.exp %690 : vector<2x32xf32>
    %cst_346 = arith.constant 1.000000e+00 : f32
    %692 = vector.broadcast %cst_346 : f32 to vector<2x32xf32>
    %693 = arith.addf %692, %691 : vector<2x32xf32>
    %694 = arith.divf %692, %693 : vector<2x32xf32>
    %695 = vector.extract_strided_slice %688 {offsets = [0, 32], sizes = [2, 32], strides = [1, 1]} : vector<2x128xf32> to vector<2x32xf32>
    %696 = arith.negf %695 : vector<2x32xf32>
    %697 = math.exp %696 : vector<2x32xf32>
    %cst_347 = arith.constant 1.000000e+00 : f32
    %698 = vector.broadcast %cst_347 : f32 to vector<2x32xf32>
    %699 = arith.addf %698, %697 : vector<2x32xf32>
    %700 = arith.divf %698, %699 : vector<2x32xf32>
    %701 = vector.extract_strided_slice %688 {offsets = [0, 64], sizes = [2, 32], strides = [1, 1]} : vector<2x128xf32> to vector<2x32xf32>
    %702 = math.tanh %701 : vector<2x32xf32>
    %703 = vector.extract_strided_slice %688 {offsets = [0, 96], sizes = [2, 32], strides = [1, 1]} : vector<2x128xf32> to vector<2x32xf32>
    %704 = arith.negf %703 : vector<2x32xf32>
    %705 = math.exp %704 : vector<2x32xf32>
    %cst_348 = arith.constant 1.000000e+00 : f32
    %706 = vector.broadcast %cst_348 : f32 to vector<2x32xf32>
    %707 = arith.addf %706, %705 : vector<2x32xf32>
    %708 = arith.divf %706, %707 : vector<2x32xf32>
    %709 = arith.mulf %700, %683 : vector<2x32xf32>
    %710 = arith.mulf %694, %702 : vector<2x32xf32>
    %711 = arith.addf %709, %710 : vector<2x32xf32>
    %712 = math.tanh %711 : vector<2x32xf32>
    %713 = arith.mulf %708, %712 : vector<2x32xf32>
    %c0_349 = arith.constant 0 : index
    %c0_350 = arith.constant 0 : index
    %714 = vector.load %arg12[%c0_349, %c0_350] : memref<2x32xf32, #tpu.memory_space<vmem>>, vector<2x32xf32>
    tpu.vector_store %arg12[%c0_349, %c0_350], %713 {strides = array<i32>} : memref<2x32xf32, #tpu.memory_space<vmem>>, vector<2x32xf32>,
    %c0_351 = arith.constant 0 : index
    %c0_352 = arith.constant 0 : index
    %715 = vector.load %arg13[%c0_351, %c0_352] : memref<2x32xf32, #tpu.memory_space<vmem>>, vector<2x32xf32>
    tpu.vector_store %arg13[%c0_351, %c0_352], %711 {strides = array<i32>} : memref<2x32xf32, #tpu.memory_space<vmem>>, vector<2x32xf32>,
    %c7_i32_353 = arith.constant 7 : i32
    %c0_354 = arith.constant 0 : index
    %c0_355 = arith.constant 0 : index
    %716 = vector.load %arg12[%c0_354, %c0_355] : memref<2x32xf32, #tpu.memory_space<vmem>>, vector<2x32xf32>
    %c0_356 = arith.constant 0 : index
    %c0_357 = arith.constant 0 : index
    %717 = vector.load %arg13[%c0_356, %c0_357] : memref<2x32xf32, #tpu.memory_space<vmem>>, vector<2x32xf32>
    %718 = arith.index_cast %c7_i32_353 : i32 to index
    %c0_358 = arith.constant 0 : index
    %c0_359 = arith.constant 0 : index
    %719 = vector.load %arg10[%718, %c0_358, %c0_359] : memref<8x2x128xf32, #tpu.memory_space<vmem>>, vector<1x2x128xf32>
    %720 = vector.shape_cast %719 : vector<1x2x128xf32> to vector<2x128xf32>
    %cst_360 = arith.constant dense<0.000000e+00> : vector<2x128xf32>
    %721 = tpu.matmul %716, %392, %cst_360 {dimension_numbers = #tpu.dot_dimension_numbers<[1], [0], [0], [1], [0, 0, 1, 1], [], []>} : vector<2x32xf32>, vector<32x128xf32>, vector<2x128xf32> -> vector<2x128xf32>
    %722 = arith.addf %720, %721 : vector<2x128xf32>
    %723 = vector.extract_strided_slice %722 {offsets = [0, 0], sizes = [2, 32], strides = [1, 1]} : vector<2x128xf32> to vector<2x32xf32>
    %724 = arith.negf %723 : vector<2x32xf32>
    %725 = math.exp %724 : vector<2x32xf32>
    %cst_361 = arith.constant 1.000000e+00 : f32
    %726 = vector.broadcast %cst_361 : f32 to vector<2x32xf32>
    %727 = arith.addf %726, %725 : vector<2x32xf32>
    %728 = arith.divf %726, %727 : vector<2x32xf32>
    %729 = vector.extract_strided_slice %722 {offsets = [0, 32], sizes = [2, 32], strides = [1, 1]} : vector<2x128xf32> to vector<2x32xf32>
    %730 = arith.negf %729 : vector<2x32xf32>
    %731 = math.exp %730 : vector<2x32xf32>
    %cst_362 = arith.constant 1.000000e+00 : f32
    %732 = vector.broadcast %cst_362 : f32 to vector<2x32xf32>
    %733 = arith.addf %732, %731 : vector<2x32xf32>
    %734 = arith.divf %732, %733 : vector<2x32xf32>
    %735 = vector.extract_strided_slice %722 {offsets = [0, 64], sizes = [2, 32], strides = [1, 1]} : vector<2x128xf32> to vector<2x32xf32>
    %736 = math.tanh %735 : vector<2x32xf32>
    %737 = vector.extract_strided_slice %722 {offsets = [0, 96], sizes = [2, 32], strides = [1, 1]} : vector<2x128xf32> to vector<2x32xf32>
    %738 = arith.negf %737 : vector<2x32xf32>
    %739 = math.exp %738 : vector<2x32xf32>
    %cst_363 = arith.constant 1.000000e+00 : f32
    %740 = vector.broadcast %cst_363 : f32 to vector<2x32xf32>
    %741 = arith.addf %740, %739 : vector<2x32xf32>
    %742 = arith.divf %740, %741 : vector<2x32xf32>
    %743 = arith.mulf %734, %717 : vector<2x32xf32>
    %744 = arith.mulf %728, %736 : vector<2x32xf32>
    %745 = arith.addf %743, %744 : vector<2x32xf32>
    %746 = math.tanh %745 : vector<2x32xf32>
    %747 = arith.mulf %742, %746 : vector<2x32xf32>
    %c0_364 = arith.constant 0 : index
    %c0_365 = arith.constant 0 : index
    %748 = vector.load %arg12[%c0_364, %c0_365] : memref<2x32xf32, #tpu.memory_space<vmem>>, vector<2x32xf32>
    tpu.vector_store %arg12[%c0_364, %c0_365], %747 {strides = array<i32>} : memref<2x32xf32, #tpu.memory_space<vmem>>, vector<2x32xf32>,
    %c0_366 = arith.constant 0 : index
    %c0_367 = arith.constant 0 : index
    %749 = vector.load %arg13[%c0_366, %c0_367] : memref<2x32xf32, #tpu.memory_space<vmem>>, vector<2x32xf32>
    tpu.vector_store %arg13[%c0_366, %c0_367], %745 {strides = array<i32>} : memref<2x32xf32, #tpu.memory_space<vmem>>, vector<2x32xf32>,
    %c8_i32_368 = arith.constant 8 : i32
    %c0_369 = arith.constant 0 : index
    %c0_370 = arith.constant 0 : index
    %750 = vector.load %arg12[%c0_369, %c0_370] : memref<2x32xf32, #tpu.memory_space<vmem>>, vector<2x32xf32>
    %c0_371 = arith.constant 0 : index
    %c0_372 = arith.constant 0 : index
    %751 = vector.load %arg7[%c0_371, %c0_372] : memref<32x4xf32, #tpu.memory_space<vmem>>, vector<32x4xf32>
    %cst_373 = arith.constant dense<0.000000e+00> : vector<2x4xf32>
    %752 = tpu.matmul %750, %751, %cst_373 {dimension_numbers = #tpu.dot_dimension_numbers<[1], [0], [0], [1], [0, 0, 1, 1], [], []>} : vector<2x32xf32>, vector<32x4xf32>, vector<2x4xf32> -> vector<2x4xf32>
    %c0_374 = arith.constant 0 : index
    %c0_375 = arith.constant 0 : index
    %753 = vector.load %arg8[%c0_374, %c0_375] : memref<1x4xf32, #tpu.memory_space<vmem>>, vector<1x4xf32>
    %754 = vector.broadcast %753 : vector<1x4xf32> to vector<2x4xf32>
    %755 = arith.addf %752, %754 : vector<2x4xf32>
    %c0_376 = arith.constant 0 : index
    %c0_377 = arith.constant 0 : index
    %756 = vector.load %arg9[%c0_376, %c0_377] : memref<2x4xf32, #tpu.memory_space<vmem>>, vector<2x4xf32>
    tpu.vector_store %arg9[%c0_376, %c0_377], %755 {strides = array<i32>} : memref<2x4xf32, #tpu.memory_space<vmem>>, vector<2x4xf32>,
    return
  }
}

</mosaic_0001>

<bundles_post_ra>
// kernel: lstm_model_forward.1
= control target key start
LH: loop header
LB: loop body
LE: loop exit
PB: predicated region body
PF: predicated region fallthrough
CT: control target
= control target key end

     0   :  { %v4110_v2 = vmov 0.0|0.0   ;;  %vm4111_vm0 = vmmov 0   ;;  %v4112_v4 = vmov 0.0   ;;  %vm661_vm1 = vcmask 254976   ;;  %s4657_s0 = inlined_call_operand.vmem [shape: f32[8,2,16], index: 0, kind: input, shape index: {}]   ;;  %s4658_s1 = inlined_call_operand.vmem [shape: f32[16,128], index: 1, kind: input, shape index: {}]   ;;  %s4659_s2 = inlined_call_operand.vmem [shape: f32[32,128], index: 2, kind: input, shape index: {}]   ;;  %s4660_s3 = inlined_call_operand.vmem [shape: f32[1,128], index: 3, kind: input, shape index: {}]   ;;  %s4661_s4 = inlined_call_operand.vmem [shape: f32[32,128], index: 4, kind: input, shape index: {}]   ;;  %s4662_s5 = inlined_call_operand.vmem [shape: f32[32,128], index: 5, kind: input, shape index: {}]   ;;  %s4663_s6 = inlined_call_operand.vmem [shape: f32[1,128], index: 6, kind: input, shape index: {}]   ;;  %s4664_s7 = inlined_call_operand.vmem [shape: f32[32,4], index: 7, kind: input, shape index: {}]   ;;  %s4665_s8 = inlined_call_operand.vmem [shape: f32[1,4], index: 8, kind: input, shape index: {}]   ;;  %s4666_s9 = inlined_call_operand.hbm [shape: f32[2,4], index: 9, kind: output, shape index: {}]  }
   0x1   :  { %v33_v0 = vld [vmem:[%s4658_s1] sm:$0xff]  ;;  %v34_v1 = vld [vmem:[%s4658_s1 + $0x8] sm:$0xff]  ;;  %3783 = vmatprep.subr.bf16.mxu0 %v4110_v2  ;;  %3464 = vmatprep.mubr.msk.f32.mxu0 %vm4111_vm0, %v4112_v4  ;;  %vm47_vm2 = vcmask 130048   ;;  %662 = vst.msk [vmem:[#allocation4] sm:$0x3] %vm661_vm1, %v4112_v4 }
   0x2   :  { %v4174_v3 = vpack.c.bf16 %v34_v1, %v33_v0  ;;  %3777 = vmatprep.subr.bf16.mxu1 %v4110_v2  ;;  %3450 = vmatprep.mubr.msk.f32.mxu1 %vm4111_vm0, %v4112_v4  ;;  %v3242_v5 = vld [vmem:[%s4657_s0 + $0x4] sm:$0x3]  ;;  %v40_v6 = vld [vmem:[%s4657_s0] sm:$0x3]  ;;  %663 = vst.msk [vmem:[#allocation5] sm:$0x3] %vm661_vm1, %v4112_v4 }
   0x4   :  { %3785 = vmatpush3.bf16.msra.mxu0 %v4174_v3  ;;  %3779 = vmatpush3.bf16.msra.mxu1 %v4174_v3 }
   0x5   :  { %3789 = vmatprep.subr.bf16.mxu0 %v4110_v2  ;;  %3780 = vmatprep.subr.bf16.mxu1 %v4110_v2 }
   0x6   :  { %14 = vsyncpa [#allocation7], 0  ;;  %v3246_v7 = vld [vmem:[%s4657_s0 + $0x8] sm:$0x3]  ;;  %v35_v8 = vld [vmem:[%s4659_s2] sm:$0xff]  ;;  %vm667_vm3 = vcmask 261120  }
   0x7   :  { %3465 = vmatmul.mubr.msk.f32.vlgmr.msra.gmra.mrb[0].mxu0 %vm47_vm2, %v3242_v5  ;;  %3451 = vmatmul.mubr.msk.f32.vlgmr.msra.gmra.mrb[0].mxu1 %vm47_vm2, %v40_v6  ;;  %v36_v9 = vld [vmem:[%s4659_s2 + $0x8] sm:$0xff]  ;;  %v37_v12 = vld [vmem:[%s4659_s2 + $0x10] sm:$0xff]  ;;  %v38_v13 = vld [vmem:[%s4659_s2 + $0x18] sm:$0xff]  ;;  %s4114_s29 = smov 32   ;;  %s4115_s1 = smov 96   ;;  %vm3222_vm4 = vcmask 25600  }
   0x8   :  { %3791 = vmatpush3.bf16.msra.mxu0 %v4174_v3  ;;  %3478 = vmatprep.mubr.msk.f32.mxu0 %vm4111_vm0, %v4112_v4  ;;  %v3250_v10 = vld [vmem:[%s4657_s0 + $0xc] sm:$0x3]  ;;  %v4221_v11 = vpack.c.bf16 %v36_v9, %v35_v8  ;;  %v4232_v14 = vpack.c.bf16 %v38_v13, %v37_v12  ;;  %v664_v15 = vld [vmem:[#allocation4] sm:$0x3]  ;;  %v3240_v46 = vld [vmem:[%s4657_s0 + $0x2] sm:$0x3] }
   0x9   :  { %3795 = vmatprep.subr.bf16.mxu0 %v4110_v2  ;;  %3782 = vmatpush3.bf16.msra.mxu1 %v4174_v3  ;;  %v4249_v16 = vld [vmem:[%s4660_s3] ss:$0 sm:$0xff]  ;;  %s4113_s3 = smov 64   ;;  %v665_v34 = vld [vmem:[#allocation5] sm:$0x3] }
   0xa   :  { %3457 = vmatprep.mubr.msk.f32.mxu1 %vm4111_vm0, %v4112_v4  ;;  %3786 = vmatprep.subr.bf16.mxu1 %v4110_v2  ;;  %v3244_v47 = vld [vmem:[%s4657_s0 + $0x6] sm:$0x3]  ;;  %v3248_v48 = vld [vmem:[%s4657_s0 + $0xa] sm:$0x3]  ;;  %v3252_v49 = vld [vmem:[%s4657_s0 + $0xe] sm:$0x3] }
   0xb   :  { %3479 = vmatmul.mubr.msk.f32.vlgmr.msra.gmra.mrb[2].mxu0 %vm47_vm2, %v3246_v7 }
   0xc   :  { %3797 = vmatpush3.bf16.msra.mxu0 %v4174_v3  ;;  %3492 = vmatprep.mubr.msk.f32.mxu0 %vm4111_vm0, %v4112_v4 }
   0xd   :  { %3801 = vmatprep.subr.bf16.mxu0 %v4110_v2  ;;  %3458 = vmatmul.mubr.msk.f32.vlgmr.msra.gmra.mrb[2].mxu1 %vm47_vm2, %v3240_v46 }
   0xe   :  { %3788 = vmatpush3.bf16.msra.mxu1 %v4174_v3  ;;  %3471 = vmatprep.mubr.msk.f32.mxu1 %vm4111_vm0, %v4112_v4 }
   0xf   :  { %3493 = vmatmul.mubr.msk.f32.vlgmr.msra.gmra.mrb[4].mxu0 %vm47_vm2, %v3250_v10  ;;  %3792 = vmatprep.subr.bf16.mxu1 %v4110_v2 }
  0x10   :  { %3803 = vmatpush3.bf16.msra.mxu0 %v4221_v11  ;;  %3510 = vmatprep.mubr.msk.f32.mxu0 %vm4111_vm0, %v4112_v4 }
  0x11   :  { %3804 = vmatprep.subr.bf16.mxu0 %v4110_v2  ;;  %3472 = vmatmul.mubr.msk.f32.vlgmr.msra.gmra.mrb[4].mxu1 %vm47_vm2, %v3244_v47 }
  0x12   :  { %3794 = vmatpush3.bf16.msra.mxu1 %v4174_v3  ;;  %3485 = vmatprep.mubr.msk.f32.mxu1 %vm4111_vm0, %v4112_v4 }
  0x13   :  { %3798 = vmatprep.subr.bf16.mxu1 %v4110_v2 }
  0x14   :  { %3806 = vmatpush3.bf16.msra.mxu0 %v4232_v14 }
  0x15   :  { %3813 = vmatprep.subr.bf16.mxu0 %v4110_v2  ;;  %3486 = vmatmul.mubr.msk.f32.vlgmr.msra.gmra.mrb[6].mxu1 %vm47_vm2, %v3248_v48 }
  0x16   :  { %3800 = vmatpush3.bf16.msra.mxu1 %v4174_v3  ;;  %3499 = vmatprep.mubr.msk.f32.mxu1 %vm4111_vm0, %v4112_v4 }
  0x17   :  { %3511 = vmatmul.mubr.msk.f32.vlgmr.msra.gmra.mrb[6].mxu0 %vm667_vm3, %v664_v15  ;;  %3807 = vmatprep.subr.bf16.mxu1 %v4110_v2 }
  0x18   :  { %3815 = vmatpush3.bf16.msra.mxu0 %v4221_v11  ;;  %3532 = vmatprep.mubr.msk.f32.mxu0 %vm4111_vm0, %v4112_v4 }
  0x19   :  { %3816 = vmatprep.subr.bf16.mxu0 %v4110_v2  ;;  %3500 = vmatmul.mubr.msk.f32.vlgmr.msra.gmra.mrb[8].mxu1 %vm47_vm2, %v3252_v49 }
  0x1a   :  { %3809 = vmatpush3.bf16.msra.mxu1 %v4221_v11  ;;  %3521 = vmatprep.mubr.msk.f32.mxu1 %vm4111_vm0, %v4112_v4 }
  0x1b   :  { %3810 = vmatprep.subr.bf16.mxu1 %v4110_v2 }
  0x1c   :  { %3818 = vmatpush3.bf16.msra.mxu0 %v4232_v14 }
  0x1d   :  { %3825 = vmatprep.subr.bf16.mxu0 %v4110_v2 }
  0x1e   :  { %3812 = vmatpush3.bf16.msra.mxu1 %v4232_v14 }
  0x1f   :  { %3819 = vmatprep.subr.bf16.mxu1 %v4110_v2 }
  0xda   :  { %v270_v17 = vpop.f32.mrb[0].mxu0  ;;  %v117_v18 = vpop.f32.mrb[0].mxu1 }
  0xdb   :  { %v271_v19 = vadd.f32 %v4249_v16, %v270_v17  ;;  %v3466_v20 = vpop.f32.mrb[1].mxu0  ;;  %v118_v21 = vadd.f32 %v4249_v16, %v117_v18  ;;  %v3452_v22 = vpop.f32.mrb[1].mxu1 }
  0xdd   :  { %275 = vst [vmem:[#allocation2 + $0x4] sm:$0x3] %v271_v19  ;;  %121 = vst [vmem:[#allocation2] sm:$0x3] %v118_v21 }
  0xde   :  { %v424_v23 = vpop.f32.mrb[2].mxu0 }
  0xdf   :  { %v425_v24 = vadd.f32 %v4249_v16, %v424_v23  ;;  %v3480_v25 = vpop.f32.mrb[3].mxu0 }
  0xe0   :  { %v193_v54 = vpop.f32.mrb[2].mxu1 }
  0xe1   :  { %429 = vst [vmem:[#allocation2 + $0x8] sm:$0x3] %v425_v24  ;;  %v194_v55 = vadd.f32 %v4249_v16, %v193_v54  ;;  %v3459_v56 = vpop.f32.mrb[3].mxu1 }
  0xe2   :  { %v578_v26 = vpop.f32.mrb[4].mxu0 }
  0xe3   :  { %v579_v27 = vadd.f32 %v4249_v16, %v578_v26  ;;  %v3494_v28 = vpop.f32.mrb[5].mxu0  ;;  %198 = vst [vmem:[#allocation2 + $0x2] sm:$0x3] %v194_v55 }
  0xe4   :  { %v666_v29 = vld [vmem:[#allocation2] sm:$0x3]  ;;  %v347_v57 = vpop.f32.mrb[4].mxu1 }
  0xe5   :  { %583 = vst [vmem:[#allocation2 + $0xc] sm:$0x3] %v579_v27  ;;  %v348_v58 = vadd.f32 %v4249_v16, %v347_v57  ;;  %v3473_v59 = vpop.f32.mrb[5].mxu1 }
  0xe7   :  { %352 = vst [vmem:[#allocation2 + $0x6] sm:$0x3] %v348_v58 }
  0xe8   :  { %v501_v60 = vpop.f32.mrb[6].mxu1 }
  0xe9   :  { %v502_v61 = vadd.f32 %v4249_v16, %v501_v60  ;;  %v3487_v62 = vpop.f32.mrb[7].mxu1 }
  0xea   :  { %v737_v30 = vpop.f32.mrb[6].mxu0  ;;  %v783_v6 = vld [vmem:[#allocation2 + $0x2] sm:$0x3] }
  0xeb   :  { %v741_v31 = vadd.f32 %v737_v30, %v666_v29  ;;  %v3512_v32 = vpop.f32.mrb[7].mxu0  ;;  %506 = vst [vmem:[#allocation2 + $0xa] sm:$0x3] %v502_v61  ;;  %v900_v30 = vld [vmem:[#allocation2 + $0x4] sm:$0x3] }
  0xec   :  { %v655_v1 = vpop.f32.mrb[8].mxu1 }
  0xed   :  { %3958 = vtanh.f32 %v741_v31  ;;  %v3255_v35 = vmul.f32 -1.442695, %v741_v31  ;;  %v656_v3 = vadd.f32 %v4249_v16, %v655_v1  ;;  %v3501_v5 = vpop.f32.mrb[9].mxu1 }
  0xef   :  { %3960 = vpow2.f32 %v3255_v35  ;;  %660 = vst [vmem:[#allocation2 + $0xe] sm:$0x3] %v656_v3 }
  0xf7   :  { %v3959_v33 = vpop.eup %3958 }
  0xf8   :  { %755 = vrot.lane.b32.xlu0 %v3959_v33, %s4113_s3 }
  0xf9   :  { %v3961_v36 = vpop.eup %3960 }
  0xfa   :  { %v745_v37 = vadd.f32 1.0, %v3961_v36 }
  0xfc   :  { %750 = vrot.lane.b32.xlu0 %v665_v34, %s4114_s29  ;;  %3962 = vrcp.f32 %v745_v37 }
 0x106   :  { %v3963_v38 = vpop.eup %3962 }
 0x16a   :  { %v756_v39 = vpop.permute.xlu0 %755 }
 0x16b   :  { %v758_v40 = vmul.f32 %v3963_v38, %v756_v39 }
 0x16d   :  { %760 = vrot.lane.b32.xlu1 %v758_v40, %s4114_s29 }
 0x16e   :  { %v751_v41 = vpop.permute.xlu0 %750 }
 0x16f   :  { %v753_v42 = vmul.f32 %v3963_v38, %v751_v41 }
 0x1df   :  { %v761_v43 = vpop.permute.xlu1 %760 }
 0x1e0   :  { %v763_v44 = vadd.f32 %v761_v43, %v753_v42 }
 0x1e2   :  { %3964 = vtanh.f32 %v763_v44 }
 0x1ec   :  { %v3965_v45 = vpop.eup %3964 }
 0x1ed   :  { %766 = vrot.lane.b32.xlu1 %v3965_v45, %s4113_s3 }
 0x1f1   :  { %776 = vrot.lane.b32.xlu1 %v763_v44, %s4115_s1 }
 0x25f   :  { %v767_v50 = vpop.permute.xlu1 %766 }
 0x260   :  { %v769_v51 = vmul.f32 %v3963_v38, %v767_v50 }
 0x262   :  { %771 = vrot.lane.b32.xlu0 %v769_v51, %s4114_s29 }
 0x263   :  { %v777_v52 = vpop.permute.xlu1 %776 }
 0x264   :  { %779 = vst.msk [vmem:[#allocation5] sm:$0x3] %vm661_vm1, %v777_v52  ;;  %v1017_v52 = vld [vmem:[#allocation2 + $0x6] sm:$0x3] }
 0x26b   :  { %v782_v53 = vld [vmem:[#allocation5] sm:$0x3] }
 0x26c   :  { %866 = vrot.lane.b32.xlu1 %v782_v53, %s4114_s29 }
 0x2d4   :  { %v772_v63 = vpop.permute.xlu0 %771 }
 0x2d5   :  { %774 = vst.msk [vmem:[#allocation4] sm:$0x3] %vm661_vm1, %v772_v63  ;;  %780 = vst.msk [vmem:[#allocation3] sm:$0x3] %vm661_vm1, %v772_v63 }
 0x2dc   :  { %v781_v0 = vld [vmem:[#allocation4] sm:$0x3] }
 0x2dd   :  { %3522 = vmatmul.mubr.msk.f32.vlgmr.msra.gmra.mrb[10].mxu1 %vm667_vm3, %v781_v0 }
 0x2de   :  { %3821 = vmatpush3.bf16.msra.mxu1 %v4221_v11  ;;  %3543 = vmatprep.mubr.msk.f32.mxu1 %vm4111_vm0, %v4112_v4  ;;  %v867_v16 = vpop.permute.xlu1 %866 }
 0x2df   :  { %3822 = vmatprep.subr.bf16.mxu1 %v4110_v2 }
 0x2e2   :  { %3824 = vmatpush3.bf16.msra.mxu1 %v4232_v14 }
 0x2e3   :  { %3831 = vmatprep.subr.bf16.mxu1 %v4110_v2 }
 0x3b0   :  { %v853_v7 = vpop.f32.mrb[10].mxu1 }
 0x3b1   :  { %v857_v8 = vadd.f32 %v853_v7, %v783_v6  ;;  %v3523_v9 = vpop.f32.mrb[11].mxu1 }
 0x3b3   :  { %3966 = vtanh.f32 %v857_v8  ;;  %v3257_v12 = vmul.f32 -1.442695, %v857_v8 }
 0x3b5   :  { %3968 = vpow2.f32 %v3257_v12 }
 0x3bd   :  { %v3967_v10 = vpop.eup %3966 }
 0x3be   :  { %871 = vrot.lane.b32.xlu0 %v3967_v10, %s4113_s3 }
 0x3bf   :  { %v3969_v13 = vpop.eup %3968 }
 0x3c0   :  { %v861_v15 = vadd.f32 1.0, %v3969_v13  ;;  %v1134_v13 = vld [vmem:[#allocation2 + $0x8] sm:$0x3] }
 0x3c2   :  { %3970 = vrcp.f32 %v861_v15 }
 0x3cc   :  { %v3971_v17 = vpop.eup %3970 }
 0x3cd   :  { %v869_v20 = vmul.f32 %v3971_v17, %v867_v16 }
 0x430   :  { %v872_v18 = vpop.permute.xlu0 %871 }
 0x431   :  { %v874_v19 = vmul.f32 %v3971_v17, %v872_v18 }
 0x433   :  { %876 = vrot.lane.b32.xlu0 %v874_v19, %s4114_s29 }
 0x4a5   :  { %v877_v21 = vpop.permute.xlu0 %876 }
 0x4a6   :  { %v879_v22 = vadd.f32 %v877_v21, %v869_v20 }
 0x4a8   :  { %3972 = vtanh.f32 %v879_v22 }
 0x4b2   :  { %v3973_v23 = vpop.eup %3972 }
 0x4b3   :  { %882 = vrot.lane.b32.xlu1 %v3973_v23, %s4113_s3 }
 0x4b7   :  { %892 = vrot.lane.b32.xlu1 %v879_v22, %s4115_s1 }
 0x525   :  { %v883_v24 = vpop.permute.xlu1 %882 }
 0x526   :  { %v885_v25 = vmul.f32 %v3971_v17, %v883_v24 }
 0x528   :  { %887 = vrot.lane.b32.xlu0 %v885_v25, %s4114_s29 }
 0x529   :  { %v893_v26 = vpop.permute.xlu1 %892 }
 0x52a   :  { %895 = vst.msk [vmem:[#allocation5] sm:$0x3] %vm661_vm1, %v893_v26 }
 0x531   :  { %v899_v27 = vld [vmem:[#allocation5] sm:$0x3] }
 0x532   :  { %983 = vrot.lane.b32.xlu1 %v899_v27, %s4114_s29 }
 0x59a   :  { %v888_v28 = vpop.permute.xlu0 %887 }
 0x59b   :  { %890 = vst.msk [vmem:[#allocation4] sm:$0x3] %vm661_vm1, %v888_v28  ;;  %897 = vst.msk [vmem:[#allocation3 + $0x2] sm:$0x3] %vm661_vm1, %v888_v28 }
 0x5a2   :  { %v898_v29 = vld [vmem:[#allocation4] sm:$0x3] }
 0x5a3   :  { %3533 = vmatmul.mubr.msk.f32.vlgmr.msra.gmra.mrb[8].mxu0 %vm667_vm3, %v898_v29 }
 0x5a4   :  { %3827 = vmatpush3.bf16.msra.mxu0 %v4221_v11  ;;  %3554 = vmatprep.mubr.msk.f32.mxu0 %vm4111_vm0, %v4112_v4  ;;  %v984_v41 = vpop.permute.xlu1 %983 }
 0x5a5   :  { %3828 = vmatprep.subr.bf16.mxu0 %v4110_v2 }
 0x5a8   :  { %3830 = vmatpush3.bf16.msra.mxu0 %v4232_v14 }
 0x5a9   :  { %3837 = vmatprep.subr.bf16.mxu0 %v4110_v2 }
 0x676   :  { %v970_v31 = vpop.f32.mrb[8].mxu0 }
 0x677   :  { %v974_v32 = vadd.f32 %v970_v31, %v900_v30  ;;  %v3534_v33 = vpop.f32.mrb[9].mxu0 }
 0x679   :  { %3974 = vtanh.f32 %v974_v32  ;;  %v3259_v35 = vmul.f32 -1.442695, %v974_v32 }
 0x67b   :  { %3976 = vpow2.f32 %v3259_v35 }
 0x683   :  { %v3975_v34 = vpop.eup %3974 }
 0x684   :  { %988 = vrot.lane.b32.xlu0 %v3975_v34, %s4113_s3 }
 0x685   :  { %v3977_v36 = vpop.eup %3976 }
 0x686   :  { %v978_v37 = vadd.f32 1.0, %v3977_v36  ;;  %v1251_v36 = vld [vmem:[#allocation2 + $0xa] sm:$0x3] }
 0x688   :  { %3978 = vrcp.f32 %v978_v37 }
 0x692   :  { %v3979_v38 = vpop.eup %3978 }
 0x693   :  { %v986_v42 = vmul.f32 %v3979_v38, %v984_v41 }
 0x6f6   :  { %v989_v39 = vpop.permute.xlu0 %988 }
 0x6f7   :  { %v991_v40 = vmul.f32 %v3979_v38, %v989_v39 }
 0x6f9   :  { %993 = vrot.lane.b32.xlu0 %v991_v40, %s4114_s29 }
 0x76b   :  { %v994_v43 = vpop.permute.xlu0 %993 }
 0x76c   :  { %v996_v44 = vadd.f32 %v994_v43, %v986_v42 }
 0x76e   :  { %3980 = vtanh.f32 %v996_v44 }
 0x778   :  { %v3981_v45 = vpop.eup %3980 }
 0x779   :  { %999 = vrot.lane.b32.xlu1 %v3981_v45, %s4113_s3 }
 0x77d   :  { %1009 = vrot.lane.b32.xlu1 %v996_v44, %s4115_s1 }
 0x7eb   :  { %v1000_v46 = vpop.permute.xlu1 %999 }
 0x7ec   :  { %v1002_v47 = vmul.f32 %v3979_v38, %v1000_v46 }
 0x7ee   :  { %1004 = vrot.lane.b32.xlu0 %v1002_v47, %s4114_s29 }
 0x7ef   :  { %v1010_v48 = vpop.permute.xlu1 %1009 }
 0x7f0   :  { %1012 = vst.msk [vmem:[#allocation5] sm:$0x3] %vm661_vm1, %v1010_v48 }
 0x7f7   :  { %v1016_v49 = vld [vmem:[#allocation5] sm:$0x3] }
 0x7f8   :  { %1100 = vrot.lane.b32.xlu1 %v1016_v49, %s4114_s29 }
 0x860   :  { %v1005_v50 = vpop.permute.xlu0 %1004 }
 0x861   :  { %1007 = vst.msk [vmem:[#allocation4] sm:$0x3] %vm661_vm1, %v1005_v50  ;;  %1014 = vst.msk [vmem:[#allocation3 + $0x4] sm:$0x3] %vm661_vm1, %v1005_v50 }
 0x868   :  { %v1015_v51 = vld [vmem:[#allocation4] sm:$0x3] }
 0x869   :  { %3544 = vmatmul.mubr.msk.f32.vlgmr.msra.gmra.mrb[12].mxu1 %vm667_vm3, %v1015_v51 }
 0x86a   :  { %3833 = vmatpush3.bf16.msra.mxu1 %v4221_v11  ;;  %3565 = vmatprep.mubr.msk.f32.mxu1 %vm4111_vm0, %v4112_v4  ;;  %v1101_v63 = vpop.permute.xlu1 %1100 }
 0x86b   :  { %3834 = vmatprep.subr.bf16.mxu1 %v4110_v2 }
 0x86e   :  { %3836 = vmatpush3.bf16.msra.mxu1 %v4232_v14 }
 0x86f   :  { %3843 = vmatprep.subr.bf16.mxu1 %v4110_v2 }
 0x93c   :  { %v1087_v53 = vpop.f32.mrb[12].mxu1 }
 0x93d   :  { %v1091_v54 = vadd.f32 %v1087_v53, %v1017_v52  ;;  %v3545_v55 = vpop.f32.mrb[13].mxu1 }
 0x93e   :  { %v1600_v55 = vld [vmem:[%s4661_s4] sm:$0xff] }
 0x93f   :  { %3982 = vtanh.f32 %v1091_v54  ;;  %v3261_v57 = vmul.f32 -1.442695, %v1091_v54 }
 0x941   :  { %3984 = vpow2.f32 %v3261_v57 }
 0x949   :  { %v3983_v56 = vpop.eup %3982 }
 0x94a   :  { %1105 = vrot.lane.b32.xlu0 %v3983_v56, %s4113_s3  ;;  %v1601_v56 = vld [vmem:[%s4661_s4 + $0x8] sm:$0xff] }
 0x94b   :  { %v3985_v58 = vpop.eup %3984  ;;  %v4389_v57 = vpack.c.bf16 %v1601_v56, %v1600_v55 }
 0x94c   :  { %v1095_v59 = vadd.f32 1.0, %v3985_v58  ;;  %v1602_v58 = vld [vmem:[%s4661_s4 + $0x10] sm:$0xff] }
 0x94e   :  { %3986 = vrcp.f32 %v1095_v59  ;;  %v1603_v59 = vld [vmem:[%s4661_s4 + $0x18] sm:$0xff] }
 0x958   :  { %v3987_v60 = vpop.eup %3986 }
 0x959   :  { %v1103_v0 = vmul.f32 %v3987_v60, %v1101_v63  ;;  %v1765_v63 = vld [vmem:[#allocation3 + $0x4] sm:$0x3] }
 0x9bc   :  { %v1106_v61 = vpop.permute.xlu0 %1105 }
 0x9bd   :  { %v1108_v62 = vmul.f32 %v3987_v60, %v1106_v61  ;;  %v4399_v61 = vpack.c.bf16 %v1603_v59, %v1602_v58 }
 0x9bf   :  { %1110 = vrot.lane.b32.xlu0 %v1108_v62, %s4114_s29  ;;  %v1609_v62 = vld [vmem:[#allocation3] sm:$0x3] }
 0xa31   :  { %v1111_v1 = vpop.permute.xlu0 %1110 }
 0xa32   :  { %v1113_v3 = vadd.f32 %v1111_v1, %v1103_v0  ;;  %v1368_v1 = vld [vmem:[#allocation2 + $0xc] sm:$0x3] }
 0xa34   :  { %3988 = vtanh.f32 %v1113_v3 }
 0xa3e   :  { %v3989_v5 = vpop.eup %3988 }
 0xa3f   :  { %1116 = vrot.lane.b32.xlu1 %v3989_v5, %s4113_s3 }
 0xa43   :  { %1126 = vrot.lane.b32.xlu1 %v1113_v3, %s4115_s1 }
 0xab1   :  { %v1117_v6 = vpop.permute.xlu1 %1116 }
 0xab2   :  { %v1119_v7 = vmul.f32 %v3987_v60, %v1117_v6 }
 0xab4   :  { %1121 = vrot.lane.b32.xlu0 %v1119_v7, %s4114_s29  ;;  %v4430_v7 = vld [vmem:[%s4663_s6] ss:$0 sm:$0xff] }
 0xab5   :  { %v1127_v8 = vpop.permute.xlu1 %1126 }
 0xab6   :  { %1129 = vst.msk [vmem:[#allocation5] sm:$0x3] %vm661_vm1, %v1127_v8 }
 0xabd   :  { %v1133_v9 = vld [vmem:[#allocation5] sm:$0x3] }
 0xabe   :  { %1217 = vrot.lane.b32.xlu1 %v1133_v9, %s4114_s29 }
 0xb26   :  { %v1122_v10 = vpop.permute.xlu0 %1121 }
 0xb27   :  { %1124 = vst.msk [vmem:[#allocation4] sm:$0x3] %vm661_vm1, %v1122_v10  ;;  %1131 = vst.msk [vmem:[#allocation3 + $0x6] sm:$0x3] %vm661_vm1, %v1122_v10 }
 0xb2e   :  { %v1132_v12 = vld [vmem:[#allocation4] sm:$0x3] }
 0xb2f   :  { %3555 = vmatmul.mubr.msk.f32.vlgmr.msra.gmra.mrb[10].mxu0 %vm667_vm3, %v1132_v12 }
 0xb30   :  { %3839 = vmatpush3.bf16.msra.mxu0 %v4221_v11  ;;  %3576 = vmatprep.mubr.msk.f32.mxu0 %vm4111_vm0, %v4112_v4  ;;  %v1218_v25 = vpop.permute.xlu1 %1217 }
 0xb31   :  { %3840 = vmatprep.subr.bf16.mxu0 %v4110_v2 }
 0xb34   :  { %3842 = vmatpush3.bf16.msra.mxu0 %v4232_v14 }
 0xb35   :  { %3849 = vmatprep.subr.bf16.mxu0 %v4110_v2 }
 0xc02   :  { %v1204_v15 = vpop.f32.mrb[10].mxu0 }
 0xc03   :  { %v1208_v17 = vadd.f32 %v1204_v15, %v1134_v13  ;;  %v3556_v18 = vpop.f32.mrb[11].mxu0 }
 0xc05   :  { %3990 = vtanh.f32 %v1208_v17  ;;  %v3263_v16 = vmul.f32 -1.442695, %v1208_v17 }
 0xc07   :  { %3992 = vpow2.f32 %v3263_v16 }
 0xc0f   :  { %v3991_v19 = vpop.eup %3990 }
 0xc10   :  { %1222 = vrot.lane.b32.xlu0 %v3991_v19, %s4113_s3 }
 0xc11   :  { %v3993_v20 = vpop.eup %3992 }
 0xc12   :  { %v1212_v21 = vadd.f32 1.0, %v3993_v20 }
 0xc14   :  { %3994 = vrcp.f32 %v1212_v21 }
 0xc1e   :  { %v3995_v22 = vpop.eup %3994 }
 0xc1f   :  { %v1220_v26 = vmul.f32 %v3995_v22, %v1218_v25 }
 0xc82   :  { %v1223_v23 = vpop.permute.xlu0 %1222 }
 0xc83   :  { %v1225_v24 = vmul.f32 %v3995_v22, %v1223_v23 }
 0xc85   :  { %1227 = vrot.lane.b32.xlu0 %v1225_v24, %s4114_s29 }
 0xcf7   :  { %v1228_v27 = vpop.permute.xlu0 %1227 }
 0xcf8   :  { %v1230_v28 = vadd.f32 %v1228_v27, %v1220_v26 }
 0xcfa   :  { %3996 = vtanh.f32 %v1230_v28 }
 0xd04   :  { %v3997_v29 = vpop.eup %3996 }
 0xd05   :  { %1233 = vrot.lane.b32.xlu1 %v3997_v29, %s4113_s3 }
 0xd09   :  { %1243 = vrot.lane.b32.xlu1 %v1230_v28, %s4115_s1 }
 0xd77   :  { %v1234_v30 = vpop.permute.xlu1 %1233 }
 0xd78   :  { %v1236_v31 = vmul.f32 %v3995_v22, %v1234_v30 }
 0xd7a   :  { %1238 = vrot.lane.b32.xlu0 %v1236_v31, %s4114_s29 }
 0xd7b   :  { %v1244_v32 = vpop.permute.xlu1 %1243 }
 0xd7c   :  { %1246 = vst.msk [vmem:[#allocation5] sm:$0x3] %vm661_vm1, %v1244_v32 }
 0xd83   :  { %v1250_v33 = vld [vmem:[#allocation5] sm:$0x3] }
 0xd84   :  { %1334 = vrot.lane.b32.xlu1 %v1250_v33, %s4114_s29 }
 0xdec   :  { %v1239_v34 = vpop.permute.xlu0 %1238 }
 0xded   :  { %1241 = vst.msk [vmem:[#allocation4] sm:$0x3] %vm661_vm1, %v1239_v34  ;;  %1248 = vst.msk [vmem:[#allocation3 + $0x8] sm:$0x3] %vm661_vm1, %v1239_v34 }
 0xdf4   :  { %v1249_v35 = vld [vmem:[#allocation4] sm:$0x3]  ;;  %v1915_v0 = vld [vmem:[#allocation3 + $0x8] sm:$0x3] }
 0xdf5   :  { %3566 = vmatmul.mubr.msk.f32.vlgmr.msra.gmra.mrb[14].mxu1 %vm667_vm3, %v1249_v35 }
 0xdf6   :  { %3845 = vmatpush3.bf16.msra.mxu1 %v4221_v11  ;;  %3587 = vmatprep.mubr.msk.f32.mxu1 %vm4111_vm0, %v4112_v4 }
 0xdf7   :  { %3846 = vmatprep.subr.bf16.mxu1 %v4110_v2 }
 0xdfa   :  { %3848 = vmatpush3.bf16.msra.mxu1 %v4232_v14  ;;  %v1335_v14 = vpop.permute.xlu1 %1334 }
 0xdfb   :  { %3855 = vmatprep.subr.bf16.mxu1 %v4110_v2 }
 0xec8   :  { %v1321_v37 = vpop.f32.mrb[14].mxu1 }
 0xec9   :  { %v1325_v38 = vadd.f32 %v1321_v37, %v1251_v36  ;;  %v3567_v39 = vpop.f32.mrb[15].mxu1 }
 0xeca   :  { %v1840_v39 = vld [vmem:[#allocation3 + $0x6] sm:$0x3] }
 0xecb   :  { %3998 = vtanh.f32 %v1325_v38  ;;  %v3265_v41 = vmul.f32 -1.442695, %v1325_v38  ;;  %v1690_v38 = vld [vmem:[#allocation3 + $0x2] sm:$0x3] }
 0xecd   :  { %4000 = vpow2.f32 %v3265_v41  ;;  %v1485_v41 = vld [vmem:[#allocation2 + $0xe] sm:$0x3] }
 0xed5   :  { %v3999_v40 = vpop.eup %3998 }
 0xed6   :  { %1339 = vrot.lane.b32.xlu0 %v3999_v40, %s4113_s3 }
 0xed7   :  { %v4001_v11 = vpop.eup %4000 }
 0xed8   :  { %v1329_v42 = vadd.f32 1.0, %v4001_v11 }
 0xeda   :  { %4002 = vrcp.f32 %v1329_v42 }
 0xee4   :  { %v4003_v43 = vpop.eup %4002 }
 0xee5   :  { %v1337_v46 = vmul.f32 %v4003_v43, %v1335_v14 }
 0xf48   :  { %v1340_v44 = vpop.permute.xlu0 %1339 }
 0xf49   :  { %v1342_v45 = vmul.f32 %v4003_v43, %v1340_v44 }
 0xf4b   :  { %1344 = vrot.lane.b32.xlu0 %v1342_v45, %s4114_s29 }
 0xfbd   :  { %v1345_v47 = vpop.permute.xlu0 %1344 }
 0xfbe   :  { %v1347_v48 = vadd.f32 %v1345_v47, %v1337_v46 }
 0xfc0   :  { %4004 = vtanh.f32 %v1347_v48 }
 0xfca   :  { %v4005_v49 = vpop.eup %4004 }
 0xfcb   :  { %1350 = vrot.lane.b32.xlu1 %v4005_v49, %s4113_s3 }
 0xfcf   :  { %1360 = vrot.lane.b32.xlu1 %v1347_v48, %s4115_s1 }
0x103d   :  { %v1351_v50 = vpop.permute.xlu1 %1350 }
0x103e   :  { %v1353_v51 = vmul.f32 %v4003_v43, %v1351_v50 }
0x1040   :  { %1355 = vrot.lane.b32.xlu0 %v1353_v51, %s4114_s29 }
0x1041   :  { %v1361_v52 = vpop.permute.xlu1 %1360 }
0x1042   :  { %1363 = vst.msk [vmem:[#allocation5] sm:$0x3] %vm661_vm1, %v1361_v52 }
0x1049   :  { %v1367_v53 = vld [vmem:[#allocation5] sm:$0x3] }
0x104a   :  { %1451 = vrot.lane.b32.xlu1 %v1367_v53, %s4114_s29 }
0x10b2   :  { %v1356_v54 = vpop.permute.xlu0 %1355 }
0x10b3   :  { %1358 = vst.msk [vmem:[#allocation4] sm:$0x3] %vm661_vm1, %v1356_v54  ;;  %1365 = vst.msk [vmem:[#allocation3 + $0xa] sm:$0x3] %vm661_vm1, %v1356_v54 }
0x10ba   :  { %v1366_v60 = vld [vmem:[#allocation4] sm:$0x3]  ;;  %v1990_v40 = vld [vmem:[#allocation3 + $0xa] sm:$0x3] }
0x10bb   :  { %3577 = vmatmul.mubr.msk.f32.vlgmr.msra.gmra.mrb[12].mxu0 %vm667_vm3, %v1366_v60 }
0x10bc   :  { %3851 = vmatpush3.bf16.msra.mxu0 %v4389_v57  ;;  %3598 = vmatprep.mubr.msk.f32.mxu0 %vm4111_vm0, %v4112_v4  ;;  %v1452_v26 = vpop.permute.xlu1 %1451 }
0x10bd   :  { %3852 = vmatprep.subr.bf16.mxu0 %v4110_v2 }
0x10c0   :  { %3854 = vmatpush3.bf16.msra.mxu0 %v4399_v61 }
0x10c1   :  { %3861 = vmatprep.subr.bf16.mxu0 %v4110_v2 }
0x10c3   :  { %3599 = vmatmul.mubr.msk.f32.vlgmr.msra.gmra.mrb[14].mxu0 %vm667_vm3, %v1609_v62 }
0x10c4   :  { %3863 = vmatpush3.bf16.msra.mxu0 %v4389_v57  ;;  %3620 = vmatprep.mubr.msk.f32.mxu0 %vm4111_vm0, %v4112_v4 }
0x10c5   :  { %3864 = vmatprep.subr.bf16.mxu0 %v4110_v2 }
0x10c8   :  { %3866 = vmatpush3.bf16.msra.mxu0 %v4399_v61 }
0x10c9   :  { %3873 = vmatprep.subr.bf16.mxu0 %v4110_v2 }
0x10cb   :  { %3621 = vmatmul.mubr.msk.f32.vlgmr.msra.gmra.mrb[16].mxu0 %vm667_vm3, %v1765_v63 }
0x10cc   :  { %3875 = vmatpush3.bf16.msra.mxu0 %v4389_v57  ;;  %3642 = vmatprep.mubr.msk.f32.mxu0 %vm4111_vm0, %v4112_v4 }
0x10cd   :  { %3876 = vmatprep.subr.bf16.mxu0 %v4110_v2 }
0x10d0   :  { %3878 = vmatpush3.bf16.msra.mxu0 %v4399_v61 }
0x10d1   :  { %3885 = vmatprep.subr.bf16.mxu0 %v4110_v2 }
0x10d3   :  { %3643 = vmatmul.mubr.msk.f32.vlgmr.msra.gmra.mrb[18].mxu0 %vm667_vm3, %v1915_v0 }
0x10d4   :  { %3887 = vmatpush3.bf16.msra.mxu0 %v4389_v57  ;;  %3664 = vmatprep.mubr.msk.f32.mxu0 %vm4111_vm0, %v4112_v4 }
0x10d5   :  { %3888 = vmatprep.subr.bf16.mxu0 %v4110_v2 }
0x10d8   :  { %3890 = vmatpush3.bf16.msra.mxu0 %v4399_v61 }
0x10d9   :  { %3897 = vmatprep.subr.bf16.mxu0 %v4110_v2 }
0x118e   :  { %v1438_v3 = vpop.f32.mrb[12].mxu0 }
0x118f   :  { %v1442_v5 = vadd.f32 %v1438_v3, %v1368_v1  ;;  %v3578_v6 = vpop.f32.mrb[13].mxu0 }
0x1190   :  { %v1605_v6 = vld [vmem:[%s4662_s5 + $0x8] sm:$0xff] }
0x1191   :  { %4006 = vtanh.f32 %v1442_v5  ;;  %v3267_v20 = vmul.f32 -1.442695, %v1442_v5  ;;  %v1604_v5 = vld [vmem:[%s4662_s5] sm:$0xff] }
0x1193   :  { %4008 = vpow2.f32 %v3267_v20 }
0x1196   :  { %v1685_v8 = vpop.f32.mrb[14].mxu0 }
0x1197   :  { %v1686_v9 = vadd.f32 %v4430_v7, %v1685_v8  ;;  %v3600_v10 = vpop.f32.mrb[15].mxu0  ;;  %v4489_v8 = vpack.c.bf16 %v1605_v6, %v1604_v5 }
0x1198   :  { %v1607_v10 = vld [vmem:[%s4662_s5 + $0x18] sm:$0xff] }
0x1199   :  { %1689 = vst [vmem:[#allocation2] sm:$0x3] %v1686_v9  ;;  %v1606_v9 = vld [vmem:[%s4662_s5 + $0x10] sm:$0xff] }
0x119b   :  { %v4007_v12 = vpop.eup %4006 }
0x119c   :  { %1456 = vrot.lane.b32.xlu0 %v4007_v12, %s4113_s3  ;;  %v4498_v12 = vpack.c.bf16 %v1607_v10, %v1606_v9 }
0x119d   :  { %v4009_v21 = vpop.eup %4008 }
0x119e   :  { %v1835_v13 = vpop.f32.mrb[16].mxu0  ;;  %v1446_v22 = vadd.f32 1.0, %v4009_v21 }
0x119f   :  { %v1836_v15 = vadd.f32 %v4430_v7, %v1835_v13  ;;  %v3622_v17 = vpop.f32.mrb[17].mxu0 }
0x11a0   :  { %4010 = vrcp.f32 %v1446_v22 }
0x11a1   :  { %1839 = vst [vmem:[#allocation2 + $0x4] sm:$0x3] %v1836_v15 }
0x11a6   :  { %v1985_v18 = vpop.f32.mrb[18].mxu0 }
0x11a7   :  { %v1986_v19 = vadd.f32 %v4430_v7, %v1985_v18  ;;  %v3644_v16 = vpop.f32.mrb[19].mxu0 }
0x11a9   :  { %1989 = vst [vmem:[#allocation2 + $0x8] sm:$0x3] %v1986_v19 }
0x11aa   :  { %v4011_v23 = vpop.eup %4010 }
0x11ab   :  { %v1454_v27 = vmul.f32 %v4011_v23, %v1452_v26 }
0x120e   :  { %v1457_v24 = vpop.permute.xlu0 %1456 }
0x120f   :  { %v1459_v25 = vmul.f32 %v4011_v23, %v1457_v24  ;;  %v2219_v24 = vld [vmem:[#allocation2] sm:$0x3] }
0x1211   :  { %1461 = vrot.lane.b32.xlu0 %v1459_v25, %s4114_s29 }
0x1283   :  { %v1462_v28 = vpop.permute.xlu0 %1461 }
0x1284   :  { %v1464_v29 = vadd.f32 %v1462_v28, %v1454_v27 }
0x1286   :  { %4012 = vtanh.f32 %v1464_v29 }
0x1290   :  { %v4013_v30 = vpop.eup %4012 }
0x1291   :  { %1467 = vrot.lane.b32.xlu1 %v4013_v30, %s4113_s3 }
0x1295   :  { %1477 = vrot.lane.b32.xlu1 %v1464_v29, %s4115_s1 }
0x1303   :  { %v1468_v31 = vpop.permute.xlu1 %1467 }
0x1304   :  { %v1470_v32 = vmul.f32 %v4011_v23, %v1468_v31 }
0x1306   :  { %1472 = vrot.lane.b32.xlu0 %v1470_v32, %s4114_s29 }
0x1307   :  { %v1478_v33 = vpop.permute.xlu1 %1477 }
0x1308   :  { %1480 = vst.msk [vmem:[#allocation5] sm:$0x3] %vm661_vm1, %v1478_v33 }
0x130f   :  { %v1484_v34 = vld [vmem:[#allocation5] sm:$0x3] }
0x1310   :  { %1568 = vrot.lane.b32.xlu1 %v1484_v34, %s4114_s29 }
0x1378   :  { %v1473_v35 = vpop.permute.xlu0 %1472 }
0x1379   :  { %1475 = vst.msk [vmem:[#allocation4] sm:$0x3] %vm661_vm1, %v1473_v35  ;;  %1482 = vst.msk [vmem:[#allocation3 + $0xc] sm:$0x3] %vm661_vm1, %v1473_v35 }
0x1380   :  { %v1483_v36 = vld [vmem:[#allocation4] sm:$0x3]  ;;  %v2065_v37 = vld [vmem:[#allocation3 + $0xc] sm:$0x3] }
0x1381   :  { %3588 = vmatmul.mubr.msk.f32.vlgmr.msra.gmra.mrb[16].mxu1 %vm667_vm3, %v1483_v36  ;;  %3665 = vmatmul.mubr.msk.f32.vlgmr.msra.gmra.mrb[20].mxu0 %vm667_vm3, %v2065_v37 }
0x1382   :  { %3857 = vmatpush3.bf16.msra.mxu1 %v4389_v57  ;;  %3609 = vmatprep.mubr.msk.f32.mxu1 %vm4111_vm0, %v4112_v4  ;;  %v1569_v62 = vpop.permute.xlu1 %1568 }
0x1383   :  { %3858 = vmatprep.subr.bf16.mxu1 %v4110_v2  ;;  %3686 = vmatprep.mubr.msk.f32.mxu0 %vm4111_vm0, %v4112_v4 }
0x1384   :  { %3899 = vmatpush3.bf16.msra.mxu0 %v4489_v8 }
0x1385   :  { %3900 = vmatprep.subr.bf16.mxu0 %v4110_v2 }
0x1386   :  { %3860 = vmatpush3.bf16.msra.mxu1 %v4399_v61 }
0x1387   :  { %3867 = vmatprep.subr.bf16.mxu1 %v4110_v2 }
0x1388   :  { %3902 = vmatpush3.bf16.msra.mxu0 %v4498_v12 }
0x1389   :  { %3610 = vmatmul.mubr.msk.f32.vlgmr.msra.gmra.mrb[18].mxu1 %vm667_vm3, %v1690_v38  ;;  %3909 = vmatprep.subr.bf16.mxu0 %v4110_v2 }
0x138a   :  { %3869 = vmatpush3.bf16.msra.mxu1 %v4389_v57  ;;  %3631 = vmatprep.mubr.msk.f32.mxu1 %vm4111_vm0, %v4112_v4 }
0x138b   :  { %3870 = vmatprep.subr.bf16.mxu1 %v4110_v2 }
0x138e   :  { %3872 = vmatpush3.bf16.msra.mxu1 %v4399_v61 }
0x138f   :  { %3879 = vmatprep.subr.bf16.mxu1 %v4110_v2 }
0x1391   :  { %3632 = vmatmul.mubr.msk.f32.vlgmr.msra.gmra.mrb[20].mxu1 %vm667_vm3, %v1840_v39 }
0x1392   :  { %3881 = vmatpush3.bf16.msra.mxu1 %v4389_v57  ;;  %3653 = vmatprep.mubr.msk.f32.mxu1 %vm4111_vm0, %v4112_v4 }
0x1393   :  { %3882 = vmatprep.subr.bf16.mxu1 %v4110_v2 }
0x1396   :  { %3884 = vmatpush3.bf16.msra.mxu1 %v4399_v61 }
0x1397   :  { %3891 = vmatprep.subr.bf16.mxu1 %v4110_v2 }
0x1399   :  { %3654 = vmatmul.mubr.msk.f32.vlgmr.msra.gmra.mrb[22].mxu1 %vm667_vm3, %v1990_v40 }
0x139a   :  { %3893 = vmatpush3.bf16.msra.mxu1 %v4389_v57  ;;  %3675 = vmatprep.mubr.msk.f32.mxu1 %vm4111_vm0, %v4112_v4 }
0x139b   :  { %3894 = vmatprep.subr.bf16.mxu1 %v4110_v2 }
0x139e   :  { %3896 = vmatpush3.bf16.msra.mxu1 %v4399_v61 }
0x139f   :  { %3903 = vmatprep.subr.bf16.mxu1 %v4110_v2 }
0x1454   :  { %v1555_v11 = vpop.f32.mrb[16].mxu1  ;;  %v2135_v42 = vpop.f32.mrb[20].mxu0 }
0x1455   :  { %v1559_v43 = vadd.f32 %v1555_v11, %v1485_v41  ;;  %v2136_v44 = vadd.f32 %v4430_v7, %v2135_v42  ;;  %v3589_v45 = vpop.f32.mrb[17].mxu1  ;;  %v3666_v14 = vpop.f32.mrb[21].mxu0 }
0x1457   :  { %4014 = vtanh.f32 %v1559_v43  ;;  %2139 = vst [vmem:[#allocation2 + $0xc] sm:$0x3] %v2136_v44  ;;  %v3269_v56 = vmul.f32 -1.442695, %v1559_v43 }
0x1459   :  { %4016 = vpow2.f32 %v3269_v56 }
0x145c   :  { %v1760_v46 = vpop.f32.mrb[18].mxu1 }
0x145d   :  { %v1761_v47 = vadd.f32 %v4430_v7, %v1760_v46  ;;  %v3611_v48 = vpop.f32.mrb[19].mxu1 }
0x145f   :  { %1764 = vst [vmem:[#allocation2 + $0x2] sm:$0x3] %v1761_v47 }
0x1461   :  { %v4015_v49 = vpop.eup %4014 }
0x1462   :  { %1573 = vrot.lane.b32.xlu0 %v4015_v49, %s4113_s3 }
0x1463   :  { %v4017_v57 = vpop.eup %4016 }
0x1464   :  { %v1910_v50 = vpop.f32.mrb[20].mxu1  ;;  %v1563_v58 = vadd.f32 1.0, %v4017_v57 }
0x1465   :  { %v1911_v51 = vadd.f32 %v4430_v7, %v1910_v50  ;;  %v3633_v52 = vpop.f32.mrb[21].mxu1 }
0x1466   :  { %4018 = vrcp.f32 %v1563_v58  ;;  %v2334_v44 = vld [vmem:[#allocation2 + $0x2] sm:$0x3] }
0x1467   :  { %1914 = vst [vmem:[#allocation2 + $0x6] sm:$0x3] %v1911_v51 }
0x146c   :  { %v2060_v53 = vpop.f32.mrb[22].mxu1 }
0x146d   :  { %v2061_v54 = vadd.f32 %v4430_v7, %v2060_v53  ;;  %v3655_v55 = vpop.f32.mrb[23].mxu1 }
0x146f   :  { %2064 = vst [vmem:[#allocation2 + $0xa] sm:$0x3] %v2061_v54 }
0x1470   :  { %v4019_v59 = vpop.eup %4018 }
0x1471   :  { %v1571_v63 = vmul.f32 %v4019_v59, %v1569_v62 }
0x14d4   :  { %v1574_v60 = vpop.permute.xlu0 %1573 }
0x14d5   :  { %v1576_v61 = vmul.f32 %v4019_v59, %v1574_v60 }
0x14d7   :  { %1578 = vrot.lane.b32.xlu0 %v1576_v61, %s4114_s29 }
0x1549   :  { %v1579_v0 = vpop.permute.xlu0 %1578 }
0x154a   :  { %v1581_v1 = vadd.f32 %v1579_v0, %v1571_v63 }
0x154c   :  { %4020 = vtanh.f32 %v1581_v1 }
0x1556   :  { %v4021_v3 = vpop.eup %4020 }
0x1557   :  { %1584 = vrot.lane.b32.xlu1 %v4021_v3, %s4113_s3 }
0x155b   :  { %1594 = vrot.lane.b32.xlu1 %v1581_v1, %s4115_s1  ;;  %v2449_v1 = vld [vmem:[#allocation2 + $0x4] sm:$0x3] }
0x15c9   :  { %v1585_v13 = vpop.permute.xlu1 %1584 }
0x15ca   :  { %v1587_v15 = vmul.f32 %v4019_v59, %v1585_v13 }
0x15cc   :  { %1589 = vrot.lane.b32.xlu0 %v1587_v15, %s4114_s29 }
0x15cd   :  { %v1595_v17 = vpop.permute.xlu1 %1594 }
0x15ce   :  { %1597 = vst.msk [vmem:[#allocation5] sm:$0x3] %vm661_vm1, %v1595_v17 }
0x15cf   :  { %2216 = vst.msk [vmem:[#allocation5] sm:$0x3] %vm661_vm1, %v4112_v4 }
0x15d6   :  { %v2218_v18 = vld [vmem:[#allocation5] sm:$0x3] }
0x15d7   :  { %2302 = vrot.lane.b32.xlu1 %v2218_v18, %s4114_s29 }
0x163e   :  { %v1590_v19 = vpop.permute.xlu0 %1589 }
0x163f   :  { %1592 = vst.msk [vmem:[#allocation4] sm:$0x3] %vm661_vm1, %v1590_v19  ;;  %1599 = vst.msk [vmem:[#allocation3 + $0xe] sm:$0x3] %vm661_vm1, %v1590_v19 }
0x1640   :  { %2215 = vst.msk [vmem:[#allocation4] sm:$0x3] %vm661_vm1, %v4112_v4 }
0x1646   :  { %v2140_v16 = vld [vmem:[#allocation3 + $0xe] sm:$0x3] }
0x1647   :  { %3676 = vmatmul.mubr.msk.f32.vlgmr.msra.gmra.mrb[24].mxu1 %vm667_vm3, %v2140_v16  ;;  %v2217_v20 = vld [vmem:[#allocation4] sm:$0x3] }
0x1648   :  { %3687 = vmatmul.mubr.msk.f32.vlgmr.msra.gmra.mrb[22].mxu0 %vm667_vm3, %v2217_v20  ;;  %3905 = vmatpush3.bf16.msra.mxu1 %v4489_v8 }
0x1649   :  { %3906 = vmatprep.subr.bf16.mxu1 %v4110_v2  ;;  %3697 = vmatprep.mubr.msk.f32.mxu1 %vm4111_vm0, %v4112_v4 }
0x164a   :  { %3911 = vmatpush3.bf16.msra.mxu0 %v4489_v8  ;;  %3708 = vmatprep.mubr.msk.f32.mxu0 %vm4111_vm0, %v4112_v4 }
0x164b   :  { %3912 = vmatprep.subr.bf16.mxu0 %v4110_v2 }
0x164c   :  { %3908 = vmatpush3.bf16.msra.mxu1 %v4498_v12 }
0x164d   :  { %3915 = vmatprep.subr.bf16.mxu1 %v4110_v2 }
0x164e   :  { %3914 = vmatpush3.bf16.msra.mxu0 %v4498_v12 }
0x164f   :  { %3921 = vmatprep.subr.bf16.mxu0 %v4110_v2 }
0x171a   :  { %v2210_v21 = vpop.f32.mrb[24].mxu1 }
0x171b   :  { %v2211_v22 = vadd.f32 %v4430_v7, %v2210_v21  ;;  %v3677_v23 = vpop.f32.mrb[25].mxu1  ;;  %v2289_v25 = vpop.f32.mrb[22].mxu0 }
0x171c   :  { %v2293_v26 = vadd.f32 %v2289_v25, %v2219_v24  ;;  %v3688_v27 = vpop.f32.mrb[23].mxu0  ;;  %v2303_v7 = vpop.permute.xlu1 %2302 }
0x171d   :  { %2214 = vst [vmem:[#allocation2 + $0xe] sm:$0x3] %v2211_v22 }
0x171e   :  { %4022 = vtanh.f32 %v2293_v26  ;;  %v3280_v29 = vmul.f32 -1.442695, %v2293_v26 }
0x1720   :  { %4024 = vpow2.f32 %v3280_v29 }
0x1728   :  { %v4023_v28 = vpop.eup %4022 }
0x1729   :  { %2307 = vrot.lane.b32.xlu0 %v4023_v28, %s4113_s3 }
0x172a   :  { %v4025_v30 = vpop.eup %4024 }
0x172b   :  { %v2297_v31 = vadd.f32 1.0, %v4025_v30  ;;  %v2564_v30 = vld [vmem:[#allocation2 + $0x6] sm:$0x3] }
0x172d   :  { %4026 = vrcp.f32 %v2297_v31 }
0x1737   :  { %v4027_v32 = vpop.eup %4026 }
0x1738   :  { %v2305_v35 = vmul.f32 %v4027_v32, %v2303_v7 }
0x179b   :  { %v2308_v33 = vpop.permute.xlu0 %2307 }
0x179c   :  { %v2310_v34 = vmul.f32 %v4027_v32, %v2308_v33 }
0x179e   :  { %2312 = vrot.lane.b32.xlu0 %v2310_v34, %s4114_s29 }
0x1810   :  { %v2313_v36 = vpop.permute.xlu0 %2312 }
0x1811   :  { %v2315_v37 = vadd.f32 %v2313_v36, %v2305_v35 }
0x1813   :  { %4028 = vtanh.f32 %v2315_v37 }
0x181d   :  { %v4029_v38 = vpop.eup %4028 }
0x181e   :  { %2318 = vrot.lane.b32.xlu1 %v4029_v38, %s4113_s3 }
0x1822   :  { %2328 = vrot.lane.b32.xlu1 %v2315_v37, %s4115_s1 }
0x1890   :  { %v2319_v39 = vpop.permute.xlu1 %2318 }
0x1891   :  { %v2321_v40 = vmul.f32 %v4027_v32, %v2319_v39 }
0x1893   :  { %2323 = vrot.lane.b32.xlu0 %v2321_v40, %s4114_s29 }
0x1894   :  { %v2329_v41 = vpop.permute.xlu1 %2328 }
0x1895   :  { %2331 = vst.msk [vmem:[#allocation5] sm:$0x3] %vm661_vm1, %v2329_v41 }
0x189c   :  { %v2333_v11 = vld [vmem:[#allocation5] sm:$0x3] }
0x189d   :  { %2417 = vrot.lane.b32.xlu1 %v2333_v11, %s4114_s29 }
0x1905   :  { %v2324_v42 = vpop.permute.xlu0 %2323 }
0x1906   :  { %2326 = vst.msk [vmem:[#allocation4] sm:$0x3] %vm661_vm1, %v2324_v42 }
0x190d   :  { %v2332_v43 = vld [vmem:[#allocation4] sm:$0x3] }
0x190e   :  { %3698 = vmatmul.mubr.msk.f32.vlgmr.msra.gmra.mrb[26].mxu1 %vm667_vm3, %v2332_v43 }
0x190f   :  { %3917 = vmatpush3.bf16.msra.mxu1 %v4489_v8  ;;  %3719 = vmatprep.mubr.msk.f32.mxu1 %vm4111_vm0, %v4112_v4  ;;  %v2418_v54 = vpop.permute.xlu1 %2417 }
0x1910   :  { %3918 = vmatprep.subr.bf16.mxu1 %v4110_v2 }
0x1913   :  { %3920 = vmatpush3.bf16.msra.mxu1 %v4498_v12 }
0x1914   :  { %3927 = vmatprep.subr.bf16.mxu1 %v4110_v2 }
0x19e1   :  { %v2404_v45 = vpop.f32.mrb[26].mxu1 }
0x19e2   :  { %v2408_v14 = vadd.f32 %v2404_v45, %v2334_v44  ;;  %v3699_v46 = vpop.f32.mrb[27].mxu1 }
0x19e4   :  { %4030 = vtanh.f32 %v2408_v14  ;;  %v3282_v48 = vmul.f32 -1.442695, %v2408_v14 }
0x19e6   :  { %4032 = vpow2.f32 %v3282_v48 }
0x19ee   :  { %v4031_v47 = vpop.eup %4030 }
0x19ef   :  { %2422 = vrot.lane.b32.xlu0 %v4031_v47, %s4113_s3 }
0x19f0   :  { %v4033_v49 = vpop.eup %4032 }
0x19f1   :  { %v2412_v50 = vadd.f32 1.0, %v4033_v49  ;;  %v2679_v49 = vld [vmem:[#allocation2 + $0x8] sm:$0x3] }
0x19f3   :  { %4034 = vrcp.f32 %v2412_v50 }
0x19fd   :  { %v4035_v51 = vpop.eup %4034 }
0x19fe   :  { %v2420_v55 = vmul.f32 %v4035_v51, %v2418_v54 }
0x1a61   :  { %v2423_v52 = vpop.permute.xlu0 %2422 }
0x1a62   :  { %v2425_v53 = vmul.f32 %v4035_v51, %v2423_v52 }
0x1a64   :  { %2427 = vrot.lane.b32.xlu0 %v2425_v53, %s4114_s29 }
0x1ad6   :  { %v2428_v56 = vpop.permute.xlu0 %2427 }
0x1ad7   :  { %v2430_v57 = vadd.f32 %v2428_v56, %v2420_v55 }
0x1ad9   :  { %4036 = vtanh.f32 %v2430_v57 }
0x1ae3   :  { %v4037_v58 = vpop.eup %4036 }
0x1ae4   :  { %2433 = vrot.lane.b32.xlu1 %v4037_v58, %s4113_s3 }
0x1ae8   :  { %2443 = vrot.lane.b32.xlu1 %v2430_v57, %s4115_s1 }
0x1b56   :  { %v2434_v59 = vpop.permute.xlu1 %2433 }
0x1b57   :  { %v2436_v60 = vmul.f32 %v4035_v51, %v2434_v59 }
0x1b59   :  { %2438 = vrot.lane.b32.xlu0 %v2436_v60, %s4114_s29 }
0x1b5a   :  { %v2444_v61 = vpop.permute.xlu1 %2443 }
0x1b5b   :  { %2446 = vst.msk [vmem:[#allocation5] sm:$0x3] %vm661_vm1, %v2444_v61 }
0x1b62   :  { %v2448_v62 = vld [vmem:[#allocation5] sm:$0x3] }
0x1b63   :  { %2532 = vrot.lane.b32.xlu1 %v2448_v62, %s4114_s29 }
0x1bcb   :  { %v2439_v63 = vpop.permute.xlu0 %2438 }
0x1bcc   :  { %2441 = vst.msk [vmem:[#allocation4] sm:$0x3] %vm661_vm1, %v2439_v63 }
0x1bd3   :  { %v2447_v0 = vld [vmem:[#allocation4] sm:$0x3] }
0x1bd4   :  { %3709 = vmatmul.mubr.msk.f32.vlgmr.msra.gmra.mrb[24].mxu0 %vm667_vm3, %v2447_v0 }
0x1bd5   :  { %3923 = vmatpush3.bf16.msra.mxu0 %v4489_v8  ;;  %3730 = vmatprep.mubr.msk.f32.mxu0 %vm4111_vm0, %v4112_v4  ;;  %v2533_v16 = vpop.permute.xlu1 %2532 }
0x1bd6   :  { %3924 = vmatprep.subr.bf16.mxu0 %v4110_v2 }
0x1bd9   :  { %3926 = vmatpush3.bf16.msra.mxu0 %v4498_v12 }
0x1bda   :  { %3933 = vmatprep.subr.bf16.mxu0 %v4110_v2 }
0x1ca7   :  { %v2519_v3 = vpop.f32.mrb[24].mxu0 }
0x1ca8   :  { %v2523_v5 = vadd.f32 %v2519_v3, %v2449_v1  ;;  %v3710_v6 = vpop.f32.mrb[25].mxu0 }
0x1caa   :  { %4038 = vtanh.f32 %v2523_v5  ;;  %v3284_v10 = vmul.f32 -1.442695, %v2523_v5 }
0x1cac   :  { %4040 = vpow2.f32 %v3284_v10 }
0x1cb4   :  { %v4039_v9 = vpop.eup %4038 }
0x1cb5   :  { %2537 = vrot.lane.b32.xlu0 %v4039_v9, %s4113_s3 }
0x1cb6   :  { %v4041_v13 = vpop.eup %4040 }
0x1cb7   :  { %v2527_v15 = vadd.f32 1.0, %v4041_v13  ;;  %v2794_v13 = vld [vmem:[#allocation2 + $0xa] sm:$0x3] }
0x1cb9   :  { %4042 = vrcp.f32 %v2527_v15 }
0x1cc3   :  { %v4043_v17 = vpop.eup %4042 }
0x1cc4   :  { %v2535_v20 = vmul.f32 %v4043_v17, %v2533_v16 }
0x1d27   :  { %v2538_v18 = vpop.permute.xlu0 %2537 }
0x1d28   :  { %v2540_v19 = vmul.f32 %v4043_v17, %v2538_v18 }
0x1d2a   :  { %2542 = vrot.lane.b32.xlu0 %v2540_v19, %s4114_s29 }
0x1d9c   :  { %v2543_v21 = vpop.permute.xlu0 %2542 }
0x1d9d   :  { %v2545_v22 = vadd.f32 %v2543_v21, %v2535_v20 }
0x1d9f   :  { %4044 = vtanh.f32 %v2545_v22 }
0x1da9   :  { %v4045_v23 = vpop.eup %4044 }
0x1daa   :  { %2548 = vrot.lane.b32.xlu1 %v4045_v23, %s4113_s3 }
0x1dae   :  { %2558 = vrot.lane.b32.xlu1 %v2545_v22, %s4115_s1 }
0x1e1c   :  { %v2549_v24 = vpop.permute.xlu1 %2548 }
0x1e1d   :  { %v2551_v25 = vmul.f32 %v4043_v17, %v2549_v24 }
0x1e1f   :  { %2553 = vrot.lane.b32.xlu0 %v2551_v25, %s4114_s29 }
0x1e20   :  { %v2559_v26 = vpop.permute.xlu1 %2558 }
0x1e21   :  { %2561 = vst.msk [vmem:[#allocation5] sm:$0x3] %vm661_vm1, %v2559_v26 }
0x1e28   :  { %v2563_v27 = vld [vmem:[#allocation5] sm:$0x3] }
0x1e29   :  { %2647 = vrot.lane.b32.xlu1 %v2563_v27, %s4114_s29 }
0x1e91   :  { %v2554_v28 = vpop.permute.xlu0 %2553 }
0x1e92   :  { %2556 = vst.msk [vmem:[#allocation4] sm:$0x3] %vm661_vm1, %v2554_v28 }
0x1e99   :  { %v2562_v29 = vld [vmem:[#allocation4] sm:$0x3] }
0x1e9a   :  { %3720 = vmatmul.mubr.msk.f32.vlgmr.msra.gmra.mrb[28].mxu1 %vm667_vm3, %v2562_v29 }
0x1e9b   :  { %3929 = vmatpush3.bf16.msra.mxu1 %v4489_v8  ;;  %3741 = vmatprep.mubr.msk.f32.mxu1 %vm4111_vm0, %v4112_v4  ;;  %v2648_v40 = vpop.permute.xlu1 %2647 }
0x1e9c   :  { %3930 = vmatprep.subr.bf16.mxu1 %v4110_v2 }
0x1e9f   :  { %3932 = vmatpush3.bf16.msra.mxu1 %v4498_v12 }
0x1ea0   :  { %3939 = vmatprep.subr.bf16.mxu1 %v4110_v2 }
0x1f6d   :  { %v2634_v31 = vpop.f32.mrb[28].mxu1 }
0x1f6e   :  { %v2638_v32 = vadd.f32 %v2634_v31, %v2564_v30  ;;  %v3721_v33 = vpop.f32.mrb[29].mxu1 }
0x1f70   :  { %4046 = vtanh.f32 %v2638_v32  ;;  %v3286_v7 = vmul.f32 -1.442695, %v2638_v32 }
0x1f72   :  { %4048 = vpow2.f32 %v3286_v7 }
0x1f7a   :  { %v4047_v34 = vpop.eup %4046 }
0x1f7b   :  { %2652 = vrot.lane.b32.xlu0 %v4047_v34, %s4113_s3  ;;  %v2909_v34 = vld [vmem:[#allocation2 + $0xc] sm:$0x3] }
0x1f7c   :  { %v4049_v35 = vpop.eup %4048 }
0x1f7d   :  { %v2642_v36 = vadd.f32 1.0, %v4049_v35 }
0x1f7f   :  { %4050 = vrcp.f32 %v2642_v36 }
0x1f89   :  { %v4051_v37 = vpop.eup %4050 }
0x1f8a   :  { %v2650_v41 = vmul.f32 %v4051_v37, %v2648_v40 }
0x1fed   :  { %v2653_v38 = vpop.permute.xlu0 %2652 }
0x1fee   :  { %v2655_v39 = vmul.f32 %v4051_v37, %v2653_v38 }
0x1ff0   :  { %2657 = vrot.lane.b32.xlu0 %v2655_v39, %s4114_s29 }
0x2062   :  { %v2658_v11 = vpop.permute.xlu0 %2657 }
0x2063   :  { %v2660_v42 = vadd.f32 %v2658_v11, %v2650_v41 }
0x2065   :  { %4052 = vtanh.f32 %v2660_v42 }
0x206f   :  { %v4053_v43 = vpop.eup %4052 }
0x2070   :  { %2663 = vrot.lane.b32.xlu1 %v4053_v43, %s4113_s3 }
0x2074   :  { %2673 = vrot.lane.b32.xlu1 %v2660_v42, %s4115_s1 }
0x20e2   :  { %v2664_v44 = vpop.permute.xlu1 %2663 }
0x20e3   :  { %v2666_v45 = vmul.f32 %v4051_v37, %v2664_v44 }
0x20e5   :  { %2668 = vrot.lane.b32.xlu0 %v2666_v45, %s4114_s29 }
0x20e6   :  { %v2674_v14 = vpop.permute.xlu1 %2673 }
0x20e7   :  { %2676 = vst.msk [vmem:[#allocation5] sm:$0x3] %vm661_vm1, %v2674_v14 }
0x20ee   :  { %v2678_v46 = vld [vmem:[#allocation5] sm:$0x3] }
0x20ef   :  { %2762 = vrot.lane.b32.xlu1 %v2678_v46, %s4114_s29 }
0x2157   :  { %v2669_v47 = vpop.permute.xlu0 %2668 }
0x2158   :  { %2671 = vst.msk [vmem:[#allocation4] sm:$0x3] %vm661_vm1, %v2669_v47 }
0x215f   :  { %v2677_v48 = vld [vmem:[#allocation4] sm:$0x3] }
0x2160   :  { %3731 = vmatmul.mubr.msk.f32.vlgmr.msra.gmra.mrb[26].mxu0 %vm667_vm3, %v2677_v48 }
0x2161   :  { %3935 = vmatpush3.bf16.msra.mxu0 %v4489_v8  ;;  %3752 = vmatprep.mubr.msk.f32.mxu0 %vm4111_vm0, %v4112_v4  ;;  %v2763_v60 = vpop.permute.xlu1 %2762 }
0x2162   :  { %3936 = vmatprep.subr.bf16.mxu0 %v4110_v2 }
0x2165   :  { %3938 = vmatpush3.bf16.msra.mxu0 %v4498_v12 }
0x2166   :  { %3945 = vmatprep.subr.bf16.mxu0 %v4110_v2 }
0x2233   :  { %v2749_v50 = vpop.f32.mrb[26].mxu0 }
0x2234   :  { %v2753_v51 = vadd.f32 %v2749_v50, %v2679_v49  ;;  %v3732_v52 = vpop.f32.mrb[27].mxu0 }
0x2235   :  { %v3024_v52 = vld [vmem:[#allocation2 + $0xe] sm:$0x3] }
0x2236   :  { %4054 = vtanh.f32 %v2753_v51  ;;  %v3288_v54 = vmul.f32 -1.442695, %v2753_v51 }
0x2238   :  { %4056 = vpow2.f32 %v3288_v54 }
0x2240   :  { %v4055_v53 = vpop.eup %4054 }
0x2241   :  { %2767 = vrot.lane.b32.xlu0 %v4055_v53, %s4113_s3 }
0x2242   :  { %v4057_v55 = vpop.eup %4056 }
0x2243   :  { %v2757_v56 = vadd.f32 1.0, %v4057_v55 }
0x2245   :  { %4058 = vrcp.f32 %v2757_v56 }
0x224f   :  { %v4059_v57 = vpop.eup %4058 }
0x2250   :  { %v2765_v61 = vmul.f32 %v4059_v57, %v2763_v60 }
0x22b3   :  { %v2768_v58 = vpop.permute.xlu0 %2767 }
0x22b4   :  { %v2770_v59 = vmul.f32 %v4059_v57, %v2768_v58 }
0x22b6   :  { %2772 = vrot.lane.b32.xlu0 %v2770_v59, %s4114_s29 }
0x2328   :  { %v2773_v62 = vpop.permute.xlu0 %2772 }
0x2329   :  { %v2775_v63 = vadd.f32 %v2773_v62, %v2765_v61 }
0x232b   :  { %4060 = vtanh.f32 %v2775_v63 }
0x2335   :  { %v4061_v0 = vpop.eup %4060 }
0x2336   :  { %2778 = vrot.lane.b32.xlu1 %v4061_v0, %s4113_s3 }
0x233a   :  { %2788 = vrot.lane.b32.xlu1 %v2775_v63, %s4115_s1 }
0x23a8   :  { %v2779_v1 = vpop.permute.xlu1 %2778 }
0x23a9   :  { %v2781_v3 = vmul.f32 %v4059_v57, %v2779_v1 }
0x23ab   :  { %2783 = vrot.lane.b32.xlu0 %v2781_v3, %s4114_s29 }
0x23ac   :  { %v2789_v5 = vpop.permute.xlu1 %2788 }
0x23ad   :  { %2791 = vst.msk [vmem:[#allocation5] sm:$0x3] %vm661_vm1, %v2789_v5 }
0x23b4   :  { %v2793_v6 = vld [vmem:[#allocation5] sm:$0x3] }
0x23b5   :  { %2877 = vrot.lane.b32.xlu1 %v2793_v6, %s4114_s29  ;;  %v3138_v6 = vld [vmem:[%s4664_s7] sm:$0xff] }
0x241d   :  { %v2784_v9 = vpop.permute.xlu0 %2783 }
0x241e   :  { %2786 = vst.msk [vmem:[#allocation4] sm:$0x3] %vm661_vm1, %v2784_v9  ;;  %v3139_v9 = vld [vmem:[%s4664_s7 + $0x8] sm:$0xff] }
0x2425   :  { %v2792_v10 = vld [vmem:[#allocation4] sm:$0x3] }
0x2426   :  { %3742 = vmatmul.mubr.msk.f32.vlgmr.msra.gmra.mrb[30].mxu1 %vm667_vm3, %v2792_v10  ;;  %v3946_v10 = vpack.c.bf16 %v3139_v9, %v3138_v6 }
0x2427   :  { %3941 = vmatpush3.bf16.msra.mxu1 %v4489_v8  ;;  %3763 = vmatprep.mubr.msk.f32.mxu1 %vm4111_vm0, %v4112_v4  ;;  %v2878_v24 = vpop.permute.xlu1 %2877 }
0x2428   :  { %3942 = vmatprep.subr.bf16.mxu1 %v4110_v2 }
0x242b   :  { %3944 = vmatpush3.bf16.msra.mxu1 %v4498_v12 }
0x24f9   :  { %v2864_v15 = vpop.f32.mrb[30].mxu1 }
0x24fa   :  { %v2868_v17 = vadd.f32 %v2864_v15, %v2794_v13  ;;  %v3743_v18 = vpop.f32.mrb[31].mxu1  ;;  %v3140_v13 = vld [vmem:[%s4664_s7 + $0x10] sm:$0xff]  ;;  %v3141_v15 = vld [vmem:[%s4664_s7 + $0x18] sm:$0xff] }
0x24fc   :  { %4062 = vtanh.f32 %v2868_v17  ;;  %v3290_v16 = vmul.f32 -1.442695, %v2868_v17  ;;  %v3949_v17 = vpack.c.bf16 %v3141_v15, %v3140_v13 }
0x24fe   :  { %4064 = vpow2.f32 %v3290_v16 }
0x2506   :  { %v4063_v19 = vpop.eup %4062 }
0x2507   :  { %2882 = vrot.lane.b32.xlu0 %v4063_v19, %s4113_s3 }
0x2508   :  { %v4065_v20 = vpop.eup %4064 }
0x2509   :  { %v2872_v21 = vadd.f32 1.0, %v4065_v20 }
0x250b   :  { %4066 = vrcp.f32 %v2872_v21 }
0x2515   :  { %v4067_v8 = vpop.eup %4066 }
0x2516   :  { %v2880_v12 = vmul.f32 %v4067_v8, %v2878_v24 }
0x2579   :  { %v2883_v22 = vpop.permute.xlu0 %2882 }
0x257a   :  { %v2885_v23 = vmul.f32 %v4067_v8, %v2883_v22 }
0x257c   :  { %2887 = vrot.lane.b32.xlu0 %v2885_v23, %s4114_s29 }
0x25ee   :  { %v2888_v25 = vpop.permute.xlu0 %2887 }
0x25ef   :  { %v2890_v26 = vadd.f32 %v2888_v25, %v2880_v12 }
0x25f1   :  { %4068 = vtanh.f32 %v2890_v26 }
0x25fb   :  { %v4069_v27 = vpop.eup %4068 }
0x25fc   :  { %2893 = vrot.lane.b32.xlu1 %v4069_v27, %s4113_s3 }
0x2600   :  { %2903 = vrot.lane.b32.xlu1 %v2890_v26, %s4115_s1 }
0x266e   :  { %v2894_v28 = vpop.permute.xlu1 %2893 }
0x266f   :  { %v2896_v29 = vmul.f32 %v4067_v8, %v2894_v28  ;;  %v3295_v8 = vld [vmem:[%s4665_s8] ss:$0 sm:$0xff] }
0x2671   :  { %2898 = vrot.lane.b32.xlu0 %v2896_v29, %s4114_s29 }
0x2672   :  { %v2904_v30 = vpop.permute.xlu1 %2903 }
0x2673   :  { %2906 = vst.msk [vmem:[#allocation5] sm:$0x3] %vm661_vm1, %v2904_v30 }
0x267a   :  { %v2908_v31 = vld [vmem:[#allocation5] sm:$0x3] }
0x267b   :  { %2992 = vrot.lane.b32.xlu1 %v2908_v31, %s4114_s29 }
0x26e3   :  { %v2899_v32 = vpop.permute.xlu0 %2898 }
0x26e4   :  { %2901 = vst.msk [vmem:[#allocation4] sm:$0x3] %vm661_vm1, %v2899_v32 }
0x26eb   :  { %v2907_v33 = vld [vmem:[#allocation4] sm:$0x3] }
0x26ec   :  { %3753 = vmatmul.mubr.msk.f32.vlgmr.msra.gmra.mrb[28].mxu0 %vm667_vm3, %v2907_v33 }
0x26ed   :  { %3774 = vmatprep.mubr.msk.f32.mxu0 %vm4111_vm0, %v4112_v4  ;;  %v2993_v43 = vpop.permute.xlu1 %2992  ;;  %3947 = vmatpush3.bf16.msra.mxu0 %v3946_v10 }
0x26ee   :  { %3948 = vmatprep.subr.bf16.mxu0 %v4110_v2 }
0x26f1   :  { %3950 = vmatpush3.bf16.msra.mxu0 %v3949_v17 }
0x27bf   :  { %v2979_v7 = vpop.f32.mrb[28].mxu0 }
0x27c0   :  { %v2983_v35 = vadd.f32 %v2979_v7, %v2909_v34  ;;  %v3754_v36 = vpop.f32.mrb[29].mxu0 }
0x27c2   :  { %4070 = vtanh.f32 %v2983_v35  ;;  %v3292_v38 = vmul.f32 -1.442695, %v2983_v35 }
0x27c4   :  { %4072 = vpow2.f32 %v3292_v38 }
0x27cc   :  { %v4071_v37 = vpop.eup %4070 }
0x27cd   :  { %2997 = vrot.lane.b32.xlu0 %v4071_v37, %s4113_s3 }
0x27ce   :  { %v4073_v39 = vpop.eup %4072 }
0x27cf   :  { %v2987_v40 = vadd.f32 1.0, %v4073_v39 }
0x27d1   :  { %4074 = vrcp.f32 %v2987_v40 }
0x27db   :  { %v4075_v41 = vpop.eup %4074 }
0x27dc   :  { %v2995_v4 = vmul.f32 %v4075_v41, %v2993_v43 }
0x283f   :  { %v2998_v11 = vpop.permute.xlu0 %2997 }
0x2840   :  { %v3000_v42 = vmul.f32 %v4075_v41, %v2998_v11 }
0x2842   :  { %3002 = vrot.lane.b32.xlu0 %v3000_v42, %s4114_s29 }
0x28b4   :  { %v3003_v44 = vpop.permute.xlu0 %3002 }
0x28b5   :  { %v3005_v45 = vadd.f32 %v3003_v44, %v2995_v4 }
0x28b7   :  { %4076 = vtanh.f32 %v3005_v45 }
0x28c1   :  { %v4077_v14 = vpop.eup %4076 }
0x28c2   :  { %3008 = vrot.lane.b32.xlu1 %v4077_v14, %s4113_s3 }
0x28c6   :  { %3018 = vrot.lane.b32.xlu1 %v3005_v45, %s4115_s1 }
0x2934   :  { %v3009_v46 = vpop.permute.xlu1 %3008 }
0x2935   :  { %v3011_v47 = vmul.f32 %v4075_v41, %v3009_v46 }
0x2937   :  { %3013 = vrot.lane.b32.xlu0 %v3011_v47, %s4114_s29 }
0x2938   :  { %v3019_v48 = vpop.permute.xlu1 %3018 }
0x2939   :  { %3021 = vst.msk [vmem:[#allocation5] sm:$0x3] %vm661_vm1, %v3019_v48 }
0x2940   :  { %v3023_v49 = vld [vmem:[#allocation5] sm:$0x3] }
0x2941   :  { %3107 = vrot.lane.b32.xlu1 %v3023_v49, %s4114_s29 }
0x29a9   :  { %v3014_v50 = vpop.permute.xlu0 %3013 }
0x29aa   :  { %3016 = vst.msk [vmem:[#allocation4] sm:$0x3] %vm661_vm1, %v3014_v50 }
0x29b1   :  { %v3022_v51 = vld [vmem:[#allocation4] sm:$0x3] }
0x29b2   :  { %3764 = vmatmul.mubr.msk.f32.vlgmr.msra.gmra.mrb[32].mxu1 %vm667_vm3, %v3022_v51 }
0x29b3   :  { %v3108_v63 = vpop.permute.xlu1 %3107 }
0x2a85   :  { %v3094_v53 = vpop.f32.mrb[32].mxu1 }
0x2a86   :  { %v3098_v54 = vadd.f32 %v3094_v53, %v3024_v52  ;;  %v3765_v55 = vpop.f32.mrb[33].mxu1 }
0x2a88   :  { %4078 = vtanh.f32 %v3098_v54  ;;  %v3294_v57 = vmul.f32 -1.442695, %v3098_v54 }
0x2a8a   :  { %4080 = vpow2.f32 %v3294_v57 }
0x2a92   :  { %v4079_v56 = vpop.eup %4078 }
0x2a93   :  { %3112 = vrot.lane.b32.xlu0 %v4079_v56, %s4113_s3 }
0x2a94   :  { %v4081_v58 = vpop.eup %4080 }
0x2a95   :  { %v3102_v59 = vadd.f32 1.0, %v4081_v58 }
0x2a97   :  { %4082 = vrcp.f32 %v3102_v59 }
0x2aa1   :  { %v4083_v60 = vpop.eup %4082 }
0x2aa2   :  { %v3110_v0 = vmul.f32 %v4083_v60, %v3108_v63 }
0x2b05   :  { %v3113_v61 = vpop.permute.xlu0 %3112 }
0x2b06   :  { %v3115_v62 = vmul.f32 %v4083_v60, %v3113_v61 }
0x2b08   :  { %3117 = vrot.lane.b32.xlu0 %v3115_v62, %s4114_s29 }
0x2b7a   :  { %v3118_v1 = vpop.permute.xlu0 %3117 }
0x2b7b   :  { %v3120_v3 = vadd.f32 %v3118_v1, %v3110_v0 }
0x2b7d   :  { %4084 = vtanh.f32 %v3120_v3 }
0x2b87   :  { %v4085_v5 = vpop.eup %4084 }
0x2b88   :  { %3123 = vrot.lane.b32.xlu1 %v4085_v5, %s4113_s3 }
0x2b8c   :  { %3133 = vrot.lane.b32.xlu1 %v3120_v3, %s4115_s1  ;;  %s4116_s1 = smov [#allocation6]  }
0x2b8d   :  { %s3230_s17 = sshll.u32 %s4116_s1, 4  ;;  %s3231_s17 = int_to_ptr.vmem [resolvable:$true] %s3230_s17 }
0x2b8e   :  { %p4091_p1 = scmp.lt.s32.totalorder %s3231_s17, %s3231_s17 }
0x2bfa   :  { %v3124_v18 = vpop.permute.xlu1 %3123 }
0x2bfb   :  { %v3126_v19 = vmul.f32 %v4083_v60, %v3124_v18 }
0x2bfd   :  { %3128 = vrot.lane.b32.xlu0 %v3126_v19, %s4114_s29  ;;  %s4086_s29 = scalar_lea.vmem %s3231_s17, 32 }
0x2bfe   :  { %v3134_v16 = vpop.permute.xlu1 %3133  ;;  %p4087_p0 = scmp.ne.s32.totalorder %s3231_s17, %s4086_s29  ;;  %p4092_p2 = scmp.lt.s32.totalorder %s4086_s29, %s4086_s29 }
0x2bff   :  { %3136 = vst.msk [vmem:[#allocation5] sm:$0x3] %vm661_vm1, %v3134_v16 }
0x2c00   :  { %p4093_p3 = por %p4092_p2, %p4091_p1 }
0x2c02   :  { %p4094_p4 = pnand %p4093_p3, %p4087_p0 }
0x2c6f   :  { %v3129_v20 = vpop.permute.xlu0 %3128 }
0x2c70   :  { %3131 = vst.msk [vmem:[#allocation4] sm:$0x3] %vm661_vm1, %v3129_v20 }
0x2c77   :  { %v3137_v21 = vld [vmem:[#allocation4] sm:$0x3] }
0x2c78   :  { %3775 = vmatmul.mubr.msk.f32.vlgmr.msra.gmra.mrb[30].mxu0 %vm667_vm3, %v3137_v21 }
0x2d4b   :  { %v3218_v2 = vpop.f32.mrb[30].mxu0 }
0x2d4c   :  { %v3219_v22 = vadd.f32 %v3295_v8, %v3218_v2  ;;  %v3776_v23 = vpop.f32.mrb[31].mxu0 }
0x2d4e   :  { %3223 = vst.msk [vmem:[#allocation6] sm:$0x3] %vm3222_vm4, %v3219_v22 }
0x2d4f   :  { %4097 = shalt.err (!%p4094_p4)
}
0x2d50   :  { %s4098_s20 = scalar_lea.hbm %s4666_s9, 32 }
0x2d51   :  { %p4099_p5 = scmp.ne.s32.totalorder %s4666_s9, %s4098_s20  ;;  %p4102_p6 = scmp.lt.u32.totalorder %s4098_s20, %s4666_s9 }
0x2d53   :  { %p4104_p7 = pnand %p4102_p6, %p4099_p5 }
0x2d55   :  { %4107 = shalt.err (!%p4104_p7)
}
0x2d56   :  { %3233 = dma.vmem_to_hbm [thread:$0]  %s3231_s17, 32, %s4666_s9, [#allocation7]  }
0x2d57   :  { %4108 = dma.done.wait [#allocation7], 32  }
0x2d58   :  { %4109 = vsyncadd [#allocation7], 4294967264 }
0x2d59   :  { %3237 = vsyncpa [#allocation7], 1 }

</bundles_post_ra>
